<compile_context>
chip_gen: v7x
topology: tpu7x:2x2x1
jax: 0.10.0
libtpu: 0.0.40
codegen_flags: <defaults>
</compile_context>

<pallas_src>
import functools

import jax
import jax.numpy as jnp
from jax.experimental import pallas as pl
from jax.experimental.pallas import tpu as pltpu  # noqa: F401  (TPU backend assumed)


RECUR_DTYPE = jnp.bfloat16  # MXU operand dtype for the per-step recurrent dots


# ----------------------------------------------------------------------------
# In-kernel LSTM cell + wavefronted stack (values live in vregs)
# ----------------------------------------------------------------------------
def _lstm_cell(gates, c_prev, gate_mask, H):
    """One LSTM cell update from pre-activations.

    gates : (B, 4H); i/f/o columns are pre-scaled by 0.5 in the weights so the
            whole activation needs ONE full-width tanh:
            sigmoid(x) == 0.5 * tanh(x/2) + 0.5.
    c_prev: (B, H) or None (zero initial state -> f*c term vanishes).
    """
    t = jnp.tanh(gates)                                    # single EUP pass
    acts = jnp.where(gate_mask, t, 0.5 * t + 0.5)          # g lanes tanh, rest sigmoid
    i_g = acts[:, 0 * H:1 * H]
    g_g = acts[:, 2 * H:3 * H]
    o_g = acts[:, 3 * H:4 * H]
    if c_prev is None:                                     # zero init: f*c == 0
        c_new = i_g * g_g
    else:
        f_g = acts[:, 1 * H:2 * H]
        c_new = f_g * c_prev + i_g * g_g
    h_new = o_g * jnp.tanh(c_new)
    return h_new, c_new


def _run_stack(xw0, w_hh0_t, upper, init_states, gate_mask, T, B, H, emit=None):
    """Wavefronted multi-layer LSTM stack, fully unrolled.

    At wave w, layer l computes time step t = w - l, so the critical path is
    T + L - 1 waves instead of T * L serial steps; within a wave all layer
    matmuls read only the previous wave's state and therefore overlap.

    xw0        : (T*B, 4H) precomputed layer-0 input projection incl. bias
                 (one batched MXU matmul, hoisted off the recurrence).
    w_hh0_t    : (H, 4H) bf16 layer-0 recurrent weights.
    upper      : per layer l>=1: (w_cat (2H,4H) bf16 = [W_ih^T ; W_hh^T],
                 bias (1,4H) f32) — input projection fused with the recurrence.
    init_states: per-layer (h, c); (None, None) means zero initial state.
    emit       : optional callback(t, h_last) when the last layer finishes
                 step t (per-step fc head + direct output-row store).
    Returns the final per-layer (h, c) list.
    """
    L = 1 + len(upper)
    states = list(init_states)
    for w in range(T + L - 1):
        snap = list(states)                    # previous-wave snapshot (read-only)
        for l in range(L):
            t = w - l
            if not (0 <= t < T):
                continue
            h_prev, c_prev = snap[l]
            if l == 0:
                g = xw0[t * B:(t + 1) * B, :]                      # (B, 4H) static slice
                if h_prev is not None:
                    g = g + jnp.dot(h_prev.astype(RECUR_DTYPE), w_hh0_t,
                                    preferred_element_type=jnp.float32)
            else:
                w_cat, b_l = upper[l - 1]
                h_in = snap[l - 1][0]          # layer l-1 output at this same step t
                if h_prev is None:             # zero state: only the W_ih half matters
                    g = jnp.dot(h_in.astype(RECUR_DTYPE), w_cat[:H, :],
                                preferred_element_type=jnp.float32) + b_l
                else:
                    lhs = jnp.concatenate([h_in, h_prev], axis=1)  # (B, 2H) lane concat
                    g = jnp.dot(lhs.astype(RECUR_DTYPE), w_cat,
                                preferred_element_type=jnp.float32) + b_l
            h_new, c_new = _lstm_cell(g, c_prev, gate_mask, H)
            states[l] = (h_new, c_new)
            if l == L - 1 and emit is not None:
                emit(t, h_new)
    return states


# ----------------------------------------------------------------------------
# Fused whole-model kernel
# ----------------------------------------------------------------------------
def _make_fused_kernel(T_enc, T_dec, B, H, num_layers):
    def kernel(*refs):
        it = iter(refs)
        x_enc_ref = next(it)                         # (T_enc*B, F_enc) f32
        x_dec_ref = next(it)                         # (T_dec*B, F_dec) f32
        stacks = []
        for _ in range(2):                           # encoder, decoder
            w_ih0_t = next(it)[...]                  # (F, 4H)  f32, gate-scaled
            b0      = next(it)[...]                  # (1, 4H)  f32, gate-scaled
            w_hh0_t = next(it)[...]                  # (H, 4H)  bf16, gate-scaled
            upper = []
            for _ in range(num_layers - 1):
                w_cat = next(it)[...]                # (2H, 4H) bf16  [W_ih^T ; W_hh^T]
                b_l   = next(it)[...]                # (1, 4H)  f32
                upper.append((w_cat, b_l))
            stacks.append((w_ih0_t, b0, w_hh0_t, upper))
        w_eff = next(it)[...]                        # (H, 1) f32  (folded fc head)
        b_eff = next(it)[...]                        # (1, 1) f32
        y_ref = next(it)                             # (T_dec*B, 1) f32 output

        lane = jax.lax.broadcasted_iota(jnp.int32, (B, 4 * H), 1)
        gate_mask = jnp.logical_and(lane >= 2 * H, lane < 3 * H)   # tanh (g) lanes

        enc_w_ih0, enc_b0, enc_w_hh0, enc_upper = stacks[0]
        dec_w_ih0, dec_b0, dec_w_hh0, dec_upper = stacks[1]

        # Layer-0 input projections: ONE batched MXU matmul per stack, off the
        # serial recurrence critical path (f32 for accuracy, it runs once).
        xw_enc = jnp.dot(x_enc_ref[...], enc_w_ih0,
                         preferred_element_type=jnp.float32) + enc_b0
        xw_dec = jnp.dot(x_dec_ref[...], dec_w_ih0,
                         preferred_element_type=jnp.float32) + dec_b0

        # Encoder: zero initial state; only the final (h, c) per layer is kept
        # (no hidden-sequence materialization at all).
        enc_final = _run_stack(xw_enc, enc_w_hh0, enc_upper,
                               [(None, None)] * num_layers,
                               gate_mask, T_enc, B, H)

        # Decoder: starts from encoder final state; the folded fc head runs per
        # step and writes the output rows directly (off the serial chain), so
        # no (2,32) concatenates / relayouts ever happen.
        def emit(t, h_last):
            y_t = jnp.dot(h_last, w_eff,
                          preferred_element_type=jnp.float32) + b_eff   # (B, 1)
            y_ref[t * B:(t + 1) * B, :] = y_t

        _run_stack(xw_dec, dec_w_hh0, dec_upper, enc_final,
                   gate_mask, T_dec, B, H, emit=emit)

    return kernel


# ----------------------------------------------------------------------------
# One-time parameter packing (outside the per-call jitted path)
# ----------------------------------------------------------------------------
def prepare_params(params, hidden_size, num_layers):
    """Transpose, merge biases, scale i/f/o gate columns by 0.5 (half-angle
    sigmoid trick), stack W_ih/W_hh for layers >= 1, cast recurrent weights to
    bf16, and fold the fc head.  Done once; the forward call then only touches
    these pre-packed arrays."""
    H = hidden_size
    gate_scale = jnp.concatenate(
        [jnp.full((1, H), 0.5, jnp.float32),    # i
         jnp.full((1, H), 0.5, jnp.float32),    # f
         jnp.ones((1, H), jnp.float32),         # g (tanh, unscaled)
         jnp.full((1, H), 0.5, jnp.float32)],   # o
        axis=1)                                 # (1, 4H)

    packed = []
    for name in ("encoder", "decoder"):
        layers = params[name]
        w_ih, w_hh, b = layers[0]
        packed.append((w_ih.T * gate_scale).astype(jnp.float32))      # (F, 4H)
        packed.append((b.reshape(1, 4 * H) * gate_scale).astype(jnp.float32))
        packed.append((w_hh.T * gate_scale).astype(RECUR_DTYPE))      # (H, 4H)
        for l in range(1, num_layers):
            w_ih, w_hh, b = layers[l]
            w_cat = jnp.concatenate([w_ih.T, w_hh.T], axis=0)         # (2H, 4H)
            packed.append((w_cat * gate_scale).astype(RECUR_DTYPE))
            packed.append((b.reshape(1, 4 * H) * gate_scale).astype(jnp.float32))

    # Fold fc = Linear(H,16) -> Linear(16,1) (no activation in between).
    w_eff = params["fc_w1"].T @ params["fc_w2"].T                     # (H, 1)
    b_eff = (params["fc_b1"].reshape(1, -1) @ params["fc_w2"].T
             + params["fc_b2"].reshape(1, 1))                         # (1, 1)
    packed += [w_eff.astype(jnp.float32), b_eff.astype(jnp.float32)]
    return tuple(packed)


@functools.partial(jax.jit, static_argnames=("num_layers", "hidden_size"))
def rnn_model_forward(x_enc, x_dec, packed, *, num_layers, hidden_size):
    T_enc, B, F_enc = x_enc.shape
    T_dec, _, F_dec = x_dec.shape
    H = hidden_size

    kernel = _make_fused_kernel(T_enc, T_dec, B, H, num_layers)
    # Single invocation, no grid: everything (weights + activations) resident
    # in VMEM for the whole kernel; only x in and y out touch HBM.
    y = pl.pallas_call(
        kernel,
        out_shape=jax.ShapeDtypeStruct((T_dec * B, 1), jnp.float32),
    )(x_enc.reshape(T_enc * B, F_enc), x_dec.reshape(T_dec * B, F_dec), *packed)
    return y


# ----------------------------------------------------------------------------
# Pure-JAX reference (exact f32 PyTorch semantics, for correctness check only)
# ----------------------------------------------------------------------------
def _reference_forward(x_enc, x_dec, params, num_layers, H):
    def run_lstm(x, layers, h0, c0):
        T = x.shape[0]
        hs, cs = list(h0), list(c0)
        out = x
        for l, (w_ih, w_hh, b) in enumerate(layers):
            h, c = hs[l], cs[l]
            seq = []
            for t in range(T):
                gates = out[t] @ w_ih.T + h @ w_hh.T + b
                i = jax.nn.sigmoid(gates[:, 0 * H:1 * H])
                f = jax.nn.sigmoid(gates[:, 1 * H:2 * H])
                g = jnp.tanh(gates[:, 2 * H:3 * H])
                o = jax.nn.sigmoid(gates[:, 3 * H:4 * H])
                c = f * c + i * g
                h = o * jnp.tanh(c)
                seq.append(h)
            out = jnp.stack(seq)
            hs[l], cs[l] = h, c
        return out, hs, cs

    B = x_enc.shape[1]
    zeros = [jnp.zeros((B, H), jnp.float32) for _ in range(num_layers)]
    _, h_enc, c_enc = run_lstm(x_enc, params["encoder"], zeros, zeros)
    Hseq, _, _ = run_lstm(x_dec, params["decoder"], h_enc, c_enc)
    Hflat = Hseq.reshape(-1, H)
    z = Hflat @ params["fc_w1"].T + params["fc_b1"]
    return z @ params["fc_w2"].T + params["fc_b2"]


# ----------------------------------------------------------------------------
# Deterministic parameter init (PyTorch-style uniform(-1/sqrt(fan), 1/sqrt(fan)))
# ----------------------------------------------------------------------------
def init_params(key, enc_feature_size, dec_feature_size, hidden_size, num_layers):
    def uniform(k, shape, bound):
        return jax.random.uniform(k, shape, jnp.float32, -bound, bound)

    stdv = 1.0 / float(hidden_size) ** 0.5
    params = {"encoder": [], "decoder": []}

    for name, feat in (("encoder", enc_feature_size), ("decoder", dec_feature_size)):
        for layer in range(num_layers):
            in_size = feat if layer == 0 else hidden_size
            key, k1, k2, k3, k4 = jax.random.split(key, 5)
            w_ih = uniform(k1, (4 * hidden_size, in_size), stdv)
            w_hh = uniform(k2, (4 * hidden_size, hidden_size), stdv)
            b_ih = uniform(k3, (4 * hidden_size,), stdv)
            b_hh = uniform(k4, (4 * hidden_size,), stdv)
            params[name].append((w_ih, w_hh, b_ih + b_hh))

    key, k1, k2, k3, k4 = jax.random.split(key, 5)
    params["fc_w1"] = uniform(k1, (16, hidden_size), stdv)
    params["fc_b1"] = uniform(k2, (16,), stdv)
    params["fc_w2"] = uniform(k3, (1, 16), 1.0 / 16.0 ** 0.5)
    params["fc_b2"] = uniform(k4, (1,), 1.0 / 16.0 ** 0.5)
    return params


# ----------------------------------------------------------------------------
if __name__ == "__main__":
    ENC_FEAT = 4
    DEC_FEAT = 6
    HIDDEN = 32
    NUM_LAYERS = 2
    SEQ_ENC = 8
    SEQ_DEC = 8
    BATCH = 2

    key = jax.random.PRNGKey(0)
    key, kx1, kx2, kp = jax.random.split(key, 4)

    x_enc = jax.random.normal(kx1, (SEQ_ENC, BATCH, ENC_FEAT), jnp.float32)
    x_dec = jax.random.normal(kx2, (SEQ_DEC, BATCH, DEC_FEAT), jnp.float32)
    params = init_params(kp, ENC_FEAT, DEC_FEAT, HIDDEN, NUM_LAYERS)

    packed = prepare_params(params, HIDDEN, NUM_LAYERS)   # one-time weight packing

    y_hat = rnn_model_forward(x_enc, x_dec, packed,
                              num_layers=NUM_LAYERS, hidden_size=HIDDEN)
    y_hat = jax.block_until_ready(y_hat)

    assert y_hat.shape == (SEQ_DEC * BATCH, 1)
    assert bool(jnp.all(jnp.isfinite(y_hat)))

    # bf16 recurrent-dot operands (perf-review item) move the result by ~1e-4;
    # well inside the original tolerance vs. the exact f32 reference.
    y_ref = _reference_forward(x_enc, x_dec, params, NUM_LAYERS, HIDDEN)
    assert bool(jnp.allclose(y_hat, y_ref, rtol=2e-3, atol=2e-3))

    print("KERNEL_OK")
</pallas_src>

<mosaic_0001>
module attributes {stable_mosaic.version = 11 : i64} {
  func.func @kernel(%arg0: memref<16x4xf32, #tpu.memory_space<vmem>>, %arg1: memref<16x6xf32, #tpu.memory_space<vmem>>, %arg2: memref<4x128xf32, #tpu.memory_space<vmem>>, %arg3: memref<1x128xf32, #tpu.memory_space<vmem>>, %arg4: memref<32x128xbf16, #tpu.memory_space<vmem>>, %arg5: memref<64x128xbf16, #tpu.memory_space<vmem>>, %arg6: memref<1x128xf32, #tpu.memory_space<vmem>>, %arg7: memref<6x128xf32, #tpu.memory_space<vmem>>, %arg8: memref<1x128xf32, #tpu.memory_space<vmem>>, %arg9: memref<32x128xbf16, #tpu.memory_space<vmem>>, %arg10: memref<64x128xbf16, #tpu.memory_space<vmem>>, %arg11: memref<1x128xf32, #tpu.memory_space<vmem>>, %arg12: memref<32x1xf32, #tpu.memory_space<vmem>>, %arg13: memref<1x1xf32, #tpu.memory_space<vmem>>, %arg14: memref<16x1xf32, #tpu.memory_space<vmem>>) attributes {dimension_semantics = [], scalar_prefetch = 0 : i64, scratch_operands = 0 : i64, tpu.core_type = #tpu.core_type<tc>} {
    %c0 = arith.constant 0 : index
    %c0_0 = arith.constant 0 : index
    %0 = vector.load %arg2[%c0, %c0_0] : memref<4x128xf32, #tpu.memory_space<vmem>>, vector<4x128xf32>
    %c0_1 = arith.constant 0 : index
    %c0_2 = arith.constant 0 : index
    %1 = vector.load %arg3[%c0_1, %c0_2] : memref<1x128xf32, #tpu.memory_space<vmem>>, vector<1x128xf32>
    %c0_3 = arith.constant 0 : index
    %c0_4 = arith.constant 0 : index
    %2 = vector.load %arg4[%c0_3, %c0_4] : memref<32x128xbf16, #tpu.memory_space<vmem>>, vector<32x128xbf16>
    %c0_5 = arith.constant 0 : index
    %c0_6 = arith.constant 0 : index
    %3 = vector.load %arg5[%c0_5, %c0_6] : memref<64x128xbf16, #tpu.memory_space<vmem>>, vector<64x128xbf16>
    %c0_7 = arith.constant 0 : index
    %c0_8 = arith.constant 0 : index
    %4 = vector.load %arg6[%c0_7, %c0_8] : memref<1x128xf32, #tpu.memory_space<vmem>>, vector<1x128xf32>
    %c0_9 = arith.constant 0 : index
    %c0_10 = arith.constant 0 : index
    %5 = vector.load %arg7[%c0_9, %c0_10] : memref<6x128xf32, #tpu.memory_space<vmem>>, vector<6x128xf32>
    %c0_11 = arith.constant 0 : index
    %c0_12 = arith.constant 0 : index
    %6 = vector.load %arg8[%c0_11, %c0_12] : memref<1x128xf32, #tpu.memory_space<vmem>>, vector<1x128xf32>
    %c0_13 = arith.constant 0 : index
    %c0_14 = arith.constant 0 : index
    %7 = vector.load %arg9[%c0_13, %c0_14] : memref<32x128xbf16, #tpu.memory_space<vmem>>, vector<32x128xbf16>
    %c0_15 = arith.constant 0 : index
    %c0_16 = arith.constant 0 : index
    %8 = vector.load %arg10[%c0_15, %c0_16] : memref<64x128xbf16, #tpu.memory_space<vmem>>, vector<64x128xbf16>
    %c0_17 = arith.constant 0 : index
    %c0_18 = arith.constant 0 : index
    %9 = vector.load %arg11[%c0_17, %c0_18] : memref<1x128xf32, #tpu.memory_space<vmem>>, vector<1x128xf32>
    %c0_19 = arith.constant 0 : index
    %c0_20 = arith.constant 0 : index
    %10 = vector.load %arg12[%c0_19, %c0_20] : memref<32x1xf32, #tpu.memory_space<vmem>>, vector<32x1xf32>
    %c0_21 = arith.constant 0 : index
    %c0_22 = arith.constant 0 : index
    %11 = vector.load %arg13[%c0_21, %c0_22] : memref<1x1xf32, #tpu.memory_space<vmem>>, vector<1x1xf32>
    %12 = tpu.iota {dimensions = array<i32: 1>} : vector<2x128xi32>
    %c64_i32 = arith.constant 64 : i32
    %13 = vector.broadcast %c64_i32 : i32 to vector<2x128xi32>
    %14 = arith.cmpi sge, %12, %13 : vector<2x128xi32>
    %c96_i32 = arith.constant 96 : i32
    %15 = vector.broadcast %c96_i32 : i32 to vector<2x128xi32>
    %16 = arith.cmpi slt, %12, %15 : vector<2x128xi32>
    %17 = arith.andi %14, %16 : vector<2x128xi1>
    %c0_23 = arith.constant 0 : index
    %c0_24 = arith.constant 0 : index
    %18 = vector.load %arg0[%c0_23, %c0_24] : memref<16x4xf32, #tpu.memory_space<vmem>>, vector<16x4xf32>
    %cst = arith.constant dense<0.000000e+00> : vector<16x128xf32>
    %19 = tpu.matmul %18, %0, %cst {dimension_numbers = #tpu.dot_dimension_numbers<[1], [0], [0], [1], [0, 0, 1, 1], [], []>} : vector<16x4xf32>, vector<4x128xf32>, vector<16x128xf32> -> vector<16x128xf32>
    %20 = vector.broadcast %1 : vector<1x128xf32> to vector<16x128xf32>
    %21 = arith.addf %19, %20 : vector<16x128xf32>
    %c0_25 = arith.constant 0 : index
    %c0_26 = arith.constant 0 : index
    %22 = vector.load %arg1[%c0_25, %c0_26] : memref<16x6xf32, #tpu.memory_space<vmem>>, vector<16x6xf32>
    %cst_27 = arith.constant dense<0.000000e+00> : vector<16x128xf32>
    %23 = tpu.matmul %22, %5, %cst_27 {dimension_numbers = #tpu.dot_dimension_numbers<[1], [0], [0], [1], [0, 0, 1, 1], [], []>} : vector<16x6xf32>, vector<6x128xf32>, vector<16x128xf32> -> vector<16x128xf32>
    %24 = vector.broadcast %6 : vector<1x128xf32> to vector<16x128xf32>
    %25 = arith.addf %23, %24 : vector<16x128xf32>
    %26 = vector.extract_strided_slice %21 {offsets = [0, 0], sizes = [2, 128], strides = [1, 1]} : vector<16x128xf32> to vector<2x128xf32>
    %27 = math.tanh %26 : vector<2x128xf32>
    %cst_28 = arith.constant 5.000000e-01 : f32
    %28 = vector.broadcast %cst_28 : f32 to vector<2x128xf32>
    %29 = arith.mulf %28, %27 : vector<2x128xf32>
    %cst_29 = arith.constant 5.000000e-01 : f32
    %30 = vector.broadcast %cst_29 : f32 to vector<2x128xf32>
    %31 = arith.addf %29, %30 : vector<2x128xf32>
    %32 = arith.select %17, %27, %31 : vector<2x128xi1>, vector<2x128xf32>
    %33 = vector.extract_strided_slice %32 {offsets = [0, 0], sizes = [2, 32], strides = [1, 1]} : vector<2x128xf32> to vector<2x32xf32>
    %34 = vector.extract_strided_slice %32 {offsets = [0, 64], sizes = [2, 32], strides = [1, 1]} : vector<2x128xf32> to vector<2x32xf32>
    %35 = vector.extract_strided_slice %32 {offsets = [0, 96], sizes = [2, 32], strides = [1, 1]} : vector<2x128xf32> to vector<2x32xf32>
    %36 = arith.mulf %33, %34 : vector<2x32xf32>
    %37 = math.tanh %36 : vector<2x32xf32>
    %38 = arith.mulf %35, %37 : vector<2x32xf32>
    %39 = vector.extract_strided_slice %21 {offsets = [2, 0], sizes = [2, 128], strides = [1, 1]} : vector<16x128xf32> to vector<2x128xf32>
    %40 = arith.truncf %38 : vector<2x32xf32> to vector<2x32xbf16>
    %cst_30 = arith.constant dense<0.000000e+00> : vector<2x128xf32>
    %41 = tpu.matmul %40, %2, %cst_30 {dimension_numbers = #tpu.dot_dimension_numbers<[1], [0], [0], [1], [0, 0, 1, 1], [], []>} : vector<2x32xbf16>, vector<32x128xbf16>, vector<2x128xf32> -> vector<2x128xf32>
    %42 = arith.addf %39, %41 : vector<2x128xf32>
    %43 = math.tanh %42 : vector<2x128xf32>
    %cst_31 = arith.constant 5.000000e-01 : f32
    %44 = vector.broadcast %cst_31 : f32 to vector<2x128xf32>
    %45 = arith.mulf %44, %43 : vector<2x128xf32>
    %cst_32 = arith.constant 5.000000e-01 : f32
    %46 = vector.broadcast %cst_32 : f32 to vector<2x128xf32>
    %47 = arith.addf %45, %46 : vector<2x128xf32>
    %48 = arith.select %17, %43, %47 : vector<2x128xi1>, vector<2x128xf32>
    %49 = vector.extract_strided_slice %48 {offsets = [0, 0], sizes = [2, 32], strides = [1, 1]} : vector<2x128xf32> to vector<2x32xf32>
    %50 = vector.extract_strided_slice %48 {offsets = [0, 64], sizes = [2, 32], strides = [1, 1]} : vector<2x128xf32> to vector<2x32xf32>
    %51 = vector.extract_strided_slice %48 {offsets = [0, 96], sizes = [2, 32], strides = [1, 1]} : vector<2x128xf32> to vector<2x32xf32>
    %52 = vector.extract_strided_slice %48 {offsets = [0, 32], sizes = [2, 32], strides = [1, 1]} : vector<2x128xf32> to vector<2x32xf32>
    %53 = arith.mulf %52, %36 : vector<2x32xf32>
    %54 = arith.mulf %49, %50 : vector<2x32xf32>
    %55 = arith.addf %53, %54 : vector<2x32xf32>
    %56 = math.tanh %55 : vector<2x32xf32>
    %57 = arith.mulf %51, %56 : vector<2x32xf32>
    %58 = arith.truncf %38 : vector<2x32xf32> to vector<2x32xbf16>
    %59 = vector.extract_strided_slice %3 {offsets = [0, 0], sizes = [32, 128], strides = [1, 1]} : vector<64x128xbf16> to vector<32x128xbf16>
    %cst_33 = arith.constant dense<0.000000e+00> : vector<2x128xf32>
    %60 = tpu.matmul %58, %59, %cst_33 {dimension_numbers = #tpu.dot_dimension_numbers<[1], [0], [0], [1], [0, 0, 1, 1], [], []>} : vector<2x32xbf16>, vector<32x128xbf16>, vector<2x128xf32> -> vector<2x128xf32>
    %61 = vector.broadcast %4 : vector<1x128xf32> to vector<2x128xf32>
    %62 = arith.addf %60, %61 : vector<2x128xf32>
    %63 = math.tanh %62 : vector<2x128xf32>
    %cst_34 = arith.constant 5.000000e-01 : f32
    %64 = vector.broadcast %cst_34 : f32 to vector<2x128xf32>
    %65 = arith.mulf %64, %63 : vector<2x128xf32>
    %cst_35 = arith.constant 5.000000e-01 : f32
    %66 = vector.broadcast %cst_35 : f32 to vector<2x128xf32>
    %67 = arith.addf %65, %66 : vector<2x128xf32>
    %68 = arith.select %17, %63, %67 : vector<2x128xi1>, vector<2x128xf32>
    %69 = vector.extract_strided_slice %68 {offsets = [0, 0], sizes = [2, 32], strides = [1, 1]} : vector<2x128xf32> to vector<2x32xf32>
    %70 = vector.extract_strided_slice %68 {offsets = [0, 64], sizes = [2, 32], strides = [1, 1]} : vector<2x128xf32> to vector<2x32xf32>
    %71 = vector.extract_strided_slice %68 {offsets = [0, 96], sizes = [2, 32], strides = [1, 1]} : vector<2x128xf32> to vector<2x32xf32>
    %72 = arith.mulf %69, %70 : vector<2x32xf32>
    %73 = math.tanh %72 : vector<2x32xf32>
    %74 = arith.mulf %71, %73 : vector<2x32xf32>
    %75 = vector.extract_strided_slice %21 {offsets = [4, 0], sizes = [2, 128], strides = [1, 1]} : vector<16x128xf32> to vector<2x128xf32>
    %76 = arith.truncf %57 : vector<2x32xf32> to vector<2x32xbf16>
    %cst_36 = arith.constant dense<0.000000e+00> : vector<2x128xf32>
    %77 = tpu.matmul %76, %2, %cst_36 {dimension_numbers = #tpu.dot_dimension_numbers<[1], [0], [0], [1], [0, 0, 1, 1], [], []>} : vector<2x32xbf16>, vector<32x128xbf16>, vector<2x128xf32> -> vector<2x128xf32>
    %78 = arith.addf %75, %77 : vector<2x128xf32>
    %79 = math.tanh %78 : vector<2x128xf32>
    %cst_37 = arith.constant 5.000000e-01 : f32
    %80 = vector.broadcast %cst_37 : f32 to vector<2x128xf32>
    %81 = arith.mulf %80, %79 : vector<2x128xf32>
    %cst_38 = arith.constant 5.000000e-01 : f32
    %82 = vector.broadcast %cst_38 : f32 to vector<2x128xf32>
    %83 = arith.addf %81, %82 : vector<2x128xf32>
    %84 = arith.select %17, %79, %83 : vector<2x128xi1>, vector<2x128xf32>
    %85 = vector.extract_strided_slice %84 {offsets = [0, 0], sizes = [2, 32], strides = [1, 1]} : vector<2x128xf32> to vector<2x32xf32>
    %86 = vector.extract_strided_slice %84 {offsets = [0, 64], sizes = [2, 32], strides = [1, 1]} : vector<2x128xf32> to vector<2x32xf32>
    %87 = vector.extract_strided_slice %84 {offsets = [0, 96], sizes = [2, 32], strides = [1, 1]} : vector<2x128xf32> to vector<2x32xf32>
    %88 = vector.extract_strided_slice %84 {offsets = [0, 32], sizes = [2, 32], strides = [1, 1]} : vector<2x128xf32> to vector<2x32xf32>
    %89 = arith.mulf %88, %55 : vector<2x32xf32>
    %90 = arith.mulf %85, %86 : vector<2x32xf32>
    %91 = arith.addf %89, %90 : vector<2x32xf32>
    %92 = math.tanh %91 : vector<2x32xf32>
    %93 = arith.mulf %87, %92 : vector<2x32xf32>
    %94 = tpu.concatenate %57, %74 in 1 : vector<2x32xf32>, vector<2x32xf32> -> vector<2x64xf32>
    %95 = arith.truncf %94 : vector<2x64xf32> to vector<2x64xbf16>
    %cst_39 = arith.constant dense<0.000000e+00> : vector<2x128xf32>
    %96 = tpu.matmul %95, %3, %cst_39 {dimension_numbers = #tpu.dot_dimension_numbers<[1], [0], [0], [1], [0, 0, 1, 1], [], []>} : vector<2x64xbf16>, vector<64x128xbf16>, vector<2x128xf32> -> vector<2x128xf32>
    %97 = vector.broadcast %4 : vector<1x128xf32> to vector<2x128xf32>
    %98 = arith.addf %96, %97 : vector<2x128xf32>
    %99 = math.tanh %98 : vector<2x128xf32>
    %cst_40 = arith.constant 5.000000e-01 : f32
    %100 = vector.broadcast %cst_40 : f32 to vector<2x128xf32>
    %101 = arith.mulf %100, %99 : vector<2x128xf32>
    %cst_41 = arith.constant 5.000000e-01 : f32
    %102 = vector.broadcast %cst_41 : f32 to vector<2x128xf32>
    %103 = arith.addf %101, %102 : vector<2x128xf32>
    %104 = arith.select %17, %99, %103 : vector<2x128xi1>, vector<2x128xf32>
    %105 = vector.extract_strided_slice %104 {offsets = [0, 0], sizes = [2, 32], strides = [1, 1]} : vector<2x128xf32> to vector<2x32xf32>
    %106 = vector.extract_strided_slice %104 {offsets = [0, 64], sizes = [2, 32], strides = [1, 1]} : vector<2x128xf32> to vector<2x32xf32>
    %107 = vector.extract_strided_slice %104 {offsets = [0, 96], sizes = [2, 32], strides = [1, 1]} : vector<2x128xf32> to vector<2x32xf32>
    %108 = vector.extract_strided_slice %104 {offsets = [0, 32], sizes = [2, 32], strides = [1, 1]} : vector<2x128xf32> to vector<2x32xf32>
    %109 = arith.mulf %108, %72 : vector<2x32xf32>
    %110 = arith.mulf %105, %106 : vector<2x32xf32>
    %111 = arith.addf %109, %110 : vector<2x32xf32>
    %112 = math.tanh %111 : vector<2x32xf32>
    %113 = arith.mulf %107, %112 : vector<2x32xf32>
    %114 = vector.extract_strided_slice %21 {offsets = [6, 0], sizes = [2, 128], strides = [1, 1]} : vector<16x128xf32> to vector<2x128xf32>
    %115 = arith.truncf %93 : vector<2x32xf32> to vector<2x32xbf16>
    %cst_42 = arith.constant dense<0.000000e+00> : vector<2x128xf32>
    %116 = tpu.matmul %115, %2, %cst_42 {dimension_numbers = #tpu.dot_dimension_numbers<[1], [0], [0], [1], [0, 0, 1, 1], [], []>} : vector<2x32xbf16>, vector<32x128xbf16>, vector<2x128xf32> -> vector<2x128xf32>
    %117 = arith.addf %114, %116 : vector<2x128xf32>
    %118 = math.tanh %117 : vector<2x128xf32>
    %cst_43 = arith.constant 5.000000e-01 : f32
    %119 = vector.broadcast %cst_43 : f32 to vector<2x128xf32>
    %120 = arith.mulf %119, %118 : vector<2x128xf32>
    %cst_44 = arith.constant 5.000000e-01 : f32
    %121 = vector.broadcast %cst_44 : f32 to vector<2x128xf32>
    %122 = arith.addf %120, %121 : vector<2x128xf32>
    %123 = arith.select %17, %118, %122 : vector<2x128xi1>, vector<2x128xf32>
    %124 = vector.extract_strided_slice %123 {offsets = [0, 0], sizes = [2, 32], strides = [1, 1]} : vector<2x128xf32> to vector<2x32xf32>
    %125 = vector.extract_strided_slice %123 {offsets = [0, 64], sizes = [2, 32], strides = [1, 1]} : vector<2x128xf32> to vector<2x32xf32>
    %126 = vector.extract_strided_slice %123 {offsets = [0, 96], sizes = [2, 32], strides = [1, 1]} : vector<2x128xf32> to vector<2x32xf32>
    %127 = vector.extract_strided_slice %123 {offsets = [0, 32], sizes = [2, 32], strides = [1, 1]} : vector<2x128xf32> to vector<2x32xf32>
    %128 = arith.mulf %127, %91 : vector<2x32xf32>
    %129 = arith.mulf %124, %125 : vector<2x32xf32>
    %130 = arith.addf %128, %129 : vector<2x32xf32>
    %131 = math.tanh %130 : vector<2x32xf32>
    %132 = arith.mulf %126, %131 : vector<2x32xf32>
    %133 = tpu.concatenate %93, %113 in 1 : vector<2x32xf32>, vector<2x32xf32> -> vector<2x64xf32>
    %134 = arith.truncf %133 : vector<2x64xf32> to vector<2x64xbf16>
    %cst_45 = arith.constant dense<0.000000e+00> : vector<2x128xf32>
    %135 = tpu.matmul %134, %3, %cst_45 {dimension_numbers = #tpu.dot_dimension_numbers<[1], [0], [0], [1], [0, 0, 1, 1], [], []>} : vector<2x64xbf16>, vector<64x128xbf16>, vector<2x128xf32> -> vector<2x128xf32>
    %136 = vector.broadcast %4 : vector<1x128xf32> to vector<2x128xf32>
    %137 = arith.addf %135, %136 : vector<2x128xf32>
    %138 = math.tanh %137 : vector<2x128xf32>
    %cst_46 = arith.constant 5.000000e-01 : f32
    %139 = vector.broadcast %cst_46 : f32 to vector<2x128xf32>
    %140 = arith.mulf %139, %138 : vector<2x128xf32>
    %cst_47 = arith.constant 5.000000e-01 : f32
    %141 = vector.broadcast %cst_47 : f32 to vector<2x128xf32>
    %142 = arith.addf %140, %141 : vector<2x128xf32>
    %143 = arith.select %17, %138, %142 : vector<2x128xi1>, vector<2x128xf32>
    %144 = vector.extract_strided_slice %143 {offsets = [0, 0], sizes = [2, 32], strides = [1, 1]} : vector<2x128xf32> to vector<2x32xf32>
    %145 = vector.extract_strided_slice %143 {offsets = [0, 64], sizes = [2, 32], strides = [1, 1]} : vector<2x128xf32> to vector<2x32xf32>
    %146 = vector.extract_strided_slice %143 {offsets = [0, 96], sizes = [2, 32], strides = [1, 1]} : vector<2x128xf32> to vector<2x32xf32>
    %147 = vector.extract_strided_slice %143 {offsets = [0, 32], sizes = [2, 32], strides = [1, 1]} : vector<2x128xf32> to vector<2x32xf32>
    %148 = arith.mulf %147, %111 : vector<2x32xf32>
    %149 = arith.mulf %144, %145 : vector<2x32xf32>
    %150 = arith.addf %148, %149 : vector<2x32xf32>
    %151 = math.tanh %150 : vector<2x32xf32>
    %152 = arith.mulf %146, %151 : vector<2x32xf32>
    %153 = vector.extract_strided_slice %21 {offsets = [8, 0], sizes = [2, 128], strides = [1, 1]} : vector<16x128xf32> to vector<2x128xf32>
    %154 = arith.truncf %132 : vector<2x32xf32> to vector<2x32xbf16>
    %cst_48 = arith.constant dense<0.000000e+00> : vector<2x128xf32>
    %155 = tpu.matmul %154, %2, %cst_48 {dimension_numbers = #tpu.dot_dimension_numbers<[1], [0], [0], [1], [0, 0, 1, 1], [], []>} : vector<2x32xbf16>, vector<32x128xbf16>, vector<2x128xf32> -> vector<2x128xf32>
    %156 = arith.addf %153, %155 : vector<2x128xf32>
    %157 = math.tanh %156 : vector<2x128xf32>
    %cst_49 = arith.constant 5.000000e-01 : f32
    %158 = vector.broadcast %cst_49 : f32 to vector<2x128xf32>
    %159 = arith.mulf %158, %157 : vector<2x128xf32>
    %cst_50 = arith.constant 5.000000e-01 : f32
    %160 = vector.broadcast %cst_50 : f32 to vector<2x128xf32>
    %161 = arith.addf %159, %160 : vector<2x128xf32>
    %162 = arith.select %17, %157, %161 : vector<2x128xi1>, vector<2x128xf32>
    %163 = vector.extract_strided_slice %162 {offsets = [0, 0], sizes = [2, 32], strides = [1, 1]} : vector<2x128xf32> to vector<2x32xf32>
    %164 = vector.extract_strided_slice %162 {offsets = [0, 64], sizes = [2, 32], strides = [1, 1]} : vector<2x128xf32> to vector<2x32xf32>
    %165 = vector.extract_strided_slice %162 {offsets = [0, 96], sizes = [2, 32], strides = [1, 1]} : vector<2x128xf32> to vector<2x32xf32>
    %166 = vector.extract_strided_slice %162 {offsets = [0, 32], sizes = [2, 32], strides = [1, 1]} : vector<2x128xf32> to vector<2x32xf32>
    %167 = arith.mulf %166, %130 : vector<2x32xf32>
    %168 = arith.mulf %163, %164 : vector<2x32xf32>
    %169 = arith.addf %167, %168 : vector<2x32xf32>
    %170 = math.tanh %169 : vector<2x32xf32>
    %171 = arith.mulf %165, %170 : vector<2x32xf32>
    %172 = tpu.concatenate %132, %152 in 1 : vector<2x32xf32>, vector<2x32xf32> -> vector<2x64xf32>
    %173 = arith.truncf %172 : vector<2x64xf32> to vector<2x64xbf16>
    %cst_51 = arith.constant dense<0.000000e+00> : vector<2x128xf32>
    %174 = tpu.matmul %173, %3, %cst_51 {dimension_numbers = #tpu.dot_dimension_numbers<[1], [0], [0], [1], [0, 0, 1, 1], [], []>} : vector<2x64xbf16>, vector<64x128xbf16>, vector<2x128xf32> -> vector<2x128xf32>
    %175 = vector.broadcast %4 : vector<1x128xf32> to vector<2x128xf32>
    %176 = arith.addf %174, %175 : vector<2x128xf32>
    %177 = math.tanh %176 : vector<2x128xf32>
    %cst_52 = arith.constant 5.000000e-01 : f32
    %178 = vector.broadcast %cst_52 : f32 to vector<2x128xf32>
    %179 = arith.mulf %178, %177 : vector<2x128xf32>
    %cst_53 = arith.constant 5.000000e-01 : f32
    %180 = vector.broadcast %cst_53 : f32 to vector<2x128xf32>
    %181 = arith.addf %179, %180 : vector<2x128xf32>
    %182 = arith.select %17, %177, %181 : vector<2x128xi1>, vector<2x128xf32>
    %183 = vector.extract_strided_slice %182 {offsets = [0, 0], sizes = [2, 32], strides = [1, 1]} : vector<2x128xf32> to vector<2x32xf32>
    %184 = vector.extract_strided_slice %182 {offsets = [0, 64], sizes = [2, 32], strides = [1, 1]} : vector<2x128xf32> to vector<2x32xf32>
    %185 = vector.extract_strided_slice %182 {offsets = [0, 96], sizes = [2, 32], strides = [1, 1]} : vector<2x128xf32> to vector<2x32xf32>
    %186 = vector.extract_strided_slice %182 {offsets = [0, 32], sizes = [2, 32], strides = [1, 1]} : vector<2x128xf32> to vector<2x32xf32>
    %187 = arith.mulf %186, %150 : vector<2x32xf32>
    %188 = arith.mulf %183, %184 : vector<2x32xf32>
    %189 = arith.addf %187, %188 : vector<2x32xf32>
    %190 = math.tanh %189 : vector<2x32xf32>
    %191 = arith.mulf %185, %190 : vector<2x32xf32>
    %192 = vector.extract_strided_slice %21 {offsets = [10, 0], sizes = [2, 128], strides = [1, 1]} : vector<16x128xf32> to vector<2x128xf32>
    %193 = arith.truncf %171 : vector<2x32xf32> to vector<2x32xbf16>
    %cst_54 = arith.constant dense<0.000000e+00> : vector<2x128xf32>
    %194 = tpu.matmul %193, %2, %cst_54 {dimension_numbers = #tpu.dot_dimension_numbers<[1], [0], [0], [1], [0, 0, 1, 1], [], []>} : vector<2x32xbf16>, vector<32x128xbf16>, vector<2x128xf32> -> vector<2x128xf32>
    %195 = arith.addf %192, %194 : vector<2x128xf32>
    %196 = math.tanh %195 : vector<2x128xf32>
    %cst_55 = arith.constant 5.000000e-01 : f32
    %197 = vector.broadcast %cst_55 : f32 to vector<2x128xf32>
    %198 = arith.mulf %197, %196 : vector<2x128xf32>
    %cst_56 = arith.constant 5.000000e-01 : f32
    %199 = vector.broadcast %cst_56 : f32 to vector<2x128xf32>
    %200 = arith.addf %198, %199 : vector<2x128xf32>
    %201 = arith.select %17, %196, %200 : vector<2x128xi1>, vector<2x128xf32>
    %202 = vector.extract_strided_slice %201 {offsets = [0, 0], sizes = [2, 32], strides = [1, 1]} : vector<2x128xf32> to vector<2x32xf32>
    %203 = vector.extract_strided_slice %201 {offsets = [0, 64], sizes = [2, 32], strides = [1, 1]} : vector<2x128xf32> to vector<2x32xf32>
    %204 = vector.extract_strided_slice %201 {offsets = [0, 96], sizes = [2, 32], strides = [1, 1]} : vector<2x128xf32> to vector<2x32xf32>
    %205 = vector.extract_strided_slice %201 {offsets = [0, 32], sizes = [2, 32], strides = [1, 1]} : vector<2x128xf32> to vector<2x32xf32>
    %206 = arith.mulf %205, %169 : vector<2x32xf32>
    %207 = arith.mulf %202, %203 : vector<2x32xf32>
    %208 = arith.addf %206, %207 : vector<2x32xf32>
    %209 = math.tanh %208 : vector<2x32xf32>
    %210 = arith.mulf %204, %209 : vector<2x32xf32>
    %211 = tpu.concatenate %171, %191 in 1 : vector<2x32xf32>, vector<2x32xf32> -> vector<2x64xf32>
    %212 = arith.truncf %211 : vector<2x64xf32> to vector<2x64xbf16>
    %cst_57 = arith.constant dense<0.000000e+00> : vector<2x128xf32>
    %213 = tpu.matmul %212, %3, %cst_57 {dimension_numbers = #tpu.dot_dimension_numbers<[1], [0], [0], [1], [0, 0, 1, 1], [], []>} : vector<2x64xbf16>, vector<64x128xbf16>, vector<2x128xf32> -> vector<2x128xf32>
    %214 = vector.broadcast %4 : vector<1x128xf32> to vector<2x128xf32>
    %215 = arith.addf %213, %214 : vector<2x128xf32>
    %216 = math.tanh %215 : vector<2x128xf32>
    %cst_58 = arith.constant 5.000000e-01 : f32
    %217 = vector.broadcast %cst_58 : f32 to vector<2x128xf32>
    %218 = arith.mulf %217, %216 : vector<2x128xf32>
    %cst_59 = arith.constant 5.000000e-01 : f32
    %219 = vector.broadcast %cst_59 : f32 to vector<2x128xf32>
    %220 = arith.addf %218, %219 : vector<2x128xf32>
    %221 = arith.select %17, %216, %220 : vector<2x128xi1>, vector<2x128xf32>
    %222 = vector.extract_strided_slice %221 {offsets = [0, 0], sizes = [2, 32], strides = [1, 1]} : vector<2x128xf32> to vector<2x32xf32>
    %223 = vector.extract_strided_slice %221 {offsets = [0, 64], sizes = [2, 32], strides = [1, 1]} : vector<2x128xf32> to vector<2x32xf32>
    %224 = vector.extract_strided_slice %221 {offsets = [0, 96], sizes = [2, 32], strides = [1, 1]} : vector<2x128xf32> to vector<2x32xf32>
    %225 = vector.extract_strided_slice %221 {offsets = [0, 32], sizes = [2, 32], strides = [1, 1]} : vector<2x128xf32> to vector<2x32xf32>
    %226 = arith.mulf %225, %189 : vector<2x32xf32>
    %227 = arith.mulf %222, %223 : vector<2x32xf32>
    %228 = arith.addf %226, %227 : vector<2x32xf32>
    %229 = math.tanh %228 : vector<2x32xf32>
    %230 = arith.mulf %224, %229 : vector<2x32xf32>
    %231 = vector.extract_strided_slice %21 {offsets = [12, 0], sizes = [2, 128], strides = [1, 1]} : vector<16x128xf32> to vector<2x128xf32>
    %232 = arith.truncf %210 : vector<2x32xf32> to vector<2x32xbf16>
    %cst_60 = arith.constant dense<0.000000e+00> : vector<2x128xf32>
    %233 = tpu.matmul %232, %2, %cst_60 {dimension_numbers = #tpu.dot_dimension_numbers<[1], [0], [0], [1], [0, 0, 1, 1], [], []>} : vector<2x32xbf16>, vector<32x128xbf16>, vector<2x128xf32> -> vector<2x128xf32>
    %234 = arith.addf %231, %233 : vector<2x128xf32>
    %235 = math.tanh %234 : vector<2x128xf32>
    %cst_61 = arith.constant 5.000000e-01 : f32
    %236 = vector.broadcast %cst_61 : f32 to vector<2x128xf32>
    %237 = arith.mulf %236, %235 : vector<2x128xf32>
    %cst_62 = arith.constant 5.000000e-01 : f32
    %238 = vector.broadcast %cst_62 : f32 to vector<2x128xf32>
    %239 = arith.addf %237, %238 : vector<2x128xf32>
    %240 = arith.select %17, %235, %239 : vector<2x128xi1>, vector<2x128xf32>
    %241 = vector.extract_strided_slice %240 {offsets = [0, 0], sizes = [2, 32], strides = [1, 1]} : vector<2x128xf32> to vector<2x32xf32>
    %242 = vector.extract_strided_slice %240 {offsets = [0, 64], sizes = [2, 32], strides = [1, 1]} : vector<2x128xf32> to vector<2x32xf32>
    %243 = vector.extract_strided_slice %240 {offsets = [0, 96], sizes = [2, 32], strides = [1, 1]} : vector<2x128xf32> to vector<2x32xf32>
    %244 = vector.extract_strided_slice %240 {offsets = [0, 32], sizes = [2, 32], strides = [1, 1]} : vector<2x128xf32> to vector<2x32xf32>
    %245 = arith.mulf %244, %208 : vector<2x32xf32>
    %246 = arith.mulf %241, %242 : vector<2x32xf32>
    %247 = arith.addf %245, %246 : vector<2x32xf32>
    %248 = math.tanh %247 : vector<2x32xf32>
    %249 = arith.mulf %243, %248 : vector<2x32xf32>
    %250 = tpu.concatenate %210, %230 in 1 : vector<2x32xf32>, vector<2x32xf32> -> vector<2x64xf32>
    %251 = arith.truncf %250 : vector<2x64xf32> to vector<2x64xbf16>
    %cst_63 = arith.constant dense<0.000000e+00> : vector<2x128xf32>
    %252 = tpu.matmul %251, %3, %cst_63 {dimension_numbers = #tpu.dot_dimension_numbers<[1], [0], [0], [1], [0, 0, 1, 1], [], []>} : vector<2x64xbf16>, vector<64x128xbf16>, vector<2x128xf32> -> vector<2x128xf32>
    %253 = vector.broadcast %4 : vector<1x128xf32> to vector<2x128xf32>
    %254 = arith.addf %252, %253 : vector<2x128xf32>
    %255 = math.tanh %254 : vector<2x128xf32>
    %cst_64 = arith.constant 5.000000e-01 : f32
    %256 = vector.broadcast %cst_64 : f32 to vector<2x128xf32>
    %257 = arith.mulf %256, %255 : vector<2x128xf32>
    %cst_65 = arith.constant 5.000000e-01 : f32
    %258 = vector.broadcast %cst_65 : f32 to vector<2x128xf32>
    %259 = arith.addf %257, %258 : vector<2x128xf32>
    %260 = arith.select %17, %255, %259 : vector<2x128xi1>, vector<2x128xf32>
    %261 = vector.extract_strided_slice %260 {offsets = [0, 0], sizes = [2, 32], strides = [1, 1]} : vector<2x128xf32> to vector<2x32xf32>
    %262 = vector.extract_strided_slice %260 {offsets = [0, 64], sizes = [2, 32], strides = [1, 1]} : vector<2x128xf32> to vector<2x32xf32>
    %263 = vector.extract_strided_slice %260 {offsets = [0, 96], sizes = [2, 32], strides = [1, 1]} : vector<2x128xf32> to vector<2x32xf32>
    %264 = vector.extract_strided_slice %260 {offsets = [0, 32], sizes = [2, 32], strides = [1, 1]} : vector<2x128xf32> to vector<2x32xf32>
    %265 = arith.mulf %264, %228 : vector<2x32xf32>
    %266 = arith.mulf %261, %262 : vector<2x32xf32>
    %267 = arith.addf %265, %266 : vector<2x32xf32>
    %268 = math.tanh %267 : vector<2x32xf32>
    %269 = arith.mulf %263, %268 : vector<2x32xf32>
    %270 = vector.extract_strided_slice %21 {offsets = [14, 0], sizes = [2, 128], strides = [1, 1]} : vector<16x128xf32> to vector<2x128xf32>
    %271 = arith.truncf %249 : vector<2x32xf32> to vector<2x32xbf16>
    %cst_66 = arith.constant dense<0.000000e+00> : vector<2x128xf32>
    %272 = tpu.matmul %271, %2, %cst_66 {dimension_numbers = #tpu.dot_dimension_numbers<[1], [0], [0], [1], [0, 0, 1, 1], [], []>} : vector<2x32xbf16>, vector<32x128xbf16>, vector<2x128xf32> -> vector<2x128xf32>
    %273 = arith.addf %270, %272 : vector<2x128xf32>
    %274 = math.tanh %273 : vector<2x128xf32>
    %cst_67 = arith.constant 5.000000e-01 : f32
    %275 = vector.broadcast %cst_67 : f32 to vector<2x128xf32>
    %276 = arith.mulf %275, %274 : vector<2x128xf32>
    %cst_68 = arith.constant 5.000000e-01 : f32
    %277 = vector.broadcast %cst_68 : f32 to vector<2x128xf32>
    %278 = arith.addf %276, %277 : vector<2x128xf32>
    %279 = arith.select %17, %274, %278 : vector<2x128xi1>, vector<2x128xf32>
    %280 = vector.extract_strided_slice %279 {offsets = [0, 0], sizes = [2, 32], strides = [1, 1]} : vector<2x128xf32> to vector<2x32xf32>
    %281 = vector.extract_strided_slice %279 {offsets = [0, 64], sizes = [2, 32], strides = [1, 1]} : vector<2x128xf32> to vector<2x32xf32>
    %282 = vector.extract_strided_slice %279 {offsets = [0, 96], sizes = [2, 32], strides = [1, 1]} : vector<2x128xf32> to vector<2x32xf32>
    %283 = vector.extract_strided_slice %279 {offsets = [0, 32], sizes = [2, 32], strides = [1, 1]} : vector<2x128xf32> to vector<2x32xf32>
    %284 = arith.mulf %283, %247 : vector<2x32xf32>
    %285 = arith.mulf %280, %281 : vector<2x32xf32>
    %286 = arith.addf %284, %285 : vector<2x32xf32>
    %287 = math.tanh %286 : vector<2x32xf32>
    %288 = arith.mulf %282, %287 : vector<2x32xf32>
    %289 = tpu.concatenate %249, %269 in 1 : vector<2x32xf32>, vector<2x32xf32> -> vector<2x64xf32>
    %290 = arith.truncf %289 : vector<2x64xf32> to vector<2x64xbf16>
    %cst_69 = arith.constant dense<0.000000e+00> : vector<2x128xf32>
    %291 = tpu.matmul %290, %3, %cst_69 {dimension_numbers = #tpu.dot_dimension_numbers<[1], [0], [0], [1], [0, 0, 1, 1], [], []>} : vector<2x64xbf16>, vector<64x128xbf16>, vector<2x128xf32> -> vector<2x128xf32>
    %292 = vector.broadcast %4 : vector<1x128xf32> to vector<2x128xf32>
    %293 = arith.addf %291, %292 : vector<2x128xf32>
    %294 = math.tanh %293 : vector<2x128xf32>
    %cst_70 = arith.constant 5.000000e-01 : f32
    %295 = vector.broadcast %cst_70 : f32 to vector<2x128xf32>
    %296 = arith.mulf %295, %294 : vector<2x128xf32>
    %cst_71 = arith.constant 5.000000e-01 : f32
    %297 = vector.broadcast %cst_71 : f32 to vector<2x128xf32>
    %298 = arith.addf %296, %297 : vector<2x128xf32>
    %299 = arith.select %17, %294, %298 : vector<2x128xi1>, vector<2x128xf32>
    %300 = vector.extract_strided_slice %299 {offsets = [0, 0], sizes = [2, 32], strides = [1, 1]} : vector<2x128xf32> to vector<2x32xf32>
    %301 = vector.extract_strided_slice %299 {offsets = [0, 64], sizes = [2, 32], strides = [1, 1]} : vector<2x128xf32> to vector<2x32xf32>
    %302 = vector.extract_strided_slice %299 {offsets = [0, 96], sizes = [2, 32], strides = [1, 1]} : vector<2x128xf32> to vector<2x32xf32>
    %303 = vector.extract_strided_slice %299 {offsets = [0, 32], sizes = [2, 32], strides = [1, 1]} : vector<2x128xf32> to vector<2x32xf32>
    %304 = arith.mulf %303, %267 : vector<2x32xf32>
    %305 = arith.mulf %300, %301 : vector<2x32xf32>
    %306 = arith.addf %304, %305 : vector<2x32xf32>
    %307 = math.tanh %306 : vector<2x32xf32>
    %308 = arith.mulf %302, %307 : vector<2x32xf32>
    %309 = tpu.concatenate %288, %308 in 1 : vector<2x32xf32>, vector<2x32xf32> -> vector<2x64xf32>
    %310 = arith.truncf %309 : vector<2x64xf32> to vector<2x64xbf16>
    %cst_72 = arith.constant dense<0.000000e+00> : vector<2x128xf32>
    %311 = tpu.matmul %310, %3, %cst_72 {dimension_numbers = #tpu.dot_dimension_numbers<[1], [0], [0], [1], [0, 0, 1, 1], [], []>} : vector<2x64xbf16>, vector<64x128xbf16>, vector<2x128xf32> -> vector<2x128xf32>
    %312 = vector.broadcast %4 : vector<1x128xf32> to vector<2x128xf32>
    %313 = arith.addf %311, %312 : vector<2x128xf32>
    %314 = math.tanh %313 : vector<2x128xf32>
    %cst_73 = arith.constant 5.000000e-01 : f32
    %315 = vector.broadcast %cst_73 : f32 to vector<2x128xf32>
    %316 = arith.mulf %315, %314 : vector<2x128xf32>
    %cst_74 = arith.constant 5.000000e-01 : f32
    %317 = vector.broadcast %cst_74 : f32 to vector<2x128xf32>
    %318 = arith.addf %316, %317 : vector<2x128xf32>
    %319 = arith.select %17, %314, %318 : vector<2x128xi1>, vector<2x128xf32>
    %320 = vector.extract_strided_slice %319 {offsets = [0, 0], sizes = [2, 32], strides = [1, 1]} : vector<2x128xf32> to vector<2x32xf32>
    %321 = vector.extract_strided_slice %319 {offsets = [0, 64], sizes = [2, 32], strides = [1, 1]} : vector<2x128xf32> to vector<2x32xf32>
    %322 = vector.extract_strided_slice %319 {offsets = [0, 96], sizes = [2, 32], strides = [1, 1]} : vector<2x128xf32> to vector<2x32xf32>
    %323 = vector.extract_strided_slice %319 {offsets = [0, 32], sizes = [2, 32], strides = [1, 1]} : vector<2x128xf32> to vector<2x32xf32>
    %324 = arith.mulf %323, %306 : vector<2x32xf32>
    %325 = arith.mulf %320, %321 : vector<2x32xf32>
    %326 = arith.addf %324, %325 : vector<2x32xf32>
    %327 = math.tanh %326 : vector<2x32xf32>
    %328 = arith.mulf %322, %327 : vector<2x32xf32>
    %329 = vector.extract_strided_slice %25 {offsets = [0, 0], sizes = [2, 128], strides = [1, 1]} : vector<16x128xf32> to vector<2x128xf32>
    %330 = arith.truncf %288 : vector<2x32xf32> to vector<2x32xbf16>
    %cst_75 = arith.constant dense<0.000000e+00> : vector<2x128xf32>
    %331 = tpu.matmul %330, %7, %cst_75 {dimension_numbers = #tpu.dot_dimension_numbers<[1], [0], [0], [1], [0, 0, 1, 1], [], []>} : vector<2x32xbf16>, vector<32x128xbf16>, vector<2x128xf32> -> vector<2x128xf32>
    %332 = arith.addf %329, %331 : vector<2x128xf32>
    %333 = math.tanh %332 : vector<2x128xf32>
    %cst_76 = arith.constant 5.000000e-01 : f32
    %334 = vector.broadcast %cst_76 : f32 to vector<2x128xf32>
    %335 = arith.mulf %334, %333 : vector<2x128xf32>
    %cst_77 = arith.constant 5.000000e-01 : f32
    %336 = vector.broadcast %cst_77 : f32 to vector<2x128xf32>
    %337 = arith.addf %335, %336 : vector<2x128xf32>
    %338 = arith.select %17, %333, %337 : vector<2x128xi1>, vector<2x128xf32>
    %339 = vector.extract_strided_slice %338 {offsets = [0, 0], sizes = [2, 32], strides = [1, 1]} : vector<2x128xf32> to vector<2x32xf32>
    %340 = vector.extract_strided_slice %338 {offsets = [0, 64], sizes = [2, 32], strides = [1, 1]} : vector<2x128xf32> to vector<2x32xf32>
    %341 = vector.extract_strided_slice %338 {offsets = [0, 96], sizes = [2, 32], strides = [1, 1]} : vector<2x128xf32> to vector<2x32xf32>
    %342 = vector.extract_strided_slice %338 {offsets = [0, 32], sizes = [2, 32], strides = [1, 1]} : vector<2x128xf32> to vector<2x32xf32>
    %343 = arith.mulf %342, %286 : vector<2x32xf32>
    %344 = arith.mulf %339, %340 : vector<2x32xf32>
    %345 = arith.addf %343, %344 : vector<2x32xf32>
    %346 = math.tanh %345 : vector<2x32xf32>
    %347 = arith.mulf %341, %346 : vector<2x32xf32>
    %348 = vector.extract_strided_slice %25 {offsets = [2, 0], sizes = [2, 128], strides = [1, 1]} : vector<16x128xf32> to vector<2x128xf32>
    %349 = arith.truncf %347 : vector<2x32xf32> to vector<2x32xbf16>
    %cst_78 = arith.constant dense<0.000000e+00> : vector<2x128xf32>
    %350 = tpu.matmul %349, %7, %cst_78 {dimension_numbers = #tpu.dot_dimension_numbers<[1], [0], [0], [1], [0, 0, 1, 1], [], []>} : vector<2x32xbf16>, vector<32x128xbf16>, vector<2x128xf32> -> vector<2x128xf32>
    %351 = arith.addf %348, %350 : vector<2x128xf32>
    %352 = math.tanh %351 : vector<2x128xf32>
    %cst_79 = arith.constant 5.000000e-01 : f32
    %353 = vector.broadcast %cst_79 : f32 to vector<2x128xf32>
    %354 = arith.mulf %353, %352 : vector<2x128xf32>
    %cst_80 = arith.constant 5.000000e-01 : f32
    %355 = vector.broadcast %cst_80 : f32 to vector<2x128xf32>
    %356 = arith.addf %354, %355 : vector<2x128xf32>
    %357 = arith.select %17, %352, %356 : vector<2x128xi1>, vector<2x128xf32>
    %358 = vector.extract_strided_slice %357 {offsets = [0, 0], sizes = [2, 32], strides = [1, 1]} : vector<2x128xf32> to vector<2x32xf32>
    %359 = vector.extract_strided_slice %357 {offsets = [0, 64], sizes = [2, 32], strides = [1, 1]} : vector<2x128xf32> to vector<2x32xf32>
    %360 = vector.extract_strided_slice %357 {offsets = [0, 96], sizes = [2, 32], strides = [1, 1]} : vector<2x128xf32> to vector<2x32xf32>
    %361 = vector.extract_strided_slice %357 {offsets = [0, 32], sizes = [2, 32], strides = [1, 1]} : vector<2x128xf32> to vector<2x32xf32>
    %362 = arith.mulf %361, %345 : vector<2x32xf32>
    %363 = arith.mulf %358, %359 : vector<2x32xf32>
    %364 = arith.addf %362, %363 : vector<2x32xf32>
    %365 = math.tanh %364 : vector<2x32xf32>
    %366 = arith.mulf %360, %365 : vector<2x32xf32>
    %367 = tpu.concatenate %347, %328 in 1 : vector<2x32xf32>, vector<2x32xf32> -> vector<2x64xf32>
    %368 = arith.truncf %367 : vector<2x64xf32> to vector<2x64xbf16>
    %cst_81 = arith.constant dense<0.000000e+00> : vector<2x128xf32>
    %369 = tpu.matmul %368, %8, %cst_81 {dimension_numbers = #tpu.dot_dimension_numbers<[1], [0], [0], [1], [0, 0, 1, 1], [], []>} : vector<2x64xbf16>, vector<64x128xbf16>, vector<2x128xf32> -> vector<2x128xf32>
    %370 = vector.broadcast %9 : vector<1x128xf32> to vector<2x128xf32>
    %371 = arith.addf %369, %370 : vector<2x128xf32>
    %372 = math.tanh %371 : vector<2x128xf32>
    %cst_82 = arith.constant 5.000000e-01 : f32
    %373 = vector.broadcast %cst_82 : f32 to vector<2x128xf32>
    %374 = arith.mulf %373, %372 : vector<2x128xf32>
    %cst_83 = arith.constant 5.000000e-01 : f32
    %375 = vector.broadcast %cst_83 : f32 to vector<2x128xf32>
    %376 = arith.addf %374, %375 : vector<2x128xf32>
    %377 = arith.select %17, %372, %376 : vector<2x128xi1>, vector<2x128xf32>
    %378 = vector.extract_strided_slice %377 {offsets = [0, 0], sizes = [2, 32], strides = [1, 1]} : vector<2x128xf32> to vector<2x32xf32>
    %379 = vector.extract_strided_slice %377 {offsets = [0, 64], sizes = [2, 32], strides = [1, 1]} : vector<2x128xf32> to vector<2x32xf32>
    %380 = vector.extract_strided_slice %377 {offsets = [0, 96], sizes = [2, 32], strides = [1, 1]} : vector<2x128xf32> to vector<2x32xf32>
    %381 = vector.extract_strided_slice %377 {offsets = [0, 32], sizes = [2, 32], strides = [1, 1]} : vector<2x128xf32> to vector<2x32xf32>
    %382 = arith.mulf %381, %326 : vector<2x32xf32>
    %383 = arith.mulf %378, %379 : vector<2x32xf32>
    %384 = arith.addf %382, %383 : vector<2x32xf32>
    %385 = math.tanh %384 : vector<2x32xf32>
    %386 = arith.mulf %380, %385 : vector<2x32xf32>
    %cst_84 = arith.constant dense<0.000000e+00> : vector<2x1xf32>
    %387 = tpu.matmul %386, %10, %cst_84 {dimension_numbers = #tpu.dot_dimension_numbers<[1], [0], [0], [1], [0, 0, 1, 1], [], []>} : vector<2x32xf32>, vector<32x1xf32>, vector<2x1xf32> -> vector<2x1xf32>
    %388 = vector.broadcast %11 : vector<1x1xf32> to vector<2x1xf32>
    %389 = arith.addf %387, %388 : vector<2x1xf32>
    %c0_85 = arith.constant 0 : index
    %c0_86 = arith.constant 0 : index
    %390 = vector.load %arg14[%c0_85, %c0_86] : memref<16x1xf32, #tpu.memory_space<vmem>>, vector<2x1xf32>
    tpu.vector_store %arg14[%c0_85, %c0_86], %389 {strides = array<i32>} : memref<16x1xf32, #tpu.memory_space<vmem>>, vector<2x1xf32>,
    %391 = vector.extract_strided_slice %25 {offsets = [4, 0], sizes = [2, 128], strides = [1, 1]} : vector<16x128xf32> to vector<2x128xf32>
    %392 = arith.truncf %366 : vector<2x32xf32> to vector<2x32xbf16>
    %cst_87 = arith.constant dense<0.000000e+00> : vector<2x128xf32>
    %393 = tpu.matmul %392, %7, %cst_87 {dimension_numbers = #tpu.dot_dimension_numbers<[1], [0], [0], [1], [0, 0, 1, 1], [], []>} : vector<2x32xbf16>, vector<32x128xbf16>, vector<2x128xf32> -> vector<2x128xf32>
    %394 = arith.addf %391, %393 : vector<2x128xf32>
    %395 = math.tanh %394 : vector<2x128xf32>
    %cst_88 = arith.constant 5.000000e-01 : f32
    %396 = vector.broadcast %cst_88 : f32 to vector<2x128xf32>
    %397 = arith.mulf %396, %395 : vector<2x128xf32>
    %cst_89 = arith.constant 5.000000e-01 : f32
    %398 = vector.broadcast %cst_89 : f32 to vector<2x128xf32>
    %399 = arith.addf %397, %398 : vector<2x128xf32>
    %400 = arith.select %17, %395, %399 : vector<2x128xi1>, vector<2x128xf32>
    %401 = vector.extract_strided_slice %400 {offsets = [0, 0], sizes = [2, 32], strides = [1, 1]} : vector<2x128xf32> to vector<2x32xf32>
    %402 = vector.extract_strided_slice %400 {offsets = [0, 64], sizes = [2, 32], strides = [1, 1]} : vector<2x128xf32> to vector<2x32xf32>
    %403 = vector.extract_strided_slice %400 {offsets = [0, 96], sizes = [2, 32], strides = [1, 1]} : vector<2x128xf32> to vector<2x32xf32>
    %404 = vector.extract_strided_slice %400 {offsets = [0, 32], sizes = [2, 32], strides = [1, 1]} : vector<2x128xf32> to vector<2x32xf32>
    %405 = arith.mulf %404, %364 : vector<2x32xf32>
    %406 = arith.mulf %401, %402 : vector<2x32xf32>
    %407 = arith.addf %405, %406 : vector<2x32xf32>
    %408 = math.tanh %407 : vector<2x32xf32>
    %409 = arith.mulf %403, %408 : vector<2x32xf32>
    %410 = tpu.concatenate %366, %386 in 1 : vector<2x32xf32>, vector<2x32xf32> -> vector<2x64xf32>
    %411 = arith.truncf %410 : vector<2x64xf32> to vector<2x64xbf16>
    %cst_90 = arith.constant dense<0.000000e+00> : vector<2x128xf32>
    %412 = tpu.matmul %411, %8, %cst_90 {dimension_numbers = #tpu.dot_dimension_numbers<[1], [0], [0], [1], [0, 0, 1, 1], [], []>} : vector<2x64xbf16>, vector<64x128xbf16>, vector<2x128xf32> -> vector<2x128xf32>
    %413 = vector.broadcast %9 : vector<1x128xf32> to vector<2x128xf32>
    %414 = arith.addf %412, %413 : vector<2x128xf32>
    %415 = math.tanh %414 : vector<2x128xf32>
    %cst_91 = arith.constant 5.000000e-01 : f32
    %416 = vector.broadcast %cst_91 : f32 to vector<2x128xf32>
    %417 = arith.mulf %416, %415 : vector<2x128xf32>
    %cst_92 = arith.constant 5.000000e-01 : f32
    %418 = vector.broadcast %cst_92 : f32 to vector<2x128xf32>
    %419 = arith.addf %417, %418 : vector<2x128xf32>
    %420 = arith.select %17, %415, %419 : vector<2x128xi1>, vector<2x128xf32>
    %421 = vector.extract_strided_slice %420 {offsets = [0, 0], sizes = [2, 32], strides = [1, 1]} : vector<2x128xf32> to vector<2x32xf32>
    %422 = vector.extract_strided_slice %420 {offsets = [0, 64], sizes = [2, 32], strides = [1, 1]} : vector<2x128xf32> to vector<2x32xf32>
    %423 = vector.extract_strided_slice %420 {offsets = [0, 96], sizes = [2, 32], strides = [1, 1]} : vector<2x128xf32> to vector<2x32xf32>
    %424 = vector.extract_strided_slice %420 {offsets = [0, 32], sizes = [2, 32], strides = [1, 1]} : vector<2x128xf32> to vector<2x32xf32>
    %425 = arith.mulf %424, %384 : vector<2x32xf32>
    %426 = arith.mulf %421, %422 : vector<2x32xf32>
    %427 = arith.addf %425, %426 : vector<2x32xf32>
    %428 = math.tanh %427 : vector<2x32xf32>
    %429 = arith.mulf %423, %428 : vector<2x32xf32>
    %cst_93 = arith.constant dense<0.000000e+00> : vector<2x1xf32>
    %430 = tpu.matmul %429, %10, %cst_93 {dimension_numbers = #tpu.dot_dimension_numbers<[1], [0], [0], [1], [0, 0, 1, 1], [], []>} : vector<2x32xf32>, vector<32x1xf32>, vector<2x1xf32> -> vector<2x1xf32>
    %431 = vector.broadcast %11 : vector<1x1xf32> to vector<2x1xf32>
    %432 = arith.addf %430, %431 : vector<2x1xf32>
    %c2 = arith.constant 2 : index
    %c0_94 = arith.constant 0 : index
    %433 = vector.load %arg14[%c2, %c0_94] : memref<16x1xf32, #tpu.memory_space<vmem>>, vector<2x1xf32>
    tpu.vector_store %arg14[%c2, %c0_94], %432 {strides = array<i32>} : memref<16x1xf32, #tpu.memory_space<vmem>>, vector<2x1xf32>,
    %434 = vector.extract_strided_slice %25 {offsets = [6, 0], sizes = [2, 128], strides = [1, 1]} : vector<16x128xf32> to vector<2x128xf32>
    %435 = arith.truncf %409 : vector<2x32xf32> to vector<2x32xbf16>
    %cst_95 = arith.constant dense<0.000000e+00> : vector<2x128xf32>
    %436 = tpu.matmul %435, %7, %cst_95 {dimension_numbers = #tpu.dot_dimension_numbers<[1], [0], [0], [1], [0, 0, 1, 1], [], []>} : vector<2x32xbf16>, vector<32x128xbf16>, vector<2x128xf32> -> vector<2x128xf32>
    %437 = arith.addf %434, %436 : vector<2x128xf32>
    %438 = math.tanh %437 : vector<2x128xf32>
    %cst_96 = arith.constant 5.000000e-01 : f32
    %439 = vector.broadcast %cst_96 : f32 to vector<2x128xf32>
    %440 = arith.mulf %439, %438 : vector<2x128xf32>
    %cst_97 = arith.constant 5.000000e-01 : f32
    %441 = vector.broadcast %cst_97 : f32 to vector<2x128xf32>
    %442 = arith.addf %440, %441 : vector<2x128xf32>
    %443 = arith.select %17, %438, %442 : vector<2x128xi1>, vector<2x128xf32>
    %444 = vector.extract_strided_slice %443 {offsets = [0, 0], sizes = [2, 32], strides = [1, 1]} : vector<2x128xf32> to vector<2x32xf32>
    %445 = vector.extract_strided_slice %443 {offsets = [0, 64], sizes = [2, 32], strides = [1, 1]} : vector<2x128xf32> to vector<2x32xf32>
    %446 = vector.extract_strided_slice %443 {offsets = [0, 96], sizes = [2, 32], strides = [1, 1]} : vector<2x128xf32> to vector<2x32xf32>
    %447 = vector.extract_strided_slice %443 {offsets = [0, 32], sizes = [2, 32], strides = [1, 1]} : vector<2x128xf32> to vector<2x32xf32>
    %448 = arith.mulf %447, %407 : vector<2x32xf32>
    %449 = arith.mulf %444, %445 : vector<2x32xf32>
    %450 = arith.addf %448, %449 : vector<2x32xf32>
    %451 = math.tanh %450 : vector<2x32xf32>
    %452 = arith.mulf %446, %451 : vector<2x32xf32>
    %453 = tpu.concatenate %409, %429 in 1 : vector<2x32xf32>, vector<2x32xf32> -> vector<2x64xf32>
    %454 = arith.truncf %453 : vector<2x64xf32> to vector<2x64xbf16>
    %cst_98 = arith.constant dense<0.000000e+00> : vector<2x128xf32>
    %455 = tpu.matmul %454, %8, %cst_98 {dimension_numbers = #tpu.dot_dimension_numbers<[1], [0], [0], [1], [0, 0, 1, 1], [], []>} : vector<2x64xbf16>, vector<64x128xbf16>, vector<2x128xf32> -> vector<2x128xf32>
    %456 = vector.broadcast %9 : vector<1x128xf32> to vector<2x128xf32>
    %457 = arith.addf %455, %456 : vector<2x128xf32>
    %458 = math.tanh %457 : vector<2x128xf32>
    %cst_99 = arith.constant 5.000000e-01 : f32
    %459 = vector.broadcast %cst_99 : f32 to vector<2x128xf32>
    %460 = arith.mulf %459, %458 : vector<2x128xf32>
    %cst_100 = arith.constant 5.000000e-01 : f32
    %461 = vector.broadcast %cst_100 : f32 to vector<2x128xf32>
    %462 = arith.addf %460, %461 : vector<2x128xf32>
    %463 = arith.select %17, %458, %462 : vector<2x128xi1>, vector<2x128xf32>
    %464 = vector.extract_strided_slice %463 {offsets = [0, 0], sizes = [2, 32], strides = [1, 1]} : vector<2x128xf32> to vector<2x32xf32>
    %465 = vector.extract_strided_slice %463 {offsets = [0, 64], sizes = [2, 32], strides = [1, 1]} : vector<2x128xf32> to vector<2x32xf32>
    %466 = vector.extract_strided_slice %463 {offsets = [0, 96], sizes = [2, 32], strides = [1, 1]} : vector<2x128xf32> to vector<2x32xf32>
    %467 = vector.extract_strided_slice %463 {offsets = [0, 32], sizes = [2, 32], strides = [1, 1]} : vector<2x128xf32> to vector<2x32xf32>
    %468 = arith.mulf %467, %427 : vector<2x32xf32>
    %469 = arith.mulf %464, %465 : vector<2x32xf32>
    %470 = arith.addf %468, %469 : vector<2x32xf32>
    %471 = math.tanh %470 : vector<2x32xf32>
    %472 = arith.mulf %466, %471 : vector<2x32xf32>
    %cst_101 = arith.constant dense<0.000000e+00> : vector<2x1xf32>
    %473 = tpu.matmul %472, %10, %cst_101 {dimension_numbers = #tpu.dot_dimension_numbers<[1], [0], [0], [1], [0, 0, 1, 1], [], []>} : vector<2x32xf32>, vector<32x1xf32>, vector<2x1xf32> -> vector<2x1xf32>
    %474 = vector.broadcast %11 : vector<1x1xf32> to vector<2x1xf32>
    %475 = arith.addf %473, %474 : vector<2x1xf32>
    %c4 = arith.constant 4 : index
    %c0_102 = arith.constant 0 : index
    %476 = vector.load %arg14[%c4, %c0_102] : memref<16x1xf32, #tpu.memory_space<vmem>>, vector<2x1xf32>
    tpu.vector_store %arg14[%c4, %c0_102], %475 {strides = array<i32>} : memref<16x1xf32, #tpu.memory_space<vmem>>, vector<2x1xf32>,
    %477 = vector.extract_strided_slice %25 {offsets = [8, 0], sizes = [2, 128], strides = [1, 1]} : vector<16x128xf32> to vector<2x128xf32>
    %478 = arith.truncf %452 : vector<2x32xf32> to vector<2x32xbf16>
    %cst_103 = arith.constant dense<0.000000e+00> : vector<2x128xf32>
    %479 = tpu.matmul %478, %7, %cst_103 {dimension_numbers = #tpu.dot_dimension_numbers<[1], [0], [0], [1], [0, 0, 1, 1], [], []>} : vector<2x32xbf16>, vector<32x128xbf16>, vector<2x128xf32> -> vector<2x128xf32>
    %480 = arith.addf %477, %479 : vector<2x128xf32>
    %481 = math.tanh %480 : vector<2x128xf32>
    %cst_104 = arith.constant 5.000000e-01 : f32
    %482 = vector.broadcast %cst_104 : f32 to vector<2x128xf32>
    %483 = arith.mulf %482, %481 : vector<2x128xf32>
    %cst_105 = arith.constant 5.000000e-01 : f32
    %484 = vector.broadcast %cst_105 : f32 to vector<2x128xf32>
    %485 = arith.addf %483, %484 : vector<2x128xf32>
    %486 = arith.select %17, %481, %485 : vector<2x128xi1>, vector<2x128xf32>
    %487 = vector.extract_strided_slice %486 {offsets = [0, 0], sizes = [2, 32], strides = [1, 1]} : vector<2x128xf32> to vector<2x32xf32>
    %488 = vector.extract_strided_slice %486 {offsets = [0, 64], sizes = [2, 32], strides = [1, 1]} : vector<2x128xf32> to vector<2x32xf32>
    %489 = vector.extract_strided_slice %486 {offsets = [0, 96], sizes = [2, 32], strides = [1, 1]} : vector<2x128xf32> to vector<2x32xf32>
    %490 = vector.extract_strided_slice %486 {offsets = [0, 32], sizes = [2, 32], strides = [1, 1]} : vector<2x128xf32> to vector<2x32xf32>
    %491 = arith.mulf %490, %450 : vector<2x32xf32>
    %492 = arith.mulf %487, %488 : vector<2x32xf32>
    %493 = arith.addf %491, %492 : vector<2x32xf32>
    %494 = math.tanh %493 : vector<2x32xf32>
    %495 = arith.mulf %489, %494 : vector<2x32xf32>
    %496 = tpu.concatenate %452, %472 in 1 : vector<2x32xf32>, vector<2x32xf32> -> vector<2x64xf32>
    %497 = arith.truncf %496 : vector<2x64xf32> to vector<2x64xbf16>
    %cst_106 = arith.constant dense<0.000000e+00> : vector<2x128xf32>
    %498 = tpu.matmul %497, %8, %cst_106 {dimension_numbers = #tpu.dot_dimension_numbers<[1], [0], [0], [1], [0, 0, 1, 1], [], []>} : vector<2x64xbf16>, vector<64x128xbf16>, vector<2x128xf32> -> vector<2x128xf32>
    %499 = vector.broadcast %9 : vector<1x128xf32> to vector<2x128xf32>
    %500 = arith.addf %498, %499 : vector<2x128xf32>
    %501 = math.tanh %500 : vector<2x128xf32>
    %cst_107 = arith.constant 5.000000e-01 : f32
    %502 = vector.broadcast %cst_107 : f32 to vector<2x128xf32>
    %503 = arith.mulf %502, %501 : vector<2x128xf32>
    %cst_108 = arith.constant 5.000000e-01 : f32
    %504 = vector.broadcast %cst_108 : f32 to vector<2x128xf32>
    %505 = arith.addf %503, %504 : vector<2x128xf32>
    %506 = arith.select %17, %501, %505 : vector<2x128xi1>, vector<2x128xf32>
    %507 = vector.extract_strided_slice %506 {offsets = [0, 0], sizes = [2, 32], strides = [1, 1]} : vector<2x128xf32> to vector<2x32xf32>
    %508 = vector.extract_strided_slice %506 {offsets = [0, 64], sizes = [2, 32], strides = [1, 1]} : vector<2x128xf32> to vector<2x32xf32>
    %509 = vector.extract_strided_slice %506 {offsets = [0, 96], sizes = [2, 32], strides = [1, 1]} : vector<2x128xf32> to vector<2x32xf32>
    %510 = vector.extract_strided_slice %506 {offsets = [0, 32], sizes = [2, 32], strides = [1, 1]} : vector<2x128xf32> to vector<2x32xf32>
    %511 = arith.mulf %510, %470 : vector<2x32xf32>
    %512 = arith.mulf %507, %508 : vector<2x32xf32>
    %513 = arith.addf %511, %512 : vector<2x32xf32>
    %514 = math.tanh %513 : vector<2x32xf32>
    %515 = arith.mulf %509, %514 : vector<2x32xf32>
    %cst_109 = arith.constant dense<0.000000e+00> : vector<2x1xf32>
    %516 = tpu.matmul %515, %10, %cst_109 {dimension_numbers = #tpu.dot_dimension_numbers<[1], [0], [0], [1], [0, 0, 1, 1], [], []>} : vector<2x32xf32>, vector<32x1xf32>, vector<2x1xf32> -> vector<2x1xf32>
    %517 = vector.broadcast %11 : vector<1x1xf32> to vector<2x1xf32>
    %518 = arith.addf %516, %517 : vector<2x1xf32>
    %c6 = arith.constant 6 : index
    %c0_110 = arith.constant 0 : index
    %519 = vector.load %arg14[%c6, %c0_110] : memref<16x1xf32, #tpu.memory_space<vmem>>, vector<2x1xf32>
    tpu.vector_store %arg14[%c6, %c0_110], %518 {strides = array<i32>} : memref<16x1xf32, #tpu.memory_space<vmem>>, vector<2x1xf32>,
    %520 = vector.extract_strided_slice %25 {offsets = [10, 0], sizes = [2, 128], strides = [1, 1]} : vector<16x128xf32> to vector<2x128xf32>
    %521 = arith.truncf %495 : vector<2x32xf32> to vector<2x32xbf16>
    %cst_111 = arith.constant dense<0.000000e+00> : vector<2x128xf32>
    %522 = tpu.matmul %521, %7, %cst_111 {dimension_numbers = #tpu.dot_dimension_numbers<[1], [0], [0], [1], [0, 0, 1, 1], [], []>} : vector<2x32xbf16>, vector<32x128xbf16>, vector<2x128xf32> -> vector<2x128xf32>
    %523 = arith.addf %520, %522 : vector<2x128xf32>
    %524 = math.tanh %523 : vector<2x128xf32>
    %cst_112 = arith.constant 5.000000e-01 : f32
    %525 = vector.broadcast %cst_112 : f32 to vector<2x128xf32>
    %526 = arith.mulf %525, %524 : vector<2x128xf32>
    %cst_113 = arith.constant 5.000000e-01 : f32
    %527 = vector.broadcast %cst_113 : f32 to vector<2x128xf32>
    %528 = arith.addf %526, %527 : vector<2x128xf32>
    %529 = arith.select %17, %524, %528 : vector<2x128xi1>, vector<2x128xf32>
    %530 = vector.extract_strided_slice %529 {offsets = [0, 0], sizes = [2, 32], strides = [1, 1]} : vector<2x128xf32> to vector<2x32xf32>
    %531 = vector.extract_strided_slice %529 {offsets = [0, 64], sizes = [2, 32], strides = [1, 1]} : vector<2x128xf32> to vector<2x32xf32>
    %532 = vector.extract_strided_slice %529 {offsets = [0, 96], sizes = [2, 32], strides = [1, 1]} : vector<2x128xf32> to vector<2x32xf32>
    %533 = vector.extract_strided_slice %529 {offsets = [0, 32], sizes = [2, 32], strides = [1, 1]} : vector<2x128xf32> to vector<2x32xf32>
    %534 = arith.mulf %533, %493 : vector<2x32xf32>
    %535 = arith.mulf %530, %531 : vector<2x32xf32>
    %536 = arith.addf %534, %535 : vector<2x32xf32>
    %537 = math.tanh %536 : vector<2x32xf32>
    %538 = arith.mulf %532, %537 : vector<2x32xf32>
    %539 = tpu.concatenate %495, %515 in 1 : vector<2x32xf32>, vector<2x32xf32> -> vector<2x64xf32>
    %540 = arith.truncf %539 : vector<2x64xf32> to vector<2x64xbf16>
    %cst_114 = arith.constant dense<0.000000e+00> : vector<2x128xf32>
    %541 = tpu.matmul %540, %8, %cst_114 {dimension_numbers = #tpu.dot_dimension_numbers<[1], [0], [0], [1], [0, 0, 1, 1], [], []>} : vector<2x64xbf16>, vector<64x128xbf16>, vector<2x128xf32> -> vector<2x128xf32>
    %542 = vector.broadcast %9 : vector<1x128xf32> to vector<2x128xf32>
    %543 = arith.addf %541, %542 : vector<2x128xf32>
    %544 = math.tanh %543 : vector<2x128xf32>
    %cst_115 = arith.constant 5.000000e-01 : f32
    %545 = vector.broadcast %cst_115 : f32 to vector<2x128xf32>
    %546 = arith.mulf %545, %544 : vector<2x128xf32>
    %cst_116 = arith.constant 5.000000e-01 : f32
    %547 = vector.broadcast %cst_116 : f32 to vector<2x128xf32>
    %548 = arith.addf %546, %547 : vector<2x128xf32>
    %549 = arith.select %17, %544, %548 : vector<2x128xi1>, vector<2x128xf32>
    %550 = vector.extract_strided_slice %549 {offsets = [0, 0], sizes = [2, 32], strides = [1, 1]} : vector<2x128xf32> to vector<2x32xf32>
    %551 = vector.extract_strided_slice %549 {offsets = [0, 64], sizes = [2, 32], strides = [1, 1]} : vector<2x128xf32> to vector<2x32xf32>
    %552 = vector.extract_strided_slice %549 {offsets = [0, 96], sizes = [2, 32], strides = [1, 1]} : vector<2x128xf32> to vector<2x32xf32>
    %553 = vector.extract_strided_slice %549 {offsets = [0, 32], sizes = [2, 32], strides = [1, 1]} : vector<2x128xf32> to vector<2x32xf32>
    %554 = arith.mulf %553, %513 : vector<2x32xf32>
    %555 = arith.mulf %550, %551 : vector<2x32xf32>
    %556 = arith.addf %554, %555 : vector<2x32xf32>
    %557 = math.tanh %556 : vector<2x32xf32>
    %558 = arith.mulf %552, %557 : vector<2x32xf32>
    %cst_117 = arith.constant dense<0.000000e+00> : vector<2x1xf32>
    %559 = tpu.matmul %558, %10, %cst_117 {dimension_numbers = #tpu.dot_dimension_numbers<[1], [0], [0], [1], [0, 0, 1, 1], [], []>} : vector<2x32xf32>, vector<32x1xf32>, vector<2x1xf32> -> vector<2x1xf32>
    %560 = vector.broadcast %11 : vector<1x1xf32> to vector<2x1xf32>
    %561 = arith.addf %559, %560 : vector<2x1xf32>
    %c8 = arith.constant 8 : index
    %c0_118 = arith.constant 0 : index
    %562 = vector.load %arg14[%c8, %c0_118] : memref<16x1xf32, #tpu.memory_space<vmem>>, vector<2x1xf32>
    tpu.vector_store %arg14[%c8, %c0_118], %561 {strides = array<i32>} : memref<16x1xf32, #tpu.memory_space<vmem>>, vector<2x1xf32>,
    %563 = vector.extract_strided_slice %25 {offsets = [12, 0], sizes = [2, 128], strides = [1, 1]} : vector<16x128xf32> to vector<2x128xf32>
    %564 = arith.truncf %538 : vector<2x32xf32> to vector<2x32xbf16>
    %cst_119 = arith.constant dense<0.000000e+00> : vector<2x128xf32>
    %565 = tpu.matmul %564, %7, %cst_119 {dimension_numbers = #tpu.dot_dimension_numbers<[1], [0], [0], [1], [0, 0, 1, 1], [], []>} : vector<2x32xbf16>, vector<32x128xbf16>, vector<2x128xf32> -> vector<2x128xf32>
    %566 = arith.addf %563, %565 : vector<2x128xf32>
    %567 = math.tanh %566 : vector<2x128xf32>
    %cst_120 = arith.constant 5.000000e-01 : f32
    %568 = vector.broadcast %cst_120 : f32 to vector<2x128xf32>
    %569 = arith.mulf %568, %567 : vector<2x128xf32>
    %cst_121 = arith.constant 5.000000e-01 : f32
    %570 = vector.broadcast %cst_121 : f32 to vector<2x128xf32>
    %571 = arith.addf %569, %570 : vector<2x128xf32>
    %572 = arith.select %17, %567, %571 : vector<2x128xi1>, vector<2x128xf32>
    %573 = vector.extract_strided_slice %572 {offsets = [0, 0], sizes = [2, 32], strides = [1, 1]} : vector<2x128xf32> to vector<2x32xf32>
    %574 = vector.extract_strided_slice %572 {offsets = [0, 64], sizes = [2, 32], strides = [1, 1]} : vector<2x128xf32> to vector<2x32xf32>
    %575 = vector.extract_strided_slice %572 {offsets = [0, 96], sizes = [2, 32], strides = [1, 1]} : vector<2x128xf32> to vector<2x32xf32>
    %576 = vector.extract_strided_slice %572 {offsets = [0, 32], sizes = [2, 32], strides = [1, 1]} : vector<2x128xf32> to vector<2x32xf32>
    %577 = arith.mulf %576, %536 : vector<2x32xf32>
    %578 = arith.mulf %573, %574 : vector<2x32xf32>
    %579 = arith.addf %577, %578 : vector<2x32xf32>
    %580 = math.tanh %579 : vector<2x32xf32>
    %581 = arith.mulf %575, %580 : vector<2x32xf32>
    %582 = tpu.concatenate %538, %558 in 1 : vector<2x32xf32>, vector<2x32xf32> -> vector<2x64xf32>
    %583 = arith.truncf %582 : vector<2x64xf32> to vector<2x64xbf16>
    %cst_122 = arith.constant dense<0.000000e+00> : vector<2x128xf32>
    %584 = tpu.matmul %583, %8, %cst_122 {dimension_numbers = #tpu.dot_dimension_numbers<[1], [0], [0], [1], [0, 0, 1, 1], [], []>} : vector<2x64xbf16>, vector<64x128xbf16>, vector<2x128xf32> -> vector<2x128xf32>
    %585 = vector.broadcast %9 : vector<1x128xf32> to vector<2x128xf32>
    %586 = arith.addf %584, %585 : vector<2x128xf32>
    %587 = math.tanh %586 : vector<2x128xf32>
    %cst_123 = arith.constant 5.000000e-01 : f32
    %588 = vector.broadcast %cst_123 : f32 to vector<2x128xf32>
    %589 = arith.mulf %588, %587 : vector<2x128xf32>
    %cst_124 = arith.constant 5.000000e-01 : f32
    %590 = vector.broadcast %cst_124 : f32 to vector<2x128xf32>
    %591 = arith.addf %589, %590 : vector<2x128xf32>
    %592 = arith.select %17, %587, %591 : vector<2x128xi1>, vector<2x128xf32>
    %593 = vector.extract_strided_slice %592 {offsets = [0, 0], sizes = [2, 32], strides = [1, 1]} : vector<2x128xf32> to vector<2x32xf32>
    %594 = vector.extract_strided_slice %592 {offsets = [0, 64], sizes = [2, 32], strides = [1, 1]} : vector<2x128xf32> to vector<2x32xf32>
    %595 = vector.extract_strided_slice %592 {offsets = [0, 96], sizes = [2, 32], strides = [1, 1]} : vector<2x128xf32> to vector<2x32xf32>
    %596 = vector.extract_strided_slice %592 {offsets = [0, 32], sizes = [2, 32], strides = [1, 1]} : vector<2x128xf32> to vector<2x32xf32>
    %597 = arith.mulf %596, %556 : vector<2x32xf32>
    %598 = arith.mulf %593, %594 : vector<2x32xf32>
    %599 = arith.addf %597, %598 : vector<2x32xf32>
    %600 = math.tanh %599 : vector<2x32xf32>
    %601 = arith.mulf %595, %600 : vector<2x32xf32>
    %cst_125 = arith.constant dense<0.000000e+00> : vector<2x1xf32>
    %602 = tpu.matmul %601, %10, %cst_125 {dimension_numbers = #tpu.dot_dimension_numbers<[1], [0], [0], [1], [0, 0, 1, 1], [], []>} : vector<2x32xf32>, vector<32x1xf32>, vector<2x1xf32> -> vector<2x1xf32>
    %603 = vector.broadcast %11 : vector<1x1xf32> to vector<2x1xf32>
    %604 = arith.addf %602, %603 : vector<2x1xf32>
    %c10 = arith.constant 10 : index
    %c0_126 = arith.constant 0 : index
    %605 = vector.load %arg14[%c10, %c0_126] : memref<16x1xf32, #tpu.memory_space<vmem>>, vector<2x1xf32>
    tpu.vector_store %arg14[%c10, %c0_126], %604 {strides = array<i32>} : memref<16x1xf32, #tpu.memory_space<vmem>>, vector<2x1xf32>,
    %606 = vector.extract_strided_slice %25 {offsets = [14, 0], sizes = [2, 128], strides = [1, 1]} : vector<16x128xf32> to vector<2x128xf32>
    %607 = arith.truncf %581 : vector<2x32xf32> to vector<2x32xbf16>
    %cst_127 = arith.constant dense<0.000000e+00> : vector<2x128xf32>
    %608 = tpu.matmul %607, %7, %cst_127 {dimension_numbers = #tpu.dot_dimension_numbers<[1], [0], [0], [1], [0, 0, 1, 1], [], []>} : vector<2x32xbf16>, vector<32x128xbf16>, vector<2x128xf32> -> vector<2x128xf32>
    %609 = arith.addf %606, %608 : vector<2x128xf32>
    %610 = math.tanh %609 : vector<2x128xf32>
    %cst_128 = arith.constant 5.000000e-01 : f32
    %611 = vector.broadcast %cst_128 : f32 to vector<2x128xf32>
    %612 = arith.mulf %611, %610 : vector<2x128xf32>
    %cst_129 = arith.constant 5.000000e-01 : f32
    %613 = vector.broadcast %cst_129 : f32 to vector<2x128xf32>
    %614 = arith.addf %612, %613 : vector<2x128xf32>
    %615 = arith.select %17, %610, %614 : vector<2x128xi1>, vector<2x128xf32>
    %616 = vector.extract_strided_slice %615 {offsets = [0, 0], sizes = [2, 32], strides = [1, 1]} : vector<2x128xf32> to vector<2x32xf32>
    %617 = vector.extract_strided_slice %615 {offsets = [0, 64], sizes = [2, 32], strides = [1, 1]} : vector<2x128xf32> to vector<2x32xf32>
    %618 = vector.extract_strided_slice %615 {offsets = [0, 96], sizes = [2, 32], strides = [1, 1]} : vector<2x128xf32> to vector<2x32xf32>
    %619 = vector.extract_strided_slice %615 {offsets = [0, 32], sizes = [2, 32], strides = [1, 1]} : vector<2x128xf32> to vector<2x32xf32>
    %620 = arith.mulf %619, %579 : vector<2x32xf32>
    %621 = arith.mulf %616, %617 : vector<2x32xf32>
    %622 = arith.addf %620, %621 : vector<2x32xf32>
    %623 = math.tanh %622 : vector<2x32xf32>
    %624 = arith.mulf %618, %623 : vector<2x32xf32>
    %625 = tpu.concatenate %581, %601 in 1 : vector<2x32xf32>, vector<2x32xf32> -> vector<2x64xf32>
    %626 = arith.truncf %625 : vector<2x64xf32> to vector<2x64xbf16>
    %cst_130 = arith.constant dense<0.000000e+00> : vector<2x128xf32>
    %627 = tpu.matmul %626, %8, %cst_130 {dimension_numbers = #tpu.dot_dimension_numbers<[1], [0], [0], [1], [0, 0, 1, 1], [], []>} : vector<2x64xbf16>, vector<64x128xbf16>, vector<2x128xf32> -> vector<2x128xf32>
    %628 = vector.broadcast %9 : vector<1x128xf32> to vector<2x128xf32>
    %629 = arith.addf %627, %628 : vector<2x128xf32>
    %630 = math.tanh %629 : vector<2x128xf32>
    %cst_131 = arith.constant 5.000000e-01 : f32
    %631 = vector.broadcast %cst_131 : f32 to vector<2x128xf32>
    %632 = arith.mulf %631, %630 : vector<2x128xf32>
    %cst_132 = arith.constant 5.000000e-01 : f32
    %633 = vector.broadcast %cst_132 : f32 to vector<2x128xf32>
    %634 = arith.addf %632, %633 : vector<2x128xf32>
    %635 = arith.select %17, %630, %634 : vector<2x128xi1>, vector<2x128xf32>
    %636 = vector.extract_strided_slice %635 {offsets = [0, 0], sizes = [2, 32], strides = [1, 1]} : vector<2x128xf32> to vector<2x32xf32>
    %637 = vector.extract_strided_slice %635 {offsets = [0, 64], sizes = [2, 32], strides = [1, 1]} : vector<2x128xf32> to vector<2x32xf32>
    %638 = vector.extract_strided_slice %635 {offsets = [0, 96], sizes = [2, 32], strides = [1, 1]} : vector<2x128xf32> to vector<2x32xf32>
    %639 = vector.extract_strided_slice %635 {offsets = [0, 32], sizes = [2, 32], strides = [1, 1]} : vector<2x128xf32> to vector<2x32xf32>
    %640 = arith.mulf %639, %599 : vector<2x32xf32>
    %641 = arith.mulf %636, %637 : vector<2x32xf32>
    %642 = arith.addf %640, %641 : vector<2x32xf32>
    %643 = math.tanh %642 : vector<2x32xf32>
    %644 = arith.mulf %638, %643 : vector<2x32xf32>
    %cst_133 = arith.constant dense<0.000000e+00> : vector<2x1xf32>
    %645 = tpu.matmul %644, %10, %cst_133 {dimension_numbers = #tpu.dot_dimension_numbers<[1], [0], [0], [1], [0, 0, 1, 1], [], []>} : vector<2x32xf32>, vector<32x1xf32>, vector<2x1xf32> -> vector<2x1xf32>
    %646 = vector.broadcast %11 : vector<1x1xf32> to vector<2x1xf32>
    %647 = arith.addf %645, %646 : vector<2x1xf32>
    %c12 = arith.constant 12 : index
    %c0_134 = arith.constant 0 : index
    %648 = vector.load %arg14[%c12, %c0_134] : memref<16x1xf32, #tpu.memory_space<vmem>>, vector<2x1xf32>
    tpu.vector_store %arg14[%c12, %c0_134], %647 {strides = array<i32>} : memref<16x1xf32, #tpu.memory_space<vmem>>, vector<2x1xf32>,
    %649 = tpu.concatenate %624, %644 in 1 : vector<2x32xf32>, vector<2x32xf32> -> vector<2x64xf32>
    %650 = arith.truncf %649 : vector<2x64xf32> to vector<2x64xbf16>
    %cst_135 = arith.constant dense<0.000000e+00> : vector<2x128xf32>
    %651 = tpu.matmul %650, %8, %cst_135 {dimension_numbers = #tpu.dot_dimension_numbers<[1], [0], [0], [1], [0, 0, 1, 1], [], []>} : vector<2x64xbf16>, vector<64x128xbf16>, vector<2x128xf32> -> vector<2x128xf32>
    %652 = vector.broadcast %9 : vector<1x128xf32> to vector<2x128xf32>
    %653 = arith.addf %651, %652 : vector<2x128xf32>
    %654 = math.tanh %653 : vector<2x128xf32>
    %cst_136 = arith.constant 5.000000e-01 : f32
    %655 = vector.broadcast %cst_136 : f32 to vector<2x128xf32>
    %656 = arith.mulf %655, %654 : vector<2x128xf32>
    %cst_137 = arith.constant 5.000000e-01 : f32
    %657 = vector.broadcast %cst_137 : f32 to vector<2x128xf32>
    %658 = arith.addf %656, %657 : vector<2x128xf32>
    %659 = arith.select %17, %654, %658 : vector<2x128xi1>, vector<2x128xf32>
    %660 = vector.extract_strided_slice %659 {offsets = [0, 0], sizes = [2, 32], strides = [1, 1]} : vector<2x128xf32> to vector<2x32xf32>
    %661 = vector.extract_strided_slice %659 {offsets = [0, 64], sizes = [2, 32], strides = [1, 1]} : vector<2x128xf32> to vector<2x32xf32>
    %662 = vector.extract_strided_slice %659 {offsets = [0, 96], sizes = [2, 32], strides = [1, 1]} : vector<2x128xf32> to vector<2x32xf32>
    %663 = vector.extract_strided_slice %659 {offsets = [0, 32], sizes = [2, 32], strides = [1, 1]} : vector<2x128xf32> to vector<2x32xf32>
    %664 = arith.mulf %663, %642 : vector<2x32xf32>
    %665 = arith.mulf %660, %661 : vector<2x32xf32>
    %666 = arith.addf %664, %665 : vector<2x32xf32>
    %667 = math.tanh %666 : vector<2x32xf32>
    %668 = arith.mulf %662, %667 : vector<2x32xf32>
    %cst_138 = arith.constant dense<0.000000e+00> : vector<2x1xf32>
    %669 = tpu.matmul %668, %10, %cst_138 {dimension_numbers = #tpu.dot_dimension_numbers<[1], [0], [0], [1], [0, 0, 1, 1], [], []>} : vector<2x32xf32>, vector<32x1xf32>, vector<2x1xf32> -> vector<2x1xf32>
    %670 = vector.broadcast %11 : vector<1x1xf32> to vector<2x1xf32>
    %671 = arith.addf %669, %670 : vector<2x1xf32>
    %c14 = arith.constant 14 : index
    %c0_139 = arith.constant 0 : index
    %672 = vector.load %arg14[%c14, %c0_139] : memref<16x1xf32, #tpu.memory_space<vmem>>, vector<2x1xf32>
    tpu.vector_store %arg14[%c14, %c0_139], %671 {strides = array<i32>} : memref<16x1xf32, #tpu.memory_space<vmem>>, vector<2x1xf32>,
    return
  }
}

</mosaic_0001>

<bundles_post_ra>
// kernel: rnn_model_forward.1
= control target key start
LH: loop header
LB: loop body
LE: loop exit
PB: predicated region body
PF: predicated region fallthrough
CT: control target
= control target key end

     0   :  { %s5197_s0 = inlined_call_operand.vmem [shape: f32[16,4], index: 0, kind: input, shape index: {}]   ;;  %s5198_s1 = inlined_call_operand.vmem [shape: f32[16,6], index: 1, kind: input, shape index: {}]   ;;  %s5199_s2 = inlined_call_operand.hbm [shape: f32[4,128], index: 2, kind: input, shape index: {}]   ;;  %s5200_s3 = inlined_call_operand.vmem [shape: f32[1,128], index: 3, kind: input, shape index: {}]   ;;  %s5201_s4 = inlined_call_operand.vmem [shape: bf16[32,128], index: 4, kind: input, shape index: {}]   ;;  %s5202_s5 = inlined_call_operand.vmem [shape: bf16[64,128], index: 5, kind: input, shape index: {}]   ;;  %s5203_s6 = inlined_call_operand.vmem [shape: f32[1,128], index: 6, kind: input, shape index: {}]   ;;  %s5204_s7 = inlined_call_operand.vmem [shape: f32[6,128], index: 7, kind: input, shape index: {}]   ;;  %s5205_s8 = inlined_call_operand.vmem [shape: f32[1,128], index: 8, kind: input, shape index: {}]   ;;  %s5206_s9 = inlined_call_operand.vmem [shape: bf16[32,128], index: 9, kind: input, shape index: {}]   ;;  %s5207_s10 = inlined_call_operand.vmem [shape: bf16[64,128], index: 10, kind: input, shape index: {}]   ;;  %s5208_s11 = inlined_call_operand.vmem [shape: f32[1,128], index: 11, kind: input, shape index: {}]   ;;  %s5209_s12 = inlined_call_operand.vmem [shape: f32[32,1], index: 12, kind: input, shape index: {}]   ;;  %s5210_s13 = inlined_call_operand.<no memory space> [shape: f32[1,1], index: 13, kind: input, shape index: {}]   ;;  %s5211_s14 = inlined_call_operand.vmem [shape: f32[16,1], index: 14, kind: output, shape index: {}]  }
   0x1   :  { %v19_v0 = vstv %s5210_s13 }
   0x2   :  { %20 = vst [vmem:[#allocation2] sm:$0x1] %v19_v0 }
   0x3   :  { %21 = vsyncpa [#allocation4], 0  ;;  %s4204_s15 = smov [#allocation3]   ;;  %s4180_s19 = scalar_lea.hbm %s5199_s2, 64 }
   0x4   :  { %s32_s16 = sshll.u32 %s4204_s15, 4  ;;  %p4181_p0 = scmp.ne.s32.totalorder %s5199_s2, %s4180_s19  ;;  %s33_s16 = int_to_ptr.vmem [resolvable:$true] %s32_s16 }
   0x5   :  { %p4184_p1 = scmp.lt.u32.totalorder %s4180_s19, %s5199_s2 }
   0x7   :  { %p4186_p2 = pnand %p4184_p1, %p4181_p0 }
   0x9   :  { %4189 = shalt.err (!%p4186_p2)
}
   0xa   :  { %s4190_s13 = scalar_lea.vmem %s33_s16, 64  ;;  %p4195_p4 = scmp.lt.s32.totalorder %s33_s16, %s33_s16 }
   0xb   :  { %p4191_p3 = scmp.ne.s32.totalorder %s33_s16, %s4190_s13  ;;  %p4196_p5 = scmp.lt.s32.totalorder %s4190_s13, %s4190_s13 }
   0xd   :  { %p4197_p6 = por %p4196_p5, %p4195_p4 }
   0xf   :  { %p4198_p7 = pnand %p4197_p6, %p4191_p3 }
  0x11   :  { %4201 = shalt.err (!%p4198_p7)
}
  0x12   :  { %35 = dma.hbm_to_vmem [thread:$0]  %s5199_s2, 64, %s33_s16, [#allocation4]  }
  0x13   :  { %4202 = dma.done.wait [#allocation4], 64  }
  0x14   :  { %4203 = vsyncadd [#allocation4], 4294967232  ;;  %vm117_vm0 = vcmask 1043456   ;;  %vm110_vm1 = vcmask 31744   ;;  %v62_v1 = vld [vmem:[#allocation3] sm:$0xf]  ;;  %v97_v9 = vlaneseq }
  0x15   :  { %v102_v2 = vld [vmem:[%s5197_s0] sm:$0xff]  ;;  %v103_v3 = vld [vmem:[%s5197_s0 + $0x8] sm:$0xff]  ;;  %3569 = vmatprep.subr.msk.mxu0 %vm117_vm0, %v62_v1  ;;  %s4205_s0 = smov 64   ;;  %vm211_vm5 = vcmask 1045504   ;;  %vm204_vm6 = vcmask 48128   ;;  %v4206_v23 = vmov 0.0  }
  0x16   :  { %3571 = vmatprep.mubr.msk.f32.mxu0 %vm110_vm1, %v102_v2  ;;  %3570 = vmatpush3.msk.msra.mxu0 %vm117_vm0, %v62_v1  ;;  %v3338_v4 = vld [vmem:[%s5200_s3] ss:$0 sm:$0xff]  ;;  %v98_v10 = vand.u32 127, %v97_v9  ;;  %v197_v20 = vld [vmem:[%s5198_s1 + $0x8] sm:$0xff]  ;;  %vm4207_vm7 = vmmov 0   ;;  %s4209_s25 = smov 32  }
  0x17   :  { %3572 = vmatmul.mubr.msk.f32.vlgmr.msra.gmra.mrb[0].mxu0 %vm110_vm1, %v103_v3  ;;  %v77_v18 = vld [vmem:[%s5204_s7] sm:$0x3f]  ;;  %3579 = vmatprep.subr.bf16.mxu0 %v4206_v23  ;;  %v4348_v24 = vld [vmem:[%s5201_s4 + $0x8] sm:$0xff]   ;;  %vm321_vm8 = vcmask 261120   ;;  %v4414_v2 = vld [vmem:[%s5202_s5 + $0x10] sm:$0xff]   ;;  %vm569_vm9 = vcmask 523264  }
  0x18   :  { %vm99_vm2 = vcmp.ge.s32.totalorder %v98_v10, 64  ;;  %vm100_vm3 = vcmp.lt.s32.totalorder %v98_v10, 96  ;;  %v196_v19 = vld [vmem:[%s5198_s1] sm:$0xff]  ;;  %3574 = vmatprep.subr.msk.mxu1 %vm211_vm5, %v77_v18  ;;  %v4353_v25 = vld [vmem:[%s5202_s5 + $0x8] sm:$0xff]   ;;  %3583 = vmatprep.mubr.msk.bf16.mxu0 %vm4207_vm7, %v4206_v23  ;;  %v4421_v3 = vld [vmem:[%s5202_s5 + $0x18] sm:$0xff]   ;;  %vm1818_vm10 = vcmask 1024  }
  0x19   :  { %vm4315_vm4 = vmand %vm99_vm2, %vm100_vm3  ;;  %3576 = vmatprep.mubr.msk.f32.mxu1 %vm204_vm6, %v196_v19  ;;  %v4334_v21 = vld [vmem:[%s5201_s4] sm:$0xff]   ;;  %3575 = vmatpush3.msk.msra.mxu1 %vm211_vm5, %v77_v18  ;;  %s4208_s4 = smov 96  }
  0x1a   :  { %v4339_v22 = vld [vmem:[%s5202_s5] sm:$0xff]   ;;  %3587 = vmatprep.subr.bf16.mxu1 %v4206_v23  ;;  %3577 = vmatmul.mubr.msk.f32.vlgmr.msra.gmra.mrb[0].mxu1 %vm204_vm6, %v197_v20 }
  0x1b   :  { %3580 = vmatpush3.bf16.msra.mxu0 %v4334_v21  ;;  %3588 = vmatpush3.bf16.msra.mxu1 %v4339_v22  ;;  %v3342_v31 = vld [vmem:[%s5205_s8] ss:$0 sm:$0xff] }
  0x1c   :  { %3581 = vmatprep.subr.bf16.mxu0 %v4206_v23  ;;  %3589 = vmatprep.subr.bf16.mxu1 %v4206_v23  ;;  %v4392_v36 = vld [vmem:[%s5203_s6] ss:$0 sm:$0xff] }
  0x1d   :  { %3591 = vmatprep.mubr.msk.bf16.mxu1 %vm4207_vm7, %v4206_v23 }
  0x1f   :  { %3582 = vmatpush3.bf16.msra.mxu0 %v4348_v24  ;;  %3590 = vmatpush3.bf16.msra.mxu1 %v4353_v25 }
  0x20   :  { %3595 = vmatprep.subr.bf16.mxu0 %v4206_v23  ;;  %3603 = vmatprep.subr.bf16.mxu1 %v4206_v23 }
  0xea   :  { %v3573_v5 = vpop.f32.mrb[0].mxu0 }
  0xeb   :  { %v4310_v6 = vadd.f32 %v3573_v5, %v3338_v4  ;;  %v187_v7 = vpop.f32.mrb[1].mxu0 }
  0xec   :  { %v4312_v8 = vadd.f32 %v3338_v4, %v187_v7 }
  0xed   :  { %v3578_v32 = vpop.f32.mrb[0].mxu1 }
  0xee   :  { %4042 = vtanh.f32 %v4312_v8  ;;  %v4371_v33 = vadd.f32 %v3578_v32, %v3342_v31  ;;  %v4373_v34 = vpop.f32.mrb[1].mxu1 }
  0xf8   :  { %v4043_v11 = vpop.eup %4042 }
  0xf9   :  { %v291_v12 = vmul.f32 0.5, %v4043_v11 }
  0xfb   :  { %v292_v14 = vadd.f32 0.5, %v291_v12 }
  0xfd   :  { %v293_v15 = vsel %vm4315_vm4, %v4043_v11, %v292_v14 }
  0xfe   :  { %295 = vrot.lane.b32.xlu0 %v293_v15, %s4205_s0 }
 0x170   :  { %v296_v16 = vpop.permute.xlu0 %295 }
 0x171   :  { %v298_v17 = vmul.f32 %v296_v16, %v293_v15 }
 0x173   :  { %4044 = vtanh.f32 %v298_v17  ;;  %v374_v27 = vrot.slane %v298_v17, 6 }
 0x17d   :  { %v4045_v26 = vpop.eup %4044 }
 0x17e   :  { %301 = vrot.lane.b32.xlu0 %v4045_v26, %s4208_s4 }
 0x182   :  { %375 = vrot.lane.b32.xlu0 %v374_v27, %s4209_s25 }
 0x1f0   :  { %v302_v28 = vpop.permute.xlu0 %301 }
 0x1f1   :  { %v304_v29 = vmul.f32 %v302_v28, %v293_v15 }
 0x1f3   :  { %v305_v30 = vpack.c.bf16 %v304_v29, %v304_v29 }
 0x1f4   :  { %v376_v56 = vpop.permute.xlu0 %375 }
 0x1f5   :  { %307 = vrot.lane.b32.xlu1 %v305_v30, %s4209_s25 }
 0x267   :  { %v308_v35 = vpop.permute.xlu1 %307 }
 0x268   :  { %3584 = vmatmul.mubr.msk.bf16.vlgmr.msra.gmra.mrb[4].mxu0 %vm321_vm8, %v308_v35  ;;  %3592 = vmatmul.mubr.msk.bf16.vlgmr.msra.gmra.mrb[4].mxu1 %vm321_vm8, %v308_v35 }
 0x269   :  { %3596 = vmatpush3.bf16.msra.mxu0 %v4334_v21  ;;  %3604 = vmatpush3.bf16.msra.mxu1 %v4339_v22 }
 0x26a   :  { %3597 = vmatprep.subr.bf16.mxu0 %v4206_v23  ;;  %3605 = vmatprep.subr.bf16.mxu1 %v4206_v23 }
 0x26b   :  { %3599 = vmatprep.mubr.msk.bf16.mxu0 %vm4207_vm7, %v4206_v23  ;;  %3611 = vmatprep.mubr.msk.bf16.mxu1 %vm4207_vm7, %v4206_v23 }
 0x26d   :  { %3598 = vmatpush3.bf16.msra.mxu0 %v4348_v24  ;;  %3606 = vmatpush3.bf16.msra.mxu1 %v4353_v25 }
 0x26e   :  { %3607 = vmatprep.subr.bf16.mxu1 %v4206_v23  ;;  %3615 = vmatprep.subr.bf16.mxu0 %v4206_v23 }
 0x271   :  { %3608 = vmatpush3.bf16.msra.mxu1 %v4414_v2 }
 0x272   :  { %3609 = vmatprep.subr.bf16.mxu1 %v4206_v23 }
 0x275   :  { %3610 = vmatpush3.bf16.msra.mxu1 %v4421_v3 }
 0x276   :  { %3635 = vmatprep.subr.bf16.mxu1 %v4206_v23 }
 0x33b   :  { %v359_v37 = vpop.f32.mrb[4].mxu0  ;;  %v447_v38 = vpop.f32.mrb[4].mxu1 }
 0x33c   :  { %v366_v39 = vrot.slane %v359_v37, 6  ;;  %v448_v40 = vadd.f32 %v4392_v36, %v447_v38  ;;  %v3585_v41 = vpop.f32.mrb[5].mxu0  ;;  %v3593_v42 = vpop.f32.mrb[5].mxu1 }
 0x33d   :  { %v362_v43 = vpop.f32.mrb[6].mxu0  ;;  %v450_v44 = vpop.f32.mrb[6].mxu1 }
 0x33e   :  { %v368_v45 = vadd.f32 %v366_v39, %v4312_v8  ;;  %4046 = vtanh.f32 %v448_v40  ;;  %v3586_v46 = vpop.f32.mrb[7].mxu0  ;;  %v3594_v47 = vpop.f32.mrb[7].mxu1 }
 0x340   :  { %4048 = vtanh.f32 %v368_v45 }
 0x348   :  { %v4047_v48 = vpop.eup %4046 }
 0x349   :  { %v454_v49 = vmul.f32 0.5, %v4047_v48 }
 0x34a   :  { %v4049_v50 = vpop.eup %4048 }
 0x34b   :  { %v455_v51 = vadd.f32 0.5, %v454_v49  ;;  %v370_v52 = vmul.f32 0.5, %v4049_v50 }
 0x34d   :  { %v456_v53 = vsel %vm4315_vm4, %v4047_v48, %v455_v51  ;;  %v371_v54 = vadd.f32 0.5, %v370_v52 }
 0x34e   :  { %458 = vrot.lane.b32.xlu0 %v456_v53, %s4205_s0 }
 0x34f   :  { %v372_v55 = vsel %vm4315_vm4, %v4049_v50, %v371_v54 }
 0x350   :  { %380 = vrot.lane.b32.xlu1 %v372_v55, %s4205_s0  ;;  %v378_v62 = vmul.f32 %v376_v56, %v372_v55 }
 0x3c0   :  { %v459_v57 = vpop.permute.xlu0 %458 }
 0x3c1   :  { %v4402_v58 = vmul.f32 %v459_v57, %v456_v53 }
 0x3c2   :  { %v381_v59 = vpop.permute.xlu1 %380 }
 0x3c3   :  { %4050 = vtanh.f32 %v4402_v58  ;;  %v383_v60 = vmul.f32 %v381_v59, %v372_v55 }
 0x3c5   :  { %385 = vrot.lane.b32.xlu1 %v383_v60, %s4209_s25 }
 0x3cd   :  { %v4051_v61 = vpop.eup %4050 }
 0x3ce   :  { %464 = vrot.lane.b32.xlu0 %v4051_v61, %s4208_s4 }
 0x437   :  { %v386_v63 = vpop.permute.xlu1 %385 }
 0x438   :  { %v4407_v0 = vadd.f32 %v386_v63, %v378_v62 }
 0x43a   :  { %4052 = vtanh.f32 %v4407_v0  ;;  %v525_v51 = vrot.slane %v4407_v0, 6 }
 0x440   :  { %v465_v7 = vpop.permute.xlu0 %464 }
 0x441   :  { %v467_v10 = vmul.f32 %v465_v7, %v456_v53 }
 0x443   :  { %v549_v12 = vrot.slane %v467_v10, 6 }
 0x444   :  { %v4053_v1 = vpop.eup %4052 }
 0x445   :  { %391 = vrot.lane.b32.xlu1 %v4053_v1, %s4205_s0 }
 0x4b7   :  { %v392_v4 = vpop.permute.xlu1 %391 }
 0x4b8   :  { %v394_v5 = vmul.f32 %v392_v4, %v372_v55 }
 0x4ba   :  { %v468_v9 = vpack.c.bf16 %v394_v5, %v394_v5  ;;  %545 = vrot.lane.b32.xlu0 %v394_v5, %s4209_s25 }
 0x4bc   :  { %v470_v11 = vrot.slane %v468_v9, 1 }
 0x4be   :  { %471 = vrot.lane.b32.xlu1 %v470_v11, %s4209_s25 }
 0x4c2   :  { %550 = vrot.lane.b32.xlu1 %v549_v12, %s4205_s0 }
 0x52c   :  { %v546_v15 = vpop.permute.xlu0 %545 }
 0x530   :  { %v472_v14 = vpop.permute.xlu1 %471 }
 0x531   :  { %3600 = vmatmul.mubr.msk.bf16.vlgmr.msra.gmra.mrb[8].mxu0 %vm321_vm8, %v472_v14 }
 0x532   :  { %3616 = vmatpush3.bf16.msra.mxu0 %v4334_v21  ;;  %3619 = vmatprep.mubr.msk.bf16.mxu0 %vm4207_vm7, %v4206_v23 }
 0x533   :  { %3617 = vmatprep.subr.bf16.mxu0 %v4206_v23 }
 0x534   :  { %v551_v16 = vpop.permute.xlu1 %550 }
 0x535   :  { %v553_v17 = vsel %vm321_vm8, %v546_v15, %v551_v16 }
 0x536   :  { %v554_v18 = vpack.c.bf16 %v553_v17, %v553_v17  ;;  %3618 = vmatpush3.bf16.msra.mxu0 %v4348_v24 }
 0x537   :  { %3623 = vmatprep.subr.bf16.mxu0 %v4206_v23 }
 0x538   :  { %v556_v19 = vrot.slane %v554_v18, 1 }
 0x53a   :  { %3612 = vmatmul.mubr.msk.bf16.vlgmr.msra.gmra.mrb[8].mxu1 %vm569_vm9, %v556_v19 }
 0x53b   :  { %3636 = vmatpush3.bf16.msra.mxu1 %v4334_v21  ;;  %3639 = vmatprep.mubr.msk.bf16.mxu1 %vm4207_vm7, %v4206_v23 }
 0x53c   :  { %3637 = vmatprep.subr.bf16.mxu1 %v4206_v23 }
 0x53f   :  { %3638 = vmatpush3.bf16.msra.mxu1 %v4348_v24 }
 0x540   :  { %3643 = vmatprep.subr.bf16.mxu1 %v4206_v23 }
 0x604   :  { %v510_v20 = vpop.f32.mrb[8].mxu0 }
 0x605   :  { %v517_v26 = vrot.slane %v510_v20, 4  ;;  %v3601_v27 = vpop.f32.mrb[9].mxu0 }
 0x606   :  { %v513_v28 = vpop.f32.mrb[10].mxu0 }
 0x607   :  { %v519_v29 = vadd.f32 %v517_v26, %v4312_v8  ;;  %v3602_v30 = vpop.f32.mrb[11].mxu0 }
 0x609   :  { %4054 = vtanh.f32 %v519_v29 }
 0x60d   :  { %v607_v31 = vpop.f32.mrb[8].mxu1 }
 0x60e   :  { %v608_v32 = vadd.f32 %v4392_v36, %v607_v31  ;;  %v3613_v35 = vpop.f32.mrb[9].mxu1 }
 0x60f   :  { %v610_v37 = vpop.f32.mrb[10].mxu1 }
 0x610   :  { %4056 = vtanh.f32 %v608_v32  ;;  %v3614_v38 = vpop.f32.mrb[11].mxu1 }
 0x613   :  { %v4055_v39 = vpop.eup %4054 }
 0x614   :  { %v521_v40 = vmul.f32 0.5, %v4055_v39 }
 0x616   :  { %v522_v41 = vadd.f32 0.5, %v521_v40 }
 0x618   :  { %v523_v42 = vsel %vm4315_vm4, %v4055_v39, %v522_v41 }
 0x619   :  { %529 = vrot.lane.b32.xlu0 %v523_v42, %s4205_s0  ;;  %v527_v52 = vmul.f32 %v525_v51, %v523_v42 }
 0x61a   :  { %v4057_v43 = vpop.eup %4056 }
 0x61b   :  { %v614_v44 = vmul.f32 0.5, %v4057_v43 }
 0x61d   :  { %v615_v45 = vadd.f32 0.5, %v614_v44 }
 0x61f   :  { %v616_v46 = vsel %vm4315_vm4, %v4057_v43, %v615_v45 }
 0x620   :  { %623 = vrot.lane.b32.xlu1 %v616_v46, %s4205_s0 }
 0x624   :  { %618 = vrot.lane.b32.xlu1 %v4402_v58, %s4209_s25 }
 0x68b   :  { %v530_v47 = vpop.permute.xlu0 %529 }
 0x68c   :  { %v532_v48 = vmul.f32 %v530_v47, %v523_v42 }
 0x68e   :  { %534 = vrot.lane.b32.xlu0 %v532_v48, %s4209_s25 }
 0x692   :  { %v624_v49 = vpop.permute.xlu1 %623 }
 0x693   :  { %v626_v50 = vmul.f32 %v624_v49, %v616_v46 }
 0x695   :  { %628 = vrot.lane.b32.xlu0 %v626_v50, %s4209_s25 }
 0x696   :  { %v619_v55 = vpop.permute.xlu1 %618 }
 0x697   :  { %v621_v56 = vmul.f32 %v619_v55, %v616_v46 }
 0x700   :  { %v535_v53 = vpop.permute.xlu0 %534 }
 0x701   :  { %v4456_v54 = vadd.f32 %v535_v53, %v527_v52 }
 0x703   :  { %4058 = vtanh.f32 %v4456_v54  ;;  %v695_v45 = vrot.slane %v4456_v54, 6 }
 0x707   :  { %v629_v57 = vpop.permute.xlu0 %628 }
 0x708   :  { %v4459_v58 = vadd.f32 %v629_v57, %v621_v56 }
 0x70a   :  { %4060 = vtanh.f32 %v4459_v58 }
 0x70d   :  { %v4059_v59 = vpop.eup %4058 }
 0x70e   :  { %540 = vrot.lane.b32.xlu1 %v4059_v59, %s4205_s0 }
 0x714   :  { %v4061_v60 = vpop.eup %4060 }
 0x715   :  { %634 = vrot.lane.b32.xlu0 %v4061_v60, %s4205_s0 }
 0x780   :  { %v541_v61 = vpop.permute.xlu1 %540 }
 0x781   :  { %v543_v62 = vmul.f32 %v541_v61, %v523_v42 }
 0x783   :  { %v638_v63 = vpack.c.bf16 %v543_v62, %v543_v62  ;;  %715 = vrot.lane.b32.xlu0 %v543_v62, %s4209_s25 }
 0x785   :  { %v640_v0 = vrot.slane %v638_v63, 2 }
 0x787   :  { %641 = vrot.lane.b32.xlu1 %v640_v0, %s4209_s25  ;;  %v635_v1 = vpop.permute.xlu0 %634 }
 0x788   :  { %v637_v4 = vmul.f32 %v635_v1, %v616_v46 }
 0x78a   :  { %v719_v5 = vrot.slane %v637_v4, 4 }
 0x78c   :  { %720 = vrot.lane.b32.xlu1 %v719_v5, %s4205_s0 }
 0x7f5   :  { %v716_v10 = vpop.permute.xlu0 %715 }
 0x7f9   :  { %v642_v7 = vpop.permute.xlu1 %641 }
 0x7fa   :  { %3620 = vmatmul.mubr.msk.bf16.vlgmr.msra.gmra.mrb[12].mxu0 %vm321_vm8, %v642_v7 }
 0x7fb   :  { %3624 = vmatpush3.bf16.msra.mxu0 %v4339_v22  ;;  %3631 = vmatprep.mubr.msk.bf16.mxu0 %vm4207_vm7, %v4206_v23 }
 0x7fc   :  { %3625 = vmatprep.subr.bf16.mxu0 %v4206_v23 }
 0x7fe   :  { %v721_v9 = vpop.permute.xlu1 %720 }
 0x7ff   :  { %3626 = vmatpush3.bf16.msra.mxu0 %v4353_v25  ;;  %v723_v11 = vsel %vm321_vm8, %v716_v10, %v721_v9 }
 0x800   :  { %3627 = vmatprep.subr.bf16.mxu0 %v4206_v23  ;;  %v724_v12 = vpack.c.bf16 %v723_v11, %v723_v11 }
 0x802   :  { %v726_v14 = vrot.slane %v724_v12, 2 }
 0x803   :  { %3628 = vmatpush3.bf16.msra.mxu0 %v4414_v2 }
 0x804   :  { %3629 = vmatprep.subr.bf16.mxu0 %v4206_v23 }
 0x807   :  { %3630 = vmatpush3.bf16.msra.mxu0 %v4421_v3 }
 0x808   :  { %3655 = vmatprep.subr.bf16.mxu0 %v4206_v23 }
 0x80a   :  { %3632 = vmatmul.mubr.msk.bf16.vlgmr.msra.gmra.mrb[16].mxu0 %vm569_vm9, %v726_v14 }
 0x80b   :  { %3656 = vmatpush3.bf16.msra.mxu0 %v4334_v21  ;;  %3659 = vmatprep.mubr.msk.bf16.mxu0 %vm4207_vm7, %v4206_v23 }
 0x80c   :  { %3657 = vmatprep.subr.bf16.mxu0 %v4206_v23 }
 0x80f   :  { %3658 = vmatpush3.bf16.msra.mxu0 %v4348_v24 }
 0x810   :  { %3663 = vmatprep.subr.bf16.mxu0 %v4206_v23 }
 0x8cd   :  { %v680_v15 = vpop.f32.mrb[12].mxu0 }
 0x8ce   :  { %v687_v16 = vrot.slane %v680_v15, 2  ;;  %v3621_v17 = vpop.f32.mrb[13].mxu0 }
 0x8cf   :  { %v683_v18 = vpop.f32.mrb[14].mxu0 }
 0x8d0   :  { %v689_v19 = vadd.f32 %v687_v16, %v4312_v8  ;;  %v3622_v20 = vpop.f32.mrb[15].mxu0 }
 0x8d2   :  { %4062 = vtanh.f32 %v689_v19 }
 0x8dc   :  { %v4063_v26 = vpop.eup %4062 }
 0x8dd   :  { %v764_v27 = vpop.f32.mrb[16].mxu0  ;;  %v691_v28 = vmul.f32 0.5, %v4063_v26 }
 0x8de   :  { %v765_v29 = vadd.f32 %v4392_v36, %v764_v27  ;;  %v3633_v30 = vpop.f32.mrb[17].mxu0 }
 0x8df   :  { %v767_v31 = vpop.f32.mrb[18].mxu0  ;;  %v692_v32 = vadd.f32 0.5, %v691_v28 }
 0x8e0   :  { %4064 = vtanh.f32 %v765_v29  ;;  %v3634_v35 = vpop.f32.mrb[19].mxu0 }
 0x8e1   :  { %v693_v37 = vsel %vm4315_vm4, %v4063_v26, %v692_v32 }
 0x8e2   :  { %699 = vrot.lane.b32.xlu0 %v693_v37, %s4205_s0  ;;  %v697_v46 = vmul.f32 %v695_v45, %v693_v37 }
 0x8ea   :  { %v4065_v38 = vpop.eup %4064 }
 0x8eb   :  { %v771_v39 = vmul.f32 0.5, %v4065_v38 }
 0x8ed   :  { %v772_v8 = vadd.f32 0.5, %v771_v39 }
 0x8ef   :  { %v773_v40 = vsel %vm4315_vm4, %v4065_v38, %v772_v8 }
 0x8f0   :  { %776 = vrot.lane.b32.xlu1 %v773_v40, %s4205_s0  ;;  %v774_v50 = vmul.f32 %v773_v40, %v4459_v58 }
 0x954   :  { %v700_v41 = vpop.permute.xlu0 %699 }
 0x955   :  { %v702_v42 = vmul.f32 %v700_v41, %v693_v37 }
 0x957   :  { %704 = vrot.lane.b32.xlu0 %v702_v42, %s4209_s25 }
 0x962   :  { %v777_v43 = vpop.permute.xlu1 %776 }
 0x963   :  { %v779_v44 = vmul.f32 %v777_v43, %v773_v40 }
 0x965   :  { %781 = vrot.lane.b32.xlu1 %v779_v44, %s4209_s25 }
 0x9c9   :  { %v705_v47 = vpop.permute.xlu0 %704 }
 0x9ca   :  { %v4497_v48 = vadd.f32 %v705_v47, %v697_v46 }
 0x9cc   :  { %4066 = vtanh.f32 %v4497_v48  ;;  %v845_v38 = vrot.slane %v4497_v48, 6 }
 0x9d6   :  { %v4067_v49 = vpop.eup %4066 }
 0x9d7   :  { %v782_v51 = vpop.permute.xlu1 %781  ;;  %710 = vrot.lane.b32.xlu0 %v4067_v49, %s4205_s0 }
 0x9d8   :  { %v4502_v52 = vadd.f32 %v782_v51, %v774_v50 }
 0x9da   :  { %4068 = vtanh.f32 %v4502_v52 }
 0x9e4   :  { %v4069_v53 = vpop.eup %4068 }
 0x9e5   :  { %787 = vrot.lane.b32.xlu1 %v4069_v53, %s4205_s0 }
 0xa49   :  { %v711_v54 = vpop.permute.xlu0 %710 }
 0xa4a   :  { %v713_v55 = vmul.f32 %v711_v54, %v693_v37 }
 0xa4c   :  { %v791_v56 = vpack.c.bf16 %v713_v55, %v713_v55  ;;  %865 = vrot.lane.b32.xlu1 %v713_v55, %s4209_s25 }
 0xa4e   :  { %v793_v57 = vrot.slane %v791_v56, 3 }
 0xa50   :  { %794 = vrot.lane.b32.xlu0 %v793_v57, %s4209_s25 }
 0xa57   :  { %v788_v59 = vpop.permute.xlu1 %787 }
 0xa58   :  { %v790_v58 = vmul.f32 %v788_v59, %v773_v40 }
 0xa5a   :  { %v869_v60 = vrot.slane %v790_v58, 2 }
 0xa5c   :  { %870 = vrot.lane.b32.xlu0 %v869_v60, %s4205_s0 }
 0xabe   :  { %v866_v62 = vpop.permute.xlu1 %865 }
 0xac2   :  { %v795_v61 = vpop.permute.xlu0 %794 }
 0xac3   :  { %3640 = vmatmul.mubr.msk.bf16.vlgmr.msra.gmra.mrb[12].mxu1 %vm321_vm8, %v795_v61 }
 0xac4   :  { %3644 = vmatpush3.bf16.msra.mxu1 %v4339_v22  ;;  %3651 = vmatprep.mubr.msk.bf16.mxu1 %vm4207_vm7, %v4206_v23 }
 0xac5   :  { %3645 = vmatprep.subr.bf16.mxu1 %v4206_v23 }
 0xac8   :  { %3646 = vmatpush3.bf16.msra.mxu1 %v4353_v25 }
 0xac9   :  { %3647 = vmatprep.subr.bf16.mxu1 %v4206_v23 }
 0xacc   :  { %3648 = vmatpush3.bf16.msra.mxu1 %v4414_v2 }
 0xacd   :  { %3649 = vmatprep.subr.bf16.mxu1 %v4206_v23 }
 0xace   :  { %v871_v63 = vpop.permute.xlu0 %870 }
 0xacf   :  { %v873_v0 = vsel %vm321_vm8, %v866_v62, %v871_v63 }
 0xad0   :  { %v874_v1 = vpack.c.bf16 %v873_v0, %v873_v0  ;;  %3650 = vmatpush3.bf16.msra.mxu1 %v4421_v3 }
 0xad1   :  { %3675 = vmatprep.subr.bf16.mxu1 %v4206_v23 }
 0xad2   :  { %v876_v4 = vrot.slane %v874_v1, 3 }
 0xad4   :  { %3652 = vmatmul.mubr.msk.bf16.vlgmr.msra.gmra.mrb[16].mxu1 %vm569_vm9, %v876_v4 }
 0xad5   :  { %3676 = vmatpush3.bf16.msra.mxu1 %v4334_v21  ;;  %3679 = vmatprep.mubr.msk.bf16.mxu1 %vm4207_vm7, %v4206_v23 }
 0xad6   :  { %3677 = vmatprep.subr.bf16.mxu1 %v4206_v23 }
 0xad9   :  { %3678 = vmatpush3.bf16.msra.mxu1 %v4348_v24 }
 0xada   :  { %3683 = vmatprep.subr.bf16.mxu1 %v4206_v23 }
 0xb96   :  { %v833_v5 = vpop.f32.mrb[12].mxu1 }
 0xb97   :  { %v839_v7 = vadd.f32 %v833_v5, %v4310_v6  ;;  %v3641_v9 = vpop.f32.mrb[13].mxu1 }
 0xb98   :  { %v836_v10 = vpop.f32.mrb[14].mxu1 }
 0xb99   :  { %4070 = vtanh.f32 %v839_v7  ;;  %v3642_v11 = vpop.f32.mrb[15].mxu1 }
 0xba3   :  { %v4071_v12 = vpop.eup %4070 }
 0xba4   :  { %v841_v14 = vmul.f32 0.5, %v4071_v12 }
 0xba6   :  { %v842_v15 = vadd.f32 0.5, %v841_v14 }
 0xba7   :  { %v914_v16 = vpop.f32.mrb[16].mxu1 }
 0xba8   :  { %v915_v17 = vadd.f32 %v4392_v36, %v914_v16  ;;  %v3653_v18 = vpop.f32.mrb[17].mxu1  ;;  %v843_v19 = vsel %vm4315_vm4, %v4071_v12, %v842_v15 }
 0xba9   :  { %v917_v20 = vpop.f32.mrb[18].mxu1  ;;  %849 = vrot.lane.b32.xlu1 %v843_v19, %s4205_s0  ;;  %v847_v39 = vmul.f32 %v845_v38, %v843_v19 }
 0xbaa   :  { %4072 = vtanh.f32 %v915_v17  ;;  %v3654_v26 = vpop.f32.mrb[19].mxu1 }
 0xbb4   :  { %v4073_v27 = vpop.eup %4072 }
 0xbb5   :  { %v921_v28 = vmul.f32 0.5, %v4073_v27 }
 0xbb7   :  { %v922_v29 = vadd.f32 0.5, %v921_v28 }
 0xbb9   :  { %v923_v30 = vsel %vm4315_vm4, %v4073_v27, %v922_v29 }
 0xbba   :  { %926 = vrot.lane.b32.xlu0 %v923_v30, %s4205_s0  ;;  %v924_v42 = vmul.f32 %v923_v30, %v4502_v52 }
 0xc1b   :  { %v850_v31 = vpop.permute.xlu1 %849 }
 0xc1c   :  { %v852_v32 = vmul.f32 %v850_v31, %v843_v19 }
 0xc1e   :  { %854 = vrot.lane.b32.xlu1 %v852_v32, %s4209_s25 }
 0xc2c   :  { %v927_v35 = vpop.permute.xlu0 %926 }
 0xc2d   :  { %v929_v37 = vmul.f32 %v927_v35, %v923_v30 }
 0xc2f   :  { %931 = vrot.lane.b32.xlu0 %v929_v37, %s4209_s25 }
 0xc90   :  { %v855_v8 = vpop.permute.xlu1 %854 }
 0xc91   :  { %v4539_v40 = vadd.f32 %v855_v8, %v847_v39 }
 0xc93   :  { %4074 = vtanh.f32 %v4539_v40  ;;  %v997_v18 = vrot.slane %v4539_v40, 6 }
 0xc9d   :  { %v4075_v41 = vpop.eup %4074 }
 0xc9e   :  { %860 = vrot.lane.b32.xlu1 %v4075_v41, %s4205_s0 }
 0xca1   :  { %v932_v43 = vpop.permute.xlu0 %931 }
 0xca2   :  { %v4544_v44 = vadd.f32 %v932_v43, %v924_v42 }
 0xca4   :  { %4076 = vtanh.f32 %v4544_v44 }
 0xcae   :  { %v4077_v45 = vpop.eup %4076 }
 0xcaf   :  { %937 = vrot.lane.b32.xlu0 %v4077_v45, %s4205_s0 }
 0xd10   :  { %v861_v46 = vpop.permute.xlu1 %860 }
 0xd11   :  { %v863_v47 = vmul.f32 %v861_v46, %v843_v19 }
 0xd13   :  { %v941_v48 = vpack.c.bf16 %v863_v47, %v863_v47  ;;  %1017 = vrot.lane.b32.xlu0 %v863_v47, %s4209_s25 }
 0xd15   :  { %943 = vrot.lane.b32.xlu1 %v941_v48, %s4209_s25 }
 0xd21   :  { %v938_v49 = vpop.permute.xlu0 %937 }
 0xd22   :  { %v940_v50 = vmul.f32 %v938_v49, %v923_v30 }
 0xd24   :  { %1021 = vrot.lane.b32.xlu1 %v940_v50, %s4205_s0 }
 0xd85   :  { %v1018_v52 = vpop.permute.xlu0 %1017 }
 0xd87   :  { %v944_v51 = vpop.permute.xlu1 %943 }
 0xd88   :  { %3660 = vmatmul.mubr.msk.bf16.vlgmr.msra.gmra.mrb[20].mxu0 %vm321_vm8, %v944_v51 }
 0xd89   :  { %3664 = vmatpush3.bf16.msra.mxu0 %v4339_v22  ;;  %3671 = vmatprep.mubr.msk.bf16.mxu0 %vm4207_vm7, %v4206_v23 }
 0xd8a   :  { %3665 = vmatprep.subr.bf16.mxu0 %v4206_v23 }
 0xd8d   :  { %3666 = vmatpush3.bf16.msra.mxu0 %v4353_v25 }
 0xd8e   :  { %3667 = vmatprep.subr.bf16.mxu0 %v4206_v23 }
 0xd91   :  { %3668 = vmatpush3.bf16.msra.mxu0 %v4414_v2 }
 0xd92   :  { %3669 = vmatprep.subr.bf16.mxu0 %v4206_v23 }
 0xd95   :  { %3670 = vmatpush3.bf16.msra.mxu0 %v4421_v3 }
 0xd96   :  { %v1022_v53 = vpop.permute.xlu1 %1021  ;;  %3695 = vmatprep.subr.bf16.mxu0 %v4206_v23 }
 0xd97   :  { %v1024_v54 = vsel %vm321_vm8, %v1018_v52, %v1022_v53 }
 0xd98   :  { %v1025_v55 = vpack.c.bf16 %v1024_v54, %v1024_v54 }
 0xd9a   :  { %3672 = vmatmul.mubr.msk.bf16.vlgmr.msra.gmra.mrb[24].mxu0 %vm569_vm9, %v1025_v55 }
 0xd9b   :  { %3696 = vmatpush3.bf16.msra.mxu0 %v4334_v21  ;;  %3699 = vmatprep.mubr.msk.bf16.mxu0 %vm4207_vm7, %v4206_v23 }
 0xd9c   :  { %3697 = vmatprep.subr.bf16.mxu0 %v4206_v23 }
 0xd9f   :  { %3698 = vmatpush3.bf16.msra.mxu0 %v4348_v24 }
 0xda0   :  { %3703 = vmatprep.subr.bf16.mxu0 %v4206_v23 }
 0xe5b   :  { %v982_v56 = vpop.f32.mrb[20].mxu0 }
 0xe5c   :  { %v989_v57 = vrot.slane %v982_v56, 6  ;;  %v3661_v59 = vpop.f32.mrb[21].mxu0 }
 0xe5d   :  { %v985_v58 = vpop.f32.mrb[22].mxu0 }
 0xe5e   :  { %v991_v60 = vadd.f32 %v989_v57, %v4310_v6  ;;  %v3662_v61 = vpop.f32.mrb[23].mxu0 }
 0xe60   :  { %4078 = vtanh.f32 %v991_v60 }
 0xe6a   :  { %v4079_v62 = vpop.eup %4078 }
 0xe6b   :  { %v993_v63 = vmul.f32 0.5, %v4079_v62 }
 0xe6d   :  { %v1063_v21 = vpop.f32.mrb[24].mxu0  ;;  %v994_v0 = vadd.f32 0.5, %v993_v63 }
 0xe6e   :  { %v1064_v1 = vadd.f32 %v4392_v36, %v1063_v21  ;;  %v3673_v4 = vpop.f32.mrb[25].mxu0 }
 0xe6f   :  { %v1066_v5 = vpop.f32.mrb[26].mxu0  ;;  %v995_v24 = vsel %vm4315_vm4, %v4079_v62, %v994_v0 }
 0xe70   :  { %4080 = vtanh.f32 %v1064_v1  ;;  %v3674_v7 = vpop.f32.mrb[27].mxu0  ;;  %1001 = vrot.lane.b32.xlu0 %v995_v24, %s4205_s0  ;;  %v999_v19 = vmul.f32 %v997_v18, %v995_v24 }
 0xe7a   :  { %v4081_v9 = vpop.eup %4080 }
 0xe7b   :  { %v1070_v10 = vmul.f32 0.5, %v4081_v9 }
 0xe7d   :  { %v1071_v11 = vadd.f32 0.5, %v1070_v10 }
 0xe7f   :  { %v1072_v12 = vsel %vm4315_vm4, %v4081_v9, %v1071_v11 }
 0xe80   :  { %1075 = vrot.lane.b32.xlu1 %v1072_v12, %s4205_s0  ;;  %v1073_v28 = vmul.f32 %v1072_v12, %v4544_v44 }
 0xee2   :  { %v1002_v14 = vpop.permute.xlu0 %1001 }
 0xee3   :  { %v1004_v15 = vmul.f32 %v1002_v14, %v995_v24 }
 0xee5   :  { %1006 = vrot.lane.b32.xlu0 %v1004_v15, %s4209_s25 }
 0xef2   :  { %v1076_v16 = vpop.permute.xlu1 %1075 }
 0xef3   :  { %v1078_v17 = vmul.f32 %v1076_v16, %v1072_v12 }
 0xef5   :  { %1080 = vrot.lane.b32.xlu1 %v1078_v17, %s4209_s25 }
 0xf57   :  { %v1007_v20 = vpop.permute.xlu0 %1006 }
 0xf58   :  { %v4581_v26 = vadd.f32 %v1007_v20, %v999_v19 }
 0xf5a   :  { %4082 = vtanh.f32 %v4581_v26  ;;  %v1147_v7 = vrot.slane %v4581_v26, 6 }
 0xf64   :  { %v4083_v27 = vpop.eup %4082 }
 0xf65   :  { %1012 = vrot.lane.b32.xlu0 %v4083_v27, %s4205_s0 }
 0xf67   :  { %v1081_v29 = vpop.permute.xlu1 %1080 }
 0xf68   :  { %v4586_v30 = vadd.f32 %v1081_v29, %v1073_v28 }
 0xf6a   :  { %4084 = vtanh.f32 %v4586_v30 }
 0xf74   :  { %v4085_v31 = vpop.eup %4084 }
 0xf75   :  { %1086 = vrot.lane.b32.xlu1 %v4085_v31, %s4205_s0 }
 0xfd7   :  { %v1013_v32 = vpop.permute.xlu0 %1012 }
 0xfd8   :  { %v1015_v35 = vmul.f32 %v1013_v32, %v995_v24 }
 0xfda   :  { %v1090_v37 = vpack.c.bf16 %v1015_v35, %v1015_v35  ;;  %1167 = vrot.lane.b32.xlu1 %v1015_v35, %s4209_s25 }
 0xfdc   :  { %v1092_v38 = vrot.slane %v1090_v37, 1 }
 0xfde   :  { %1093 = vrot.lane.b32.xlu0 %v1092_v38, %s4209_s25 }
 0xfe7   :  { %v1087_v39 = vpop.permute.xlu1 %1086 }
 0xfe8   :  { %v1089_v8 = vmul.f32 %v1087_v39, %v1072_v12 }
 0xfea   :  { %v1171_v40 = vrot.slane %v1089_v8, 6 }
 0xfec   :  { %1172 = vrot.lane.b32.xlu0 %v1171_v40, %s4205_s0 }
0x104c   :  { %v1168_v42 = vpop.permute.xlu1 %1167 }
0x1050   :  { %v1094_v41 = vpop.permute.xlu0 %1093 }
0x1051   :  { %3680 = vmatmul.mubr.msk.bf16.vlgmr.msra.gmra.mrb[20].mxu1 %vm321_vm8, %v1094_v41 }
0x1052   :  { %3684 = vmatpush3.bf16.msra.mxu1 %v4339_v22  ;;  %3691 = vmatprep.mubr.msk.bf16.mxu1 %vm4207_vm7, %v4206_v23 }
0x1053   :  { %3685 = vmatprep.subr.bf16.mxu1 %v4206_v23 }
0x1056   :  { %3686 = vmatpush3.bf16.msra.mxu1 %v4353_v25 }
0x1057   :  { %3687 = vmatprep.subr.bf16.mxu1 %v4206_v23 }
0x105a   :  { %3688 = vmatpush3.bf16.msra.mxu1 %v4414_v2 }
0x105b   :  { %3689 = vmatprep.subr.bf16.mxu1 %v4206_v23 }
0x105e   :  { %v1173_v43 = vpop.permute.xlu0 %1172  ;;  %3690 = vmatpush3.bf16.msra.mxu1 %v4421_v3 }
0x105f   :  { %v1175_v44 = vsel %vm321_vm8, %v1168_v42, %v1173_v43  ;;  %3715 = vmatprep.subr.bf16.mxu1 %v4206_v23 }
0x1060   :  { %v1176_v45 = vpack.c.bf16 %v1175_v44, %v1175_v44 }
0x1062   :  { %v1178_v46 = vrot.slane %v1176_v45, 1 }
0x1064   :  { %3692 = vmatmul.mubr.msk.bf16.vlgmr.msra.gmra.mrb[24].mxu1 %vm569_vm9, %v1178_v46 }
0x1065   :  { %3716 = vmatpush3.bf16.msra.mxu1 %v4339_v22  ;;  %3723 = vmatprep.mubr.msk.bf16.mxu1 %vm4207_vm7, %v4206_v23 }
0x1066   :  { %3717 = vmatprep.subr.bf16.mxu1 %v4206_v23 }
0x1069   :  { %3718 = vmatpush3.bf16.msra.mxu1 %v4353_v25 }
0x106a   :  { %3719 = vmatprep.subr.bf16.mxu1 %v4206_v23 }
0x106d   :  { %3720 = vmatpush3.bf16.msra.mxu1 %v4414_v2 }
0x106e   :  { %3721 = vmatprep.subr.bf16.mxu1 %v4206_v23 }
0x1071   :  { %3722 = vmatpush3.bf16.msra.mxu1 %v4421_v3 }
0x1072   :  { %3735 = vmatprep.subr.bf16.mxu1 %v4206_v23 }
0x1124   :  { %v1132_v47 = vpop.f32.mrb[20].mxu1 }
0x1125   :  { %v1139_v48 = vrot.slane %v1132_v47, 4  ;;  %v3681_v49 = vpop.f32.mrb[21].mxu1 }
0x1126   :  { %v1135_v50 = vpop.f32.mrb[22].mxu1 }
0x1127   :  { %v1141_v51 = vadd.f32 %v1139_v48, %v4310_v6  ;;  %v3682_v52 = vpop.f32.mrb[23].mxu1 }
0x1129   :  { %4086 = vtanh.f32 %v1141_v51 }
0x1133   :  { %v4087_v53 = vpop.eup %4086 }
0x1134   :  { %v1143_v54 = vmul.f32 0.5, %v4087_v53 }
0x1136   :  { %v1144_v55 = vadd.f32 0.5, %v1143_v54 }
0x1137   :  { %v1216_v56 = vpop.f32.mrb[24].mxu1 }
0x1138   :  { %v1217_v57 = vadd.f32 %v4392_v36, %v1216_v56  ;;  %v3693_v59 = vpop.f32.mrb[25].mxu1  ;;  %v1145_v58 = vsel %vm4315_vm4, %v4087_v53, %v1144_v55 }
0x1139   :  { %v1219_v60 = vpop.f32.mrb[26].mxu1  ;;  %1151 = vrot.lane.b32.xlu1 %v1145_v58, %s4205_s0  ;;  %v1149_v9 = vmul.f32 %v1147_v7, %v1145_v58 }
0x113a   :  { %4088 = vtanh.f32 %v1217_v57  ;;  %v3694_v61 = vpop.f32.mrb[27].mxu1 }
0x1144   :  { %v4089_v62 = vpop.eup %4088 }
0x1145   :  { %v1223_v63 = vmul.f32 0.5, %v4089_v62 }
0x1147   :  { %v1224_v21 = vadd.f32 0.5, %v1223_v63  ;;  %v4676_v63 = vld [vmem:[%s5206_s9] sm:$0xff]  }
0x1149   :  { %v1225_v0 = vsel %vm4315_vm4, %v4089_v62, %v1224_v21 }
0x114a   :  { %1228 = vrot.lane.b32.xlu0 %v1225_v0, %s4205_s0  ;;  %v1226_v14 = vmul.f32 %v1225_v0, %v4586_v30 }
0x11ab   :  { %v1152_v1 = vpop.permute.xlu1 %1151 }
0x11ac   :  { %v1154_v4 = vmul.f32 %v1152_v1, %v1145_v58 }
0x11ae   :  { %1156 = vrot.lane.b32.xlu1 %v1154_v4, %s4209_s25 }
0x11bc   :  { %v1229_v5 = vpop.permute.xlu0 %1228 }
0x11bd   :  { %v1231_v24 = vmul.f32 %v1229_v5, %v1225_v0 }
0x11bf   :  { %1233 = vrot.lane.b32.xlu0 %v1231_v24, %s4209_s25 }
0x1220   :  { %v1157_v10 = vpop.permute.xlu1 %1156 }
0x1221   :  { %v4627_v11 = vadd.f32 %v1157_v10, %v1149_v9 }
0x1223   :  { %4090 = vtanh.f32 %v4627_v11  ;;  %v1300_v55 = vrot.slane %v4627_v11, 6 }
0x122d   :  { %v4091_v12 = vpop.eup %4090 }
0x122e   :  { %1162 = vrot.lane.b32.xlu1 %v4091_v12, %s4205_s0 }
0x1231   :  { %v1234_v15 = vpop.permute.xlu0 %1233 }
0x1232   :  { %v4632_v16 = vadd.f32 %v1234_v15, %v1226_v14 }
0x1234   :  { %4092 = vtanh.f32 %v4632_v16 }
0x123e   :  { %v4093_v17 = vpop.eup %4092 }
0x123f   :  { %1239 = vrot.lane.b32.xlu0 %v4093_v17, %s4205_s0 }
0x12a0   :  { %v1163_v18 = vpop.permute.xlu1 %1162 }
0x12a1   :  { %v1165_v19 = vmul.f32 %v1163_v18, %v1145_v58  ;;  %v4170_v18 = vld [vmem:[%s5205_s8] ss:$0 sm:$0xff] }
0x12a3   :  { %v1243_v20 = vpack.c.bf16 %v1165_v19, %v1165_v19  ;;  %1320 = vrot.lane.b32.xlu0 %v1165_v19, %s4209_s25  ;;  %v4705_v19 = vadd.f32 %v4170_v18, %v4373_v34  ;;  %v4171_v34 = vld [vmem:[%s5203_s6] ss:$0 sm:$0xff] }
0x12a5   :  { %v1245_v26 = vrot.slane %v1243_v20, 2 }
0x12a7   :  { %1246 = vrot.lane.b32.xlu1 %v1245_v26, %s4209_s25 }
0x12b1   :  { %v1240_v27 = vpop.permute.xlu0 %1239 }
0x12b2   :  { %v1242_v28 = vmul.f32 %v1240_v27, %v1225_v0  ;;  %v4684_v0 = vld [vmem:[%s5206_s9 + $0x8] sm:$0xff]  }
0x12b4   :  { %v1324_v29 = vrot.slane %v1242_v28, 4 }
0x12b6   :  { %1325 = vrot.lane.b32.xlu1 %v1324_v29, %s4205_s0 }
0x1315   :  { %v1321_v31 = vpop.permute.xlu0 %1320 }
0x1319   :  { %v1247_v30 = vpop.permute.xlu1 %1246 }
0x131a   :  { %3700 = vmatmul.mubr.msk.bf16.vlgmr.msra.gmra.mrb[28].mxu0 %vm321_vm8, %v1247_v30 }
0x131b   :  { %3704 = vmatpush3.bf16.msra.mxu0 %v4339_v22  ;;  %3711 = vmatprep.mubr.msk.bf16.mxu0 %vm4207_vm7, %v4206_v23 }
0x131c   :  { %3705 = vmatprep.subr.bf16.mxu0 %v4206_v23 }
0x131f   :  { %3706 = vmatpush3.bf16.msra.mxu0 %v4353_v25 }
0x1320   :  { %3707 = vmatprep.subr.bf16.mxu0 %v4206_v23 }
0x1323   :  { %3708 = vmatpush3.bf16.msra.mxu0 %v4414_v2 }
0x1324   :  { %3709 = vmatprep.subr.bf16.mxu0 %v4206_v23 }
0x1327   :  { %3710 = vmatpush3.bf16.msra.mxu0 %v4421_v3 }
0x1328   :  { %v1326_v32 = vpop.permute.xlu1 %1325  ;;  %3727 = vmatprep.subr.bf16.mxu0 %v4206_v23 }
0x1329   :  { %v1328_v22 = vsel %vm321_vm8, %v1321_v31, %v1326_v32 }
0x132a   :  { %v1329_v35 = vpack.c.bf16 %v1328_v22, %v1328_v22 }
0x132c   :  { %v1331_v37 = vrot.slane %v1329_v35, 2 }
0x132e   :  { %3712 = vmatmul.mubr.msk.bf16.vlgmr.msra.gmra.mrb[32].mxu0 %vm569_vm9, %v1331_v37 }
0x132f   :  { %3731 = vmatprep.mubr.msk.bf16.mxu0 %vm4207_vm7, %v4206_v23  ;;  %3728 = vmatpush3.bf16.msra.mxu0 %v4676_v63 }
0x1330   :  { %3729 = vmatprep.subr.bf16.mxu0 %v4206_v23 }
0x1333   :  { %3730 = vmatpush3.bf16.msra.mxu0 %v4684_v0 }
0x1334   :  { %3743 = vmatprep.subr.bf16.mxu0 %v4206_v23 }
0x13ed   :  { %v1285_v25 = vpop.f32.mrb[28].mxu0 }
0x13ee   :  { %v1292_v38 = vrot.slane %v1285_v25, 2  ;;  %v3701_v2 = vpop.f32.mrb[29].mxu0 }
0x13ef   :  { %v1288_v39 = vpop.f32.mrb[30].mxu0 }
0x13f0   :  { %v1294_v8 = vadd.f32 %v1292_v38, %v4310_v6  ;;  %v3702_v3 = vpop.f32.mrb[31].mxu0 }
0x13f2   :  { %4094 = vtanh.f32 %v1294_v8 }
0x13fc   :  { %v4095_v40 = vpop.eup %4094 }
0x13fd   :  { %v1296_v41 = vmul.f32 0.5, %v4095_v40 }
0x13ff   :  { %v1297_v42 = vadd.f32 0.5, %v1296_v41 }
0x1401   :  { %v1369_v43 = vpop.f32.mrb[32].mxu0  ;;  %v1298_v44 = vsel %vm4315_vm4, %v4095_v40, %v1297_v42 }
0x1402   :  { %v1370_v45 = vadd.f32 %v4392_v36, %v1369_v43  ;;  %v3713_v46 = vpop.f32.mrb[33].mxu0  ;;  %1304 = vrot.lane.b32.xlu1 %v1298_v44, %s4205_s0  ;;  %v1302_v56 = vmul.f32 %v1300_v55, %v1298_v44  ;;  %v4745_v55 = vld [vmem:[%s5207_s10 + $0x10] sm:$0xff]  }
0x1403   :  { %v1372_v47 = vpop.f32.mrb[34].mxu0 }
0x1404   :  { %4096 = vtanh.f32 %v1370_v45  ;;  %v3714_v48 = vpop.f32.mrb[35].mxu0 }
0x140e   :  { %v4097_v49 = vpop.eup %4096 }
0x140f   :  { %v1376_v50 = vmul.f32 0.5, %v4097_v49 }
0x1411   :  { %v1377_v6 = vadd.f32 0.5, %v1376_v50 }
0x1413   :  { %v1378_v51 = vsel %vm4315_vm4, %v4097_v49, %v1377_v6 }
0x1414   :  { %1381 = vrot.lane.b32.xlu0 %v1378_v51, %s4205_s0  ;;  %v1379_v60 = vmul.f32 %v1378_v51, %v4632_v16 }
0x1474   :  { %v1305_v52 = vpop.permute.xlu1 %1304 }
0x1475   :  { %v1307_v53 = vmul.f32 %v1305_v52, %v1298_v44 }
0x1477   :  { %1309 = vrot.lane.b32.xlu1 %v1307_v53, %s4209_s25  ;;  %v4732_v53 = vld [vmem:[%s5207_s10] sm:$0xff]  }
0x1486   :  { %v1382_v54 = vpop.permute.xlu0 %1381 }
0x1487   :  { %v1384_v36 = vmul.f32 %v1382_v54, %v1378_v51  ;;  %v4738_v54 = vld [vmem:[%s5207_s10 + $0x8] sm:$0xff]  }
0x1489   :  { %1386 = vrot.lane.b32.xlu0 %v1384_v36, %s4209_s25 }
0x14e9   :  { %v1310_v57 = vpop.permute.xlu1 %1309 }
0x14ea   :  { %v4665_v59 = vadd.f32 %v1310_v57, %v1302_v56 }
0x14ec   :  { %4098 = vtanh.f32 %v4665_v59  ;;  %v1539_v45 = vrot.slane %v4665_v59, 6  ;;  %v4755_v59 = vld [vmem:[%s5207_s10 + $0x18] sm:$0xff]  }
0x14f6   :  { %v4099_v58 = vpop.eup %4098 }
0x14f7   :  { %1315 = vrot.lane.b32.xlu1 %v4099_v58, %s4205_s0 }
0x14fb   :  { %v1387_v61 = vpop.permute.xlu0 %1386 }
0x14fc   :  { %v4670_v62 = vadd.f32 %v1387_v61, %v1379_v60 }
0x14fe   :  { %4100 = vtanh.f32 %v4670_v62 }
0x1508   :  { %v4101_v21 = vpop.eup %4100 }
0x1509   :  { %1392 = vrot.lane.b32.xlu0 %v4101_v21, %s4205_s0 }
0x1569   :  { %v1316_v1 = vpop.permute.xlu1 %1315 }
0x156a   :  { %v1318_v4 = vmul.f32 %v1316_v1, %v1298_v44 }
0x156c   :  { %v1473_v5 = vpack.c.bf16 %v1318_v4, %v1318_v4  ;;  %1397 = vrot.lane.b32.xlu0 %v1318_v4, %s4209_s25 }
0x156e   :  { %v1475_v24 = vrot.slane %v1473_v5, 3 }
0x1570   :  { %1476 = vrot.lane.b32.xlu0 %v1475_v24, %s4209_s25 }
0x157b   :  { %v1393_v7 = vpop.permute.xlu0 %1392 }
0x157c   :  { %v1395_v9 = vmul.f32 %v1393_v7, %v1378_v51 }
0x157e   :  { %v1401_v10 = vrot.slane %v1395_v9, 2 }
0x1580   :  { %1402 = vrot.lane.b32.xlu1 %v1401_v10, %s4205_s0 }
0x15de   :  { %v1398_v11 = vpop.permute.xlu0 %1397 }
0x15e2   :  { %v1477_v12 = vpop.permute.xlu0 %1476 }
0x15e3   :  { %3732 = vmatmul.mubr.msk.bf16.vlgmr.msra.gmra.mrb[36].mxu0 %vm321_vm8, %v1477_v12 }
0x15e4   :  { %3751 = vmatprep.mubr.msk.bf16.mxu0 %vm4207_vm7, %v4206_v23  ;;  %3744 = vmatpush3.bf16.msra.mxu0 %v4732_v53 }
0x15e5   :  { %3745 = vmatprep.subr.bf16.mxu0 %v4206_v23 }
0x15e8   :  { %3746 = vmatpush3.bf16.msra.mxu0 %v4738_v54 }
0x15e9   :  { %3747 = vmatprep.subr.bf16.mxu0 %v4206_v23 }
0x15ec   :  { %3748 = vmatpush3.bf16.msra.mxu0 %v4745_v55 }
0x15ed   :  { %3749 = vmatprep.subr.bf16.mxu0 %v4206_v23 }
0x15f0   :  { %3750 = vmatpush3.bf16.msra.mxu0 %v4755_v59 }
0x15f1   :  { %3774 = vmatprep.subr.bf16.mxu0 %v4206_v23 }
0x15f2   :  { %v1403_v14 = vpop.permute.xlu1 %1402 }
0x15f3   :  { %v1405_v15 = vsel %vm321_vm8, %v1398_v11, %v1403_v14 }
0x15f4   :  { %v1406_v16 = vpack.c.bf16 %v1405_v15, %v1405_v15  ;;  %v4779_v15 = vld [vmem:[%s5208_s11] ss:$0 sm:$0xff] }
0x15f6   :  { %v1408_v17 = vrot.slane %v1406_v16, 3 }
0x15f8   :  { %3724 = vmatmul.mubr.msk.bf16.vlgmr.msra.gmra.mrb[28].mxu1 %vm569_vm9, %v1408_v17 }
0x15f9   :  { %3736 = vmatpush3.bf16.msra.mxu1 %v4676_v63  ;;  %3739 = vmatprep.mubr.msk.bf16.mxu1 %vm4207_vm7, %v4206_v23 }
0x15fa   :  { %3737 = vmatprep.subr.bf16.mxu1 %v4206_v23 }
0x15fd   :  { %3738 = vmatpush3.bf16.msra.mxu1 %v4684_v0 }
0x16b6   :  { %v1527_v20 = vpop.f32.mrb[36].mxu0 }
0x16b7   :  { %v1533_v26 = vadd.f32 %v1527_v20, %v4705_v19  ;;  %v3733_v27 = vpop.f32.mrb[37].mxu0 }
0x16b8   :  { %v1530_v28 = vpop.f32.mrb[38].mxu0 }
0x16b9   :  { %4102 = vtanh.f32 %v1533_v26  ;;  %v3734_v29 = vpop.f32.mrb[39].mxu0 }
0x16c3   :  { %v4103_v30 = vpop.eup %4102 }
0x16c4   :  { %v1535_v31 = vmul.f32 0.5, %v4103_v30 }
0x16c6   :  { %v1536_v32 = vadd.f32 0.5, %v1535_v31 }
0x16c8   :  { %v1537_v22 = vsel %vm4315_vm4, %v4103_v30, %v1536_v32 }
0x16c9   :  { %1543 = vrot.lane.b32.xlu0 %v1537_v22, %s4205_s0  ;;  %v1541_v46 = vmul.f32 %v1539_v45, %v1537_v22  ;;  %v94_v45 = vld [vmem:[%s5209_s12 + $0x10] sm:$0xff] }
0x16cb   :  { %v1446_v35 = vpop.f32.mrb[28].mxu1 }
0x16cc   :  { %v1447_v37 = vadd.f32 %v4171_v34, %v1446_v35  ;;  %v3725_v25 = vpop.f32.mrb[29].mxu1 }
0x16cd   :  { %v1449_v38 = vpop.f32.mrb[30].mxu1 }
0x16ce   :  { %4104 = vtanh.f32 %v1447_v37  ;;  %v3726_v2 = vpop.f32.mrb[31].mxu1 }
0x16d8   :  { %v4105_v39 = vpop.eup %4104 }
0x16d9   :  { %v1453_v8 = vmul.f32 0.5, %v4105_v39 }
0x16db   :  { %v1454_v3 = vadd.f32 0.5, %v1453_v8 }
0x16dd   :  { %v1455_v40 = vsel %vm4315_vm4, %v4105_v39, %v1454_v3 }
0x16de   :  { %1458 = vrot.lane.b32.xlu1 %v1455_v40, %s4205_s0  ;;  %v1456_v50 = vmul.f32 %v1455_v40, %v4670_v62 }
0x173b   :  { %v1544_v41 = vpop.permute.xlu0 %1543 }
0x173c   :  { %v1546_v42 = vmul.f32 %v1544_v41, %v1537_v22 }
0x173e   :  { %1548 = vrot.lane.b32.xlu0 %v1546_v42, %s4209_s25 }
0x1750   :  { %v1459_v43 = vpop.permute.xlu1 %1458 }
0x1751   :  { %v1461_v44 = vmul.f32 %v1459_v43, %v1455_v40  ;;  %v92_v43 = vld [vmem:[%s5209_s12] sm:$0xff] }
0x1753   :  { %1463 = vrot.lane.b32.xlu1 %v1461_v44, %s4209_s25  ;;  %v93_v44 = vld [vmem:[%s5209_s12 + $0x8] sm:$0xff] }
0x17b0   :  { %v1549_v47 = vpop.permute.xlu0 %1548 }
0x17b1   :  { %v4720_v48 = vadd.f32 %v1549_v47, %v1541_v46  ;;  %v4210_v46 = vmov 0.0|0.0   ;;  %v4810_v47 = vpack.c.bf16 %v93_v44, %v92_v43 }
0x17b2   :  { %3975 = vmatprep.subr.bf16.mxu1 %v4210_v46 }
0x17b3   :  { %4106 = vtanh.f32 %v4720_v48  ;;  %v1614_v25 = vrot.slane %v4720_v48, 6  ;;  %v95_v48 = vld [vmem:[%s5209_s12 + $0x18] sm:$0xff] }
0x17bd   :  { %v4107_v49 = vpop.eup %4106 }
0x17be   :  { %1554 = vrot.lane.b32.xlu0 %v4107_v49, %s4205_s0  ;;  %v4816_v49 = vpack.c.bf16 %v95_v48, %v94_v45 }
0x17c5   :  { %v1464_v6 = vpop.permute.xlu1 %1463 }
0x17c6   :  { %v4725_v51 = vadd.f32 %v1464_v6, %v1456_v50 }
0x17c8   :  { %4108 = vtanh.f32 %v4725_v51 }
0x17d2   :  { %v4109_v52 = vpop.eup %4108 }
0x17d3   :  { %1469 = vrot.lane.b32.xlu1 %v4109_v52, %s4205_s0 }
0x1830   :  { %v1555_v36 = vpop.permute.xlu0 %1554 }
0x1831   :  { %v1557_v56 = vmul.f32 %v1555_v36, %v1537_v22 }
0x1833   :  { %1634 = vrot.lane.b32.xlu1 %v1557_v56, %s4209_s25  ;;  %v1558_v57 = vpack.c.bf16 %v1557_v56, %v1557_v56 }
0x1837   :  { %1560 = vrot.lane.b32.xlu1 %v1558_v57, %s4209_s25 }
0x1845   :  { %v1470_v58 = vpop.permute.xlu1 %1469 }
0x1846   :  { %v1472_v60 = vmul.f32 %v1470_v58, %v1455_v40 }
0x1848   :  { %1638 = vrot.lane.b32.xlu0 %v1472_v60, %s4205_s0 }
0x18a5   :  { %v1635_v61 = vpop.permute.xlu1 %1634 }
0x18a9   :  { %v1561_v62 = vpop.permute.xlu1 %1560 }
0x18aa   :  { %3740 = vmatmul.mubr.msk.bf16.vlgmr.msra.gmra.mrb[32].mxu1 %vm321_vm8, %v1561_v62 }
0x18ab   :  { %3763 = vmatprep.mubr.msk.f32.mxu1 %vm4207_vm7, %v4206_v23  ;;  %3977 = vmatpush3.bf16.msra.mxu1 %v4810_v47 }
0x18ac   :  { %3978 = vmatprep.subr.bf16.mxu1 %v4210_v46 }
0x18af   :  { %3980 = vmatpush3.bf16.msra.mxu1 %v4816_v49 }
0x18b0   :  { %3766 = vmatprep.subr.bf16.mxu1 %v4206_v23 }
0x18ba   :  { %v1639_v21 = vpop.permute.xlu0 %1638 }
0x18bb   :  { %v1641_v1 = vsel %vm321_vm8, %v1635_v61, %v1639_v21 }
0x18bc   :  { %v1642_v4 = vpack.c.bf16 %v1641_v1, %v1641_v1 }
0x18be   :  { %3752 = vmatmul.mubr.msk.bf16.vlgmr.msra.gmra.mrb[40].mxu0 %vm569_vm9, %v1642_v4 }
0x18bf   :  { %3775 = vmatpush3.bf16.msra.mxu0 %v4732_v53  ;;  %3782 = vmatprep.mubr.msk.bf16.mxu0 %vm4207_vm7, %v4206_v23 }
0x18c0   :  { %3776 = vmatprep.subr.bf16.mxu0 %v4206_v23 }
0x18c3   :  { %3777 = vmatpush3.bf16.msra.mxu0 %v4738_v54 }
0x18c4   :  { %3778 = vmatprep.subr.bf16.mxu0 %v4206_v23 }
0x18c7   :  { %3779 = vmatpush3.bf16.msra.mxu0 %v4745_v55 }
0x18c8   :  { %3780 = vmatprep.subr.bf16.mxu0 %v4206_v23 }
0x18cb   :  { %3781 = vmatpush3.bf16.msra.mxu0 %v4755_v59 }
0x18cc   :  { %3805 = vmatprep.subr.bf16.mxu0 %v4206_v23 }
0x197d   :  { %v1599_v5 = vpop.f32.mrb[32].mxu1 }
0x197e   :  { %v1606_v24 = vrot.slane %v1599_v5, 6  ;;  %v3741_v7 = vpop.f32.mrb[33].mxu1  ;;  %v4851_v5 = vld [vmem:[#allocation2] ss:$0 sm:$0xff] }
0x197f   :  { %v1602_v9 = vpop.f32.mrb[34].mxu1 }
0x1980   :  { %v1608_v10 = vadd.f32 %v1606_v24, %v4705_v19  ;;  %v3742_v11 = vpop.f32.mrb[35].mxu1 }
0x1982   :  { %4110 = vtanh.f32 %v1608_v10 }
0x198c   :  { %v4111_v12 = vpop.eup %4110 }
0x198d   :  { %v1610_v14 = vmul.f32 0.5, %v4111_v12 }
0x198f   :  { %v1611_v16 = vadd.f32 0.5, %v1610_v14 }
0x1991   :  { %v1710_v17 = vpop.f32.mrb[40].mxu0  ;;  %v1612_v18 = vsel %vm4315_vm4, %v4111_v12, %v1611_v16 }
0x1992   :  { %v1711_v20 = vadd.f32 %v4779_v15, %v1710_v17  ;;  %v3753_v26 = vpop.f32.mrb[41].mxu0  ;;  %1618 = vrot.lane.b32.xlu1 %v1612_v18, %s4205_s0  ;;  %v1616_v38 = vmul.f32 %v1614_v25, %v1612_v18 }
0x1993   :  { %v1713_v27 = vpop.f32.mrb[42].mxu0 }
0x1994   :  { %4112 = vtanh.f32 %v1711_v20  ;;  %v3754_v28 = vpop.f32.mrb[43].mxu0 }
0x199e   :  { %v4113_v29 = vpop.eup %4112 }
0x199f   :  { %v1717_v30 = vmul.f32 0.5, %v4113_v29 }
0x19a1   :  { %v1718_v31 = vadd.f32 0.5, %v1717_v30 }
0x19a3   :  { %v1719_v32 = vsel %vm4315_vm4, %v4113_v29, %v1718_v31 }
0x19a4   :  { %1722 = vrot.lane.b32.xlu0 %v1719_v32, %s4205_s0  ;;  %v1720_v3 = vmul.f32 %v1719_v32, %v4725_v51 }
0x1a04   :  { %v1619_v22 = vpop.permute.xlu1 %1618 }
0x1a05   :  { %v1621_v35 = vmul.f32 %v1619_v22, %v1612_v18 }
0x1a07   :  { %1623 = vrot.lane.b32.xlu1 %v1621_v35, %s4209_s25 }
0x1a16   :  { %v1723_v34 = vpop.permute.xlu0 %1722 }
0x1a17   :  { %v1725_v37 = vmul.f32 %v1723_v34, %v1719_v32 }
0x1a19   :  { %1727 = vrot.lane.b32.xlu0 %v1725_v37, %s4209_s25 }
0x1a79   :  { %v1624_v2 = vpop.permute.xlu1 %1623 }
0x1a7a   :  { %v4791_v39 = vadd.f32 %v1624_v2, %v1616_v38 }
0x1a7c   :  { %4114 = vtanh.f32 %v4791_v39 }
0x1a86   :  { %v4115_v8 = vpop.eup %4114 }
0x1a87   :  { %1629 = vrot.lane.b32.xlu1 %v4115_v8, %s4205_s0 }
0x1a8b   :  { %v1728_v40 = vpop.permute.xlu0 %1727 }
0x1a8c   :  { %v4796_v41 = vadd.f32 %v1728_v40, %v1720_v3  ;;  %v1877_v3 = vrot.slane %v4791_v39, 6 }
0x1a8e   :  { %4116 = vtanh.f32 %v4796_v41 }
0x1a98   :  { %v4117_v42 = vpop.eup %4116 }
0x1a99   :  { %1733 = vrot.lane.b32.xlu0 %v4117_v42, %s4205_s0 }
0x1af9   :  { %v1630_v50 = vpop.permute.xlu1 %1629 }
0x1afa   :  { %v1632_v6 = vmul.f32 %v1630_v50, %v1612_v18 }
0x1afc   :  { %v1820_v51 = vpack.c.bf16 %v1632_v6, %v1632_v6  ;;  %1897 = vrot.lane.b32.xlu1 %v1632_v6, %s4209_s25 }
0x1afe   :  { %v1822_v52 = vrot.slane %v1820_v51, 1 }
0x1b00   :  { %1823 = vrot.lane.b32.xlu1 %v1822_v52, %s4209_s25 }
0x1b0b   :  { %v1734_v36 = vpop.permute.xlu0 %1733 }
0x1b0c   :  { %v1736_v56 = vmul.f32 %v1734_v36, %v1719_v32 }
0x1b0e   :  { %1744 = vrot.lane.b32.xlu0 %v1736_v56, %s4209_s25  ;;  %v1900_v57 = vrot.slane %v1736_v56, 6 }
0x1b12   :  { %1901 = vrot.lane.b32.xlu0 %v1900_v57, %s4205_s0 }
0x1b6e   :  { %v1898_v60 = vpop.permute.xlu1 %1897 }
0x1b72   :  { %v1824_v1 = vpop.permute.xlu1 %1823 }
0x1b80   :  { %v1745_v58 = vpop.permute.xlu0 %1744 }
0x1b81   :  { %3764 = vmatmul.mubr.msk.f32.vlgmr.msra.gmra.mrb[2].mxu1 %vm321_vm8, %v1745_v58 }
0x1b82   :  { %3767 = vmatpush3.bf16.msra.mxu1 %v4676_v63  ;;  %3770 = vmatprep.mubr.msk.bf16.mxu1 %vm4207_vm7, %v4206_v23 }
0x1b83   :  { %3768 = vmatprep.subr.bf16.mxu1 %v4206_v23 }
0x1b84   :  { %v1902_v61 = vpop.permute.xlu0 %1901 }
0x1b85   :  { %v1904_v62 = vsel %vm321_vm8, %v1898_v60, %v1902_v61 }
0x1b86   :  { %v1905_v21 = vpack.c.bf16 %v1904_v62, %v1904_v62  ;;  %3769 = vmatpush3.bf16.msra.mxu1 %v4684_v0 }
0x1b87   :  { %3981 = vmatprep.subr.bf16.mxu1 %v4210_v46 }
0x1b88   :  { %v1907_v4 = vrot.slane %v1905_v21, 1 }
0x1b89   :  { %3771 = vmatmul.mubr.msk.bf16.vlgmr.msra.gmra.mrb[36].mxu1 %vm321_vm8, %v1824_v1 }
0x1b8a   :  { %3783 = vmatmul.mubr.msk.bf16.vlgmr.msra.gmra.mrb[44].mxu0 %vm569_vm9, %v1907_v4  ;;  %3983 = vmatpush3.bf16.msra.mxu1 %v4810_v47 }
0x1b8b   :  { %3806 = vmatpush3.bf16.msra.mxu0 %v4732_v53  ;;  %3984 = vmatprep.subr.bf16.mxu1 %v4210_v46 }
0x1b8c   :  { %3807 = vmatprep.subr.bf16.mxu0 %v4206_v23  ;;  %3794 = vmatprep.mubr.msk.f32.mxu1 %vm4207_vm7, %v4206_v23 }
0x1b8d   :  { %3813 = vmatprep.mubr.msk.bf16.mxu0 %vm4207_vm7, %v4206_v23 }
0x1b8e   :  { %3986 = vmatpush3.bf16.msra.mxu1 %v4816_v49 }
0x1b8f   :  { %3808 = vmatpush3.bf16.msra.mxu0 %v4738_v54  ;;  %3797 = vmatprep.subr.bf16.mxu1 %v4206_v23 }
0x1b90   :  { %3809 = vmatprep.subr.bf16.mxu0 %v4206_v23 }
0x1b93   :  { %3810 = vmatpush3.bf16.msra.mxu0 %v4745_v55 }
0x1b94   :  { %3811 = vmatprep.subr.bf16.mxu0 %v4206_v23 }
0x1b97   :  { %3812 = vmatpush3.bf16.msra.mxu0 %v4755_v59 }
0x1b98   :  { %3836 = vmatprep.subr.bf16.mxu0 %v4206_v23 }
0x1c54   :  { %v1814_v24 = vpop.f32.mrb[2].mxu1 }
0x1c55   :  { %v1815_v7 = vadd.f32 %v4851_v5, %v1814_v24  ;;  %v3765_v9 = vpop.f32.mrb[3].mxu1 }
0x1c57   :  { %1819 = vst.msk [vmem:[%s5211_s14] sm:$0x3] %vm1818_vm10, %v1815_v7 }
0x1c5c   :  { %v1862_v10 = vpop.f32.mrb[36].mxu1 }
0x1c5d   :  { %v1869_v11 = vrot.slane %v1862_v10, 4  ;;  %v3772_v12 = vpop.f32.mrb[37].mxu1  ;;  %v1945_v14 = vpop.f32.mrb[44].mxu0 }
0x1c5e   :  { %v1865_v16 = vpop.f32.mrb[38].mxu1  ;;  %v1946_v17 = vadd.f32 %v4779_v15, %v1945_v14  ;;  %v3784_v18 = vpop.f32.mrb[45].mxu0 }
0x1c5f   :  { %v1871_v20 = vadd.f32 %v1869_v11, %v4705_v19  ;;  %v3773_v26 = vpop.f32.mrb[39].mxu1  ;;  %v1948_v27 = vpop.f32.mrb[46].mxu0 }
0x1c60   :  { %4118 = vtanh.f32 %v1946_v17  ;;  %v3785_v28 = vpop.f32.mrb[47].mxu0 }
0x1c61   :  { %4120 = vtanh.f32 %v1871_v20 }
0x1c6a   :  { %v4119_v29 = vpop.eup %4118 }
0x1c6b   :  { %v4121_v30 = vpop.eup %4120  ;;  %v1952_v31 = vmul.f32 0.5, %v4119_v29 }
0x1c6c   :  { %v1873_v32 = vmul.f32 0.5, %v4121_v30 }
0x1c6d   :  { %v1953_v22 = vadd.f32 0.5, %v1952_v31 }
0x1c6e   :  { %v1874_v35 = vadd.f32 0.5, %v1873_v32 }
0x1c6f   :  { %v1954_v34 = vsel %vm4315_vm4, %v4119_v29, %v1953_v22 }
0x1c70   :  { %1957 = vrot.lane.b32.xlu0 %v1954_v34, %s4205_s0  ;;  %v1875_v37 = vsel %vm4315_vm4, %v4121_v30, %v1874_v35  ;;  %v1955_v40 = vmul.f32 %v1954_v34, %v4796_v41 }
0x1c71   :  { %1881 = vrot.lane.b32.xlu1 %v1875_v37, %s4205_s0  ;;  %v1879_v43 = vmul.f32 %v1877_v3, %v1875_v37 }
0x1ce2   :  { %v1958_v25 = vpop.permute.xlu0 %1957 }
0x1ce3   :  { %v1960_v38 = vmul.f32 %v1958_v25, %v1954_v34  ;;  %v1882_v2 = vpop.permute.xlu1 %1881 }
0x1ce4   :  { %v1884_v8 = vmul.f32 %v1882_v2, %v1875_v37 }
0x1ce5   :  { %1962 = vrot.lane.b32.xlu0 %v1960_v38, %s4209_s25 }
0x1ce6   :  { %1886 = vrot.lane.b32.xlu1 %v1884_v8, %s4209_s25 }
0x1d57   :  { %v1963_v42 = vpop.permute.xlu0 %1962 }
0x1d58   :  { %v4870_v44 = vadd.f32 %v1963_v42, %v1955_v40  ;;  %v1887_v45 = vpop.permute.xlu1 %1886 }
0x1d59   :  { %v4872_v48 = vadd.f32 %v1887_v45, %v1879_v43 }
0x1d5a   :  { %4122 = vtanh.f32 %v4870_v44 }
0x1d5b   :  { %4124 = vtanh.f32 %v4872_v48  ;;  %v2105_v8 = vrot.slane %v4872_v48, 6 }
0x1d64   :  { %v4123_v50 = vpop.eup %4122 }
0x1d65   :  { %v4125_v6 = vpop.eup %4124  ;;  %1968 = vrot.lane.b32.xlu0 %v4123_v50, %s4205_s0 }
0x1d66   :  { %1892 = vrot.lane.b32.xlu1 %v4125_v6, %s4205_s0 }
0x1dd7   :  { %v1969_v39 = vpop.permute.xlu0 %1968 }
0x1dd8   :  { %v1971_v51 = vmul.f32 %v1969_v39, %v1954_v34  ;;  %v1893_v41 = vpop.permute.xlu1 %1892 }
0x1dd9   :  { %v1895_v52 = vmul.f32 %v1893_v41, %v1875_v37 }
0x1dda   :  { %1973 = vrot.lane.b32.xlu0 %v1971_v51, %s4209_s25  ;;  %v2128_v56 = vrot.slane %v1971_v51, 4 }
0x1ddb   :  { %v2048_v36 = vpack.c.bf16 %v1895_v52, %v1895_v52  ;;  %2125 = vrot.lane.b32.xlu1 %v1895_v52, %s4209_s25 }
0x1ddd   :  { %v2050_v57 = vrot.slane %v2048_v36, 2 }
0x1dde   :  { %2129 = vrot.lane.b32.xlu0 %v2128_v56, %s4205_s0 }
0x1ddf   :  { %2051 = vrot.lane.b32.xlu1 %v2050_v57, %s4209_s25 }
0x1e4c   :  { %v1974_v58 = vpop.permute.xlu0 %1973 }
0x1e4d   :  { %3795 = vmatmul.mubr.msk.f32.vlgmr.msra.gmra.mrb[40].mxu1 %vm321_vm8, %v1974_v58  ;;  %v2126_v60 = vpop.permute.xlu1 %2125 }
0x1e4e   :  { %3798 = vmatpush3.bf16.msra.mxu1 %v4676_v63  ;;  %3801 = vmatprep.mubr.msk.bf16.mxu1 %vm4207_vm7, %v4206_v23 }
0x1e4f   :  { %3799 = vmatprep.subr.bf16.mxu1 %v4206_v23 }
0x1e50   :  { %v2130_v61 = vpop.permute.xlu0 %2129 }
0x1e51   :  { %v2132_v62 = vsel %vm321_vm8, %v2126_v60, %v2130_v61  ;;  %v2052_v4 = vpop.permute.xlu1 %2051 }
0x1e52   :  { %v2133_v21 = vpack.c.bf16 %v2132_v62, %v2132_v62  ;;  %3800 = vmatpush3.bf16.msra.mxu1 %v4684_v0 }
0x1e53   :  { %3987 = vmatprep.subr.bf16.mxu1 %v4210_v46 }
0x1e54   :  { %v2135_v1 = vrot.slane %v2133_v21, 2 }
0x1e55   :  { %3802 = vmatmul.mubr.msk.bf16.vlgmr.msra.gmra.mrb[44].mxu1 %vm321_vm8, %v2052_v4 }
0x1e56   :  { %3814 = vmatmul.mubr.msk.bf16.vlgmr.msra.gmra.mrb[48].mxu0 %vm569_vm9, %v2135_v1  ;;  %3989 = vmatpush3.bf16.msra.mxu1 %v4810_v47 }
0x1e57   :  { %3837 = vmatpush3.bf16.msra.mxu0 %v4732_v53  ;;  %3990 = vmatprep.subr.bf16.mxu1 %v4210_v46 }
0x1e58   :  { %3838 = vmatprep.subr.bf16.mxu0 %v4206_v23  ;;  %3825 = vmatprep.mubr.msk.f32.mxu1 %vm4207_vm7, %v4206_v23 }
0x1e59   :  { %3844 = vmatprep.mubr.msk.bf16.mxu0 %vm4207_vm7, %v4206_v23 }
0x1e5a   :  { %3992 = vmatpush3.bf16.msra.mxu1 %v4816_v49 }
0x1e5b   :  { %3839 = vmatpush3.bf16.msra.mxu0 %v4738_v54  ;;  %3828 = vmatprep.subr.bf16.mxu1 %v4206_v23 }
0x1e5c   :  { %3840 = vmatprep.subr.bf16.mxu0 %v4206_v23 }
0x1e5f   :  { %3841 = vmatpush3.bf16.msra.mxu0 %v4745_v55 }
0x1e60   :  { %3842 = vmatprep.subr.bf16.mxu0 %v4206_v23 }
0x1e63   :  { %3843 = vmatpush3.bf16.msra.mxu0 %v4755_v59 }
0x1e64   :  { %3867 = vmatprep.subr.bf16.mxu0 %v4206_v23 }
0x1f20   :  { %v2043_v24 = vpop.f32.mrb[40].mxu1 }
0x1f21   :  { %v2044_v7 = vadd.f32 %v4851_v5, %v2043_v24  ;;  %v3796_v9 = vpop.f32.mrb[41].mxu1 }
0x1f23   :  { %2047 = vst.msk [vmem:[%s5211_s14 + $0x2] sm:$0x3] %vm1818_vm10, %v2044_v7 }
0x1f28   :  { %v2090_v10 = vpop.f32.mrb[44].mxu1 }
0x1f29   :  { %v2097_v11 = vrot.slane %v2090_v10, 2  ;;  %v3803_v12 = vpop.f32.mrb[45].mxu1  ;;  %v2173_v14 = vpop.f32.mrb[48].mxu0 }
0x1f2a   :  { %v2093_v16 = vpop.f32.mrb[46].mxu1  ;;  %v2174_v17 = vadd.f32 %v4779_v15, %v2173_v14  ;;  %v3815_v18 = vpop.f32.mrb[49].mxu0 }
0x1f2b   :  { %v2099_v20 = vadd.f32 %v2097_v11, %v4705_v19  ;;  %v3804_v26 = vpop.f32.mrb[47].mxu1  ;;  %v2176_v27 = vpop.f32.mrb[50].mxu0 }
0x1f2c   :  { %4126 = vtanh.f32 %v2174_v17  ;;  %v3816_v28 = vpop.f32.mrb[51].mxu0 }
0x1f2d   :  { %4128 = vtanh.f32 %v2099_v20 }
0x1f36   :  { %v4127_v29 = vpop.eup %4126 }
0x1f37   :  { %v4129_v30 = vpop.eup %4128  ;;  %v2180_v31 = vmul.f32 0.5, %v4127_v29 }
0x1f38   :  { %v2101_v32 = vmul.f32 0.5, %v4129_v30 }
0x1f39   :  { %v2181_v22 = vadd.f32 0.5, %v2180_v31 }
0x1f3a   :  { %v2102_v35 = vadd.f32 0.5, %v2101_v32 }
0x1f3b   :  { %v2182_v34 = vsel %vm4315_vm4, %v4127_v29, %v2181_v22 }
0x1f3c   :  { %2185 = vrot.lane.b32.xlu0 %v2182_v34, %s4205_s0  ;;  %v2103_v37 = vsel %vm4315_vm4, %v4129_v30, %v2102_v35  ;;  %v2183_v3 = vmul.f32 %v2182_v34, %v4870_v44 }
0x1f3d   :  { %2109 = vrot.lane.b32.xlu1 %v2103_v37, %s4205_s0  ;;  %v2107_v42 = vmul.f32 %v2105_v8, %v2103_v37 }
0x1fae   :  { %v2186_v19 = vpop.permute.xlu0 %2185 }
0x1faf   :  { %v2188_v25 = vmul.f32 %v2186_v19, %v2182_v34  ;;  %v2110_v38 = vpop.permute.xlu1 %2109 }
0x1fb0   :  { %v2112_v2 = vmul.f32 %v2110_v38, %v2103_v37 }
0x1fb1   :  { %2190 = vrot.lane.b32.xlu0 %v2188_v25, %s4209_s25 }
0x1fb2   :  { %2114 = vrot.lane.b32.xlu1 %v2112_v2, %s4209_s25 }
0x2023   :  { %v2191_v40 = vpop.permute.xlu0 %2190 }
0x2024   :  { %v4925_v43 = vadd.f32 %v2191_v40, %v2183_v3  ;;  %v2115_v45 = vpop.permute.xlu1 %2114 }
0x2025   :  { %v4927_v50 = vadd.f32 %v2115_v45, %v2107_v42 }
0x2026   :  { %4130 = vtanh.f32 %v4925_v43 }
0x2027   :  { %4132 = vtanh.f32 %v4927_v50  ;;  %v2330_v3 = vrot.slane %v4927_v50, 6 }
0x2030   :  { %v4131_v6 = vpop.eup %4130 }
0x2031   :  { %v4133_v39 = vpop.eup %4132  ;;  %2196 = vrot.lane.b32.xlu0 %v4131_v6, %s4205_s0 }
0x2032   :  { %2120 = vrot.lane.b32.xlu1 %v4133_v39, %s4205_s0 }
0x20a3   :  { %v2197_v48 = vpop.permute.xlu0 %2196 }
0x20a4   :  { %v2199_v51 = vmul.f32 %v2197_v48, %v2182_v34  ;;  %v2121_v44 = vpop.permute.xlu1 %2120 }
0x20a5   :  { %v2123_v41 = vmul.f32 %v2121_v44, %v2103_v37 }
0x20a6   :  { %v2353_v52 = vrot.slane %v2199_v51, 2 }
0x20a7   :  { %v2276_v36 = vpack.c.bf16 %v2123_v41, %v2123_v41  ;;  %2350 = vrot.lane.b32.xlu0 %v2123_v41, %s4209_s25 }
0x20a8   :  { %2354 = vrot.lane.b32.xlu1 %v2353_v52, %s4205_s0 }
0x20a9   :  { %v2278_v56 = vrot.slane %v2276_v36, 3 }
0x20ab   :  { %2201 = vrot.lane.b32.xlu0 %v2199_v51, %s4209_s25 }
0x20ac   :  { %2279 = vrot.lane.b32.xlu1 %v2278_v56, %s4209_s25 }
0x2119   :  { %v2351_v57 = vpop.permute.xlu0 %2350 }
0x211a   :  { %v2355_v58 = vpop.permute.xlu1 %2354 }
0x211b   :  { %v2357_v60 = vsel %vm321_vm8, %v2351_v57, %v2355_v58 }
0x211c   :  { %v2358_v61 = vpack.c.bf16 %v2357_v60, %v2357_v60 }
0x211d   :  { %v2202_v62 = vpop.permute.xlu0 %2201 }
0x211e   :  { %v2360_v21 = vrot.slane %v2358_v61, 3  ;;  %3826 = vmatmul.mubr.msk.f32.vlgmr.msra.gmra.mrb[42].mxu1 %vm321_vm8, %v2202_v62  ;;  %v2280_v1 = vpop.permute.xlu1 %2279 }
0x211f   :  { %3829 = vmatpush3.bf16.msra.mxu1 %v4676_v63  ;;  %3832 = vmatprep.mubr.msk.bf16.mxu1 %vm4207_vm7, %v4206_v23 }
0x2120   :  { %3830 = vmatprep.subr.bf16.mxu1 %v4206_v23  ;;  %3845 = vmatmul.mubr.msk.bf16.vlgmr.msra.gmra.mrb[52].mxu0 %vm569_vm9, %v2360_v21 }
0x2121   :  { %3868 = vmatpush3.bf16.msra.mxu0 %v4732_v53  ;;  %3875 = vmatprep.mubr.msk.bf16.mxu0 %vm4207_vm7, %v4206_v23 }
0x2122   :  { %3869 = vmatprep.subr.bf16.mxu0 %v4206_v23 }
0x2123   :  { %3831 = vmatpush3.bf16.msra.mxu1 %v4684_v0 }
0x2124   :  { %3993 = vmatprep.subr.bf16.mxu1 %v4210_v46 }
0x2125   :  { %3870 = vmatpush3.bf16.msra.mxu0 %v4738_v54 }
0x2126   :  { %3833 = vmatmul.mubr.msk.bf16.vlgmr.msra.gmra.mrb[48].mxu1 %vm321_vm8, %v2280_v1  ;;  %3871 = vmatprep.subr.bf16.mxu0 %v4206_v23 }
0x2127   :  { %3995 = vmatpush3.bf16.msra.mxu1 %v4810_v47  ;;  %3856 = vmatprep.mubr.msk.f32.mxu1 %vm4207_vm7, %v4206_v23 }
0x2128   :  { %3996 = vmatprep.subr.bf16.mxu1 %v4210_v46 }
0x2129   :  { %3872 = vmatpush3.bf16.msra.mxu0 %v4745_v55 }
0x212a   :  { %3873 = vmatprep.subr.bf16.mxu0 %v4206_v23 }
0x212b   :  { %3998 = vmatpush3.bf16.msra.mxu1 %v4816_v49 }
0x212c   :  { %3859 = vmatprep.subr.bf16.mxu1 %v4206_v23 }
0x212d   :  { %3874 = vmatpush3.bf16.msra.mxu0 %v4755_v59 }
0x212e   :  { %3898 = vmatprep.subr.bf16.mxu0 %v4206_v23 }
0x21f1   :  { %v2271_v4 = vpop.f32.mrb[42].mxu1 }
0x21f2   :  { %v2272_v24 = vadd.f32 %v4851_v5, %v2271_v4  ;;  %v3827_v7 = vpop.f32.mrb[43].mxu1 }
0x21f3   :  { %v2398_v9 = vpop.f32.mrb[52].mxu0 }
0x21f4   :  { %2275 = vst.msk [vmem:[%s5211_s14 + $0x4] sm:$0x3] %vm1818_vm10, %v2272_v24  ;;  %v2399_v10 = vadd.f32 %v4779_v15, %v2398_v9  ;;  %v3846_v11 = vpop.f32.mrb[53].mxu0 }
0x21f5   :  { %v2401_v12 = vpop.f32.mrb[54].mxu0 }
0x21f6   :  { %4134 = vtanh.f32 %v2399_v10  ;;  %v3847_v14 = vpop.f32.mrb[55].mxu0 }
0x21f9   :  { %v2318_v16 = vpop.f32.mrb[48].mxu1 }
0x21fa   :  { %v2324_v17 = vadd.f32 %v2318_v16, %v4371_v33  ;;  %v3834_v18 = vpop.f32.mrb[49].mxu1 }
0x21fb   :  { %v2321_v20 = vpop.f32.mrb[50].mxu1 }
0x21fc   :  { %4136 = vtanh.f32 %v2324_v17  ;;  %v3835_v26 = vpop.f32.mrb[51].mxu1 }
0x2200   :  { %v4135_v27 = vpop.eup %4134 }
0x2201   :  { %v2405_v28 = vmul.f32 0.5, %v4135_v27 }
0x2203   :  { %v2406_v29 = vadd.f32 0.5, %v2405_v28 }
0x2205   :  { %v2407_v30 = vsel %vm4315_vm4, %v4135_v27, %v2406_v29 }
0x2206   :  { %v4137_v31 = vpop.eup %4136  ;;  %2410 = vrot.lane.b32.xlu0 %v2407_v30, %s4205_s0  ;;  %v2408_v38 = vmul.f32 %v2407_v30, %v4925_v43 }
0x2207   :  { %v2326_v32 = vmul.f32 0.5, %v4137_v31 }
0x2209   :  { %v2327_v22 = vadd.f32 0.5, %v2326_v32 }
0x220b   :  { %v2328_v35 = vsel %vm4315_vm4, %v4137_v31, %v2327_v22 }
0x220c   :  { %2334 = vrot.lane.b32.xlu1 %v2328_v35, %s4205_s0  ;;  %v2332_v40 = vmul.f32 %v2330_v3, %v2328_v35 }
0x2278   :  { %v2411_v34 = vpop.permute.xlu0 %2410 }
0x2279   :  { %v2413_v37 = vmul.f32 %v2411_v34, %v2407_v30 }
0x227b   :  { %2415 = vrot.lane.b32.xlu0 %v2413_v37, %s4209_s25 }
0x227e   :  { %v2335_v19 = vpop.permute.xlu1 %2334 }
0x227f   :  { %v2337_v25 = vmul.f32 %v2335_v19, %v2328_v35 }
0x2281   :  { %2339 = vrot.lane.b32.xlu1 %v2337_v25, %s4209_s25 }
0x22ed   :  { %v2416_v2 = vpop.permute.xlu0 %2415 }
0x22ee   :  { %v4979_v8 = vadd.f32 %v2416_v2, %v2408_v38 }
0x22f0   :  { %4138 = vtanh.f32 %v4979_v8 }
0x22f3   :  { %v2340_v42 = vpop.permute.xlu1 %2339 }
0x22f4   :  { %v4983_v45 = vadd.f32 %v2340_v42, %v2332_v40 }
0x22f6   :  { %4140 = vtanh.f32 %v4983_v45 }
0x22fa   :  { %v4139_v6 = vpop.eup %4138 }
0x22fb   :  { %2421 = vrot.lane.b32.xlu0 %v4139_v6, %s4205_s0 }
0x2300   :  { %v4141_v39 = vpop.eup %4140 }
0x2301   :  { %2345 = vrot.lane.b32.xlu1 %v4141_v39, %s4205_s0 }
0x236d   :  { %v2422_v43 = vpop.permute.xlu0 %2421 }
0x236e   :  { %v2424_v48 = vmul.f32 %v2422_v43, %v2407_v30 }
0x2370   :  { %2426 = vrot.lane.b32.xlu0 %v2424_v48, %s4209_s25 }
0x2373   :  { %v2346_v51 = vpop.permute.xlu1 %2345 }
0x2374   :  { %v2348_v50 = vmul.f32 %v2346_v51, %v2328_v35  ;;  %2580 = vrot.lane.b32.xlu0 %v2424_v48, %s4205_s0  ;;  %v2557_v35 = vrot.slane %v4983_v45, 6  ;;  %v5051_v51 = vld [vmem:[%s5206_s9] sm:$0xff]  }
0x2376   :  { %2577 = vrot.lane.b32.xlu1 %v2348_v50, %s4209_s25  ;;  %v2501_v44 = vpack.c.bf16 %v2348_v50, %v2348_v50 }
0x237a   :  { %2503 = vrot.lane.b32.xlu1 %v2501_v44, %s4209_s25 }
0x23e2   :  { %v2427_v41 = vpop.permute.xlu0 %2426 }
0x23e3   :  { %3857 = vmatmul.mubr.msk.f32.vlgmr.msra.gmra.mrb[52].mxu1 %vm321_vm8, %v2427_v41 }
0x23e4   :  { %3860 = vmatpush3.bf16.msra.mxu1 %v4676_v63  ;;  %3863 = vmatprep.mubr.msk.bf16.mxu1 %vm4207_vm7, %v4206_v23 }
0x23e5   :  { %3861 = vmatprep.subr.bf16.mxu1 %v4206_v23 }
0x23e6   :  { %v2581_v52 = vpop.permute.xlu0 %2580 }
0x23e8   :  { %v2578_v36 = vpop.permute.xlu1 %2577  ;;  %3862 = vmatpush3.bf16.msra.mxu1 %v4684_v0 }
0x23e9   :  { %v2583_v56 = vsel %vm321_vm8, %v2578_v36, %v2581_v52  ;;  %3999 = vmatprep.subr.bf16.mxu1 %v4210_v46  ;;  %v5061_v36 = vld [vmem:[%s5206_s9 + $0x8] sm:$0xff]  }
0x23ea   :  { %v2584_v57 = vpack.c.bf16 %v2583_v56, %v2583_v56 }
0x23ec   :  { %3876 = vmatmul.mubr.msk.bf16.vlgmr.msra.gmra.mrb[56].mxu0 %vm569_vm9, %v2584_v57  ;;  %v2504_v58 = vpop.permute.xlu1 %2503 }
0x23ed   :  { %3864 = vmatmul.mubr.msk.bf16.vlgmr.msra.gmra.mrb[56].mxu1 %vm321_vm8, %v2504_v58  ;;  %3899 = vmatpush3.bf16.msra.mxu0 %v4732_v53 }
0x23ee   :  { %4001 = vmatpush3.bf16.msra.mxu1 %v4810_v47  ;;  %3900 = vmatprep.subr.bf16.mxu0 %v4206_v23 }
0x23ef   :  { %4002 = vmatprep.subr.bf16.mxu1 %v4210_v46  ;;  %3887 = vmatprep.mubr.msk.f32.mxu1 %vm4207_vm7, %v4206_v23 }
0x23f0   :  { %3906 = vmatprep.mubr.msk.bf16.mxu0 %vm4207_vm7, %v4206_v23 }
0x23f1   :  { %3901 = vmatpush3.bf16.msra.mxu0 %v4738_v54 }
0x23f2   :  { %4004 = vmatpush3.bf16.msra.mxu1 %v4816_v49  ;;  %3902 = vmatprep.subr.bf16.mxu0 %v4206_v23 }
0x23f3   :  { %3890 = vmatprep.subr.bf16.mxu1 %v4206_v23 }
0x23f5   :  { %3903 = vmatpush3.bf16.msra.mxu0 %v4745_v55 }
0x23f6   :  { %3904 = vmatprep.subr.bf16.mxu0 %v4206_v23 }
0x23f9   :  { %3905 = vmatpush3.bf16.msra.mxu0 %v4755_v59 }
0x23fa   :  { %3929 = vmatprep.subr.bf16.mxu0 %v4206_v23 }
0x24b6   :  { %v2496_v63 = vpop.f32.mrb[52].mxu1 }
0x24b7   :  { %v2497_v0 = vadd.f32 %v4851_v5, %v2496_v63  ;;  %v3858_v60 = vpop.f32.mrb[53].mxu1 }
0x24b9   :  { %2500 = vst.msk [vmem:[%s5211_s14 + $0x6] sm:$0x3] %vm1818_vm10, %v2497_v0 }
0x24bf   :  { %v2622_v61 = vpop.f32.mrb[56].mxu0 }
0x24c0   :  { %v2623_v62 = vadd.f32 %v4779_v15, %v2622_v61  ;;  %v2542_v21 = vpop.f32.mrb[56].mxu1  ;;  %v3877_v1 = vpop.f32.mrb[57].mxu0 }
0x24c1   :  { %v2549_v4 = vrot.slane %v2542_v21, 6  ;;  %v3865_v24 = vpop.f32.mrb[57].mxu1  ;;  %v2625_v7 = vpop.f32.mrb[58].mxu0 }
0x24c2   :  { %4142 = vtanh.f32 %v2623_v62  ;;  %v2545_v9 = vpop.f32.mrb[58].mxu1  ;;  %v3878_v10 = vpop.f32.mrb[59].mxu0 }
0x24c3   :  { %v2551_v11 = vadd.f32 %v2549_v4, %v4371_v33  ;;  %v3866_v12 = vpop.f32.mrb[59].mxu1 }
0x24c5   :  { %4144 = vtanh.f32 %v2551_v11 }
0x24cc   :  { %v4143_v14 = vpop.eup %4142 }
0x24cd   :  { %v2629_v16 = vmul.f32 0.5, %v4143_v14 }
0x24cf   :  { %v4145_v17 = vpop.eup %4144  ;;  %v2630_v18 = vadd.f32 0.5, %v2629_v16 }
0x24d0   :  { %v2553_v20 = vmul.f32 0.5, %v4145_v17 }
0x24d1   :  { %v2631_v26 = vsel %vm4315_vm4, %v4143_v14, %v2630_v18 }
0x24d2   :  { %2634 = vrot.lane.b32.xlu0 %v2631_v26, %s4205_s0  ;;  %v2554_v27 = vadd.f32 0.5, %v2553_v20  ;;  %v2632_v22 = vmul.f32 %v2631_v26, %v4979_v8 }
0x24d4   :  { %v2555_v28 = vsel %vm4315_vm4, %v4145_v17, %v2554_v27 }
0x24d5   :  { %2561 = vrot.lane.b32.xlu1 %v2555_v28, %s4205_s0  ;;  %v2559_v19 = vmul.f32 %v2557_v35, %v2555_v28 }
0x2544   :  { %v2635_v29 = vpop.permute.xlu0 %2634 }
0x2545   :  { %v2637_v30 = vmul.f32 %v2635_v29, %v2631_v26 }
0x2547   :  { %2639 = vrot.lane.b32.xlu0 %v2637_v30, %s4209_s25  ;;  %v2562_v31 = vpop.permute.xlu1 %2561 }
0x2548   :  { %v2564_v32 = vmul.f32 %v2562_v31, %v2555_v28 }
0x254a   :  { %2566 = vrot.lane.b32.xlu1 %v2564_v32, %s4209_s25 }
0x25b9   :  { %v2640_v34 = vpop.permute.xlu0 %2639 }
0x25ba   :  { %v5035_v37 = vadd.f32 %v2640_v34, %v2632_v22 }
0x25bc   :  { %4146 = vtanh.f32 %v5035_v37  ;;  %v2567_v25 = vpop.permute.xlu1 %2566 }
0x25bd   :  { %v5038_v38 = vadd.f32 %v2567_v25, %v2559_v19 }
0x25bf   :  { %4148 = vtanh.f32 %v5038_v38  ;;  %v2782_v27 = vrot.slane %v5038_v38, 6 }
0x25c6   :  { %v4147_v2 = vpop.eup %4146 }
0x25c7   :  { %2645 = vrot.lane.b32.xlu0 %v4147_v2, %s4205_s0 }
0x25c9   :  { %v4149_v3 = vpop.eup %4148 }
0x25ca   :  { %2572 = vrot.lane.b32.xlu1 %v4149_v3, %s4205_s0 }
0x2639   :  { %v2646_v8 = vpop.permute.xlu0 %2645 }
0x263a   :  { %v2648_v40 = vmul.f32 %v2646_v8, %v2631_v26 }
0x263c   :  { %2650 = vrot.lane.b32.xlu0 %v2648_v40, %s4209_s25  ;;  %v2573_v42 = vpop.permute.xlu1 %2572  ;;  %v2805_v6 = vrot.slane %v2648_v40, 6 }
0x263d   :  { %v2575_v45 = vmul.f32 %v2573_v42, %v2555_v28 }
0x263f   :  { %v2725_v39 = vpack.c.bf16 %v2575_v45, %v2575_v45  ;;  %2802 = vrot.lane.b32.xlu1 %v2575_v45, %s4209_s25 }
0x2640   :  { %2806 = vrot.lane.b32.xlu0 %v2805_v6, %s4205_s0 }
0x2641   :  { %v2727_v43 = vrot.slane %v2725_v39, 1 }
0x2643   :  { %2728 = vrot.lane.b32.xlu1 %v2727_v43, %s4209_s25 }
0x26ae   :  { %v2651_v48 = vpop.permute.xlu0 %2650 }
0x26af   :  { %3888 = vmatmul.mubr.msk.f32.vlgmr.msra.gmra.mrb[54].mxu1 %vm321_vm8, %v2651_v48 }
0x26b0   :  { %3891 = vmatpush3.bf16.msra.mxu1 %v5051_v51  ;;  %3894 = vmatprep.mubr.msk.bf16.mxu1 %vm4207_vm7, %v4206_v23 }
0x26b1   :  { %v2803_v50 = vpop.permute.xlu1 %2802  ;;  %3892 = vmatprep.subr.bf16.mxu1 %v4206_v23 }
0x26b2   :  { %v2807_v44 = vpop.permute.xlu0 %2806 }
0x26b3   :  { %v2809_v41 = vsel %vm321_vm8, %v2803_v50, %v2807_v44 }
0x26b4   :  { %v2810_v52 = vpack.c.bf16 %v2809_v41, %v2809_v41  ;;  %3893 = vmatpush3.bf16.msra.mxu1 %v5061_v36 }
0x26b5   :  { %v2729_v56 = vpop.permute.xlu1 %2728  ;;  %4005 = vmatprep.subr.bf16.mxu1 %v4210_v46 }
0x26b6   :  { %v2812_v57 = vrot.slane %v2810_v52, 1 }
0x26b7   :  { %3895 = vmatmul.mubr.msk.bf16.vlgmr.msra.gmra.mrb[60].mxu1 %vm321_vm8, %v2729_v56 }
0x26b8   :  { %3907 = vmatmul.mubr.msk.bf16.vlgmr.msra.gmra.mrb[60].mxu0 %vm569_vm9, %v2812_v57  ;;  %4007 = vmatpush3.bf16.msra.mxu1 %v4810_v47 }
0x26b9   :  { %3930 = vmatpush3.bf16.msra.mxu0 %v4732_v53  ;;  %4008 = vmatprep.subr.bf16.mxu1 %v4210_v46 }
0x26ba   :  { %3931 = vmatprep.subr.bf16.mxu0 %v4206_v23  ;;  %3918 = vmatprep.mubr.msk.f32.mxu1 %vm4207_vm7, %v4206_v23 }
0x26bb   :  { %3937 = vmatprep.mubr.msk.bf16.mxu0 %vm4207_vm7, %v4206_v23 }
0x26bc   :  { %4010 = vmatpush3.bf16.msra.mxu1 %v4816_v49 }
0x26bd   :  { %3932 = vmatpush3.bf16.msra.mxu0 %v4738_v54  ;;  %3921 = vmatprep.subr.bf16.mxu1 %v4206_v23 }
0x26be   :  { %3933 = vmatprep.subr.bf16.mxu0 %v4206_v23 }
0x26c1   :  { %3934 = vmatpush3.bf16.msra.mxu0 %v4745_v55 }
0x26c2   :  { %3935 = vmatprep.subr.bf16.mxu0 %v4206_v23 }
0x26c5   :  { %3936 = vmatpush3.bf16.msra.mxu0 %v4755_v59 }
0x26c6   :  { %4017 = vmatprep.subr.bf16.mxu0 %v4210_v46 }
0x2782   :  { %v2720_v53 = vpop.f32.mrb[54].mxu1 }
0x2783   :  { %v2721_v58 = vadd.f32 %v4851_v5, %v2720_v53  ;;  %v3889_v63 = vpop.f32.mrb[55].mxu1 }
0x2785   :  { %2724 = vst.msk [vmem:[%s5211_s14 + $0x8] sm:$0x3] %vm1818_vm10, %v2721_v58 }
0x278a   :  { %v2767_v54 = vpop.f32.mrb[60].mxu1 }
0x278b   :  { %v2774_v0 = vrot.slane %v2767_v54, 4  ;;  %v3896_v60 = vpop.f32.mrb[61].mxu1  ;;  %v2850_v61 = vpop.f32.mrb[60].mxu0 }
0x278c   :  { %v2770_v55 = vpop.f32.mrb[62].mxu1  ;;  %v2851_v62 = vadd.f32 %v4779_v15, %v2850_v61  ;;  %v3908_v21 = vpop.f32.mrb[61].mxu0 }
0x278d   :  { %v2776_v59 = vadd.f32 %v2774_v0, %v4371_v33  ;;  %v3897_v1 = vpop.f32.mrb[63].mxu1  ;;  %v2853_v4 = vpop.f32.mrb[62].mxu0 }
0x278e   :  { %4150 = vtanh.f32 %v2851_v62  ;;  %v3909_v24 = vpop.f32.mrb[63].mxu0 }
0x278f   :  { %4152 = vtanh.f32 %v2776_v59 }
0x2798   :  { %v4151_v7 = vpop.eup %4150 }
0x2799   :  { %v4153_v9 = vpop.eup %4152  ;;  %v2857_v10 = vmul.f32 0.5, %v4151_v7 }
0x279a   :  { %v2778_v11 = vmul.f32 0.5, %v4153_v9 }
0x279b   :  { %v2858_v12 = vadd.f32 0.5, %v2857_v10 }
0x279c   :  { %v2779_v14 = vadd.f32 0.5, %v2778_v11 }
0x279d   :  { %v2859_v16 = vsel %vm4315_vm4, %v4151_v7, %v2858_v12 }
0x279e   :  { %2862 = vrot.lane.b32.xlu0 %v2859_v16, %s4205_s0  ;;  %v2780_v15 = vsel %vm4315_vm4, %v4153_v9, %v2779_v14  ;;  %v2860_v28 = vmul.f32 %v2859_v16, %v5035_v37 }
0x279f   :  { %2786 = vrot.lane.b32.xlu1 %v2780_v15, %s4205_s0  ;;  %v2784_v30 = vmul.f32 %v2782_v27, %v2780_v15 }
0x2810   :  { %v2863_v17 = vpop.permute.xlu0 %2862 }
0x2811   :  { %v2865_v18 = vmul.f32 %v2863_v17, %v2859_v16  ;;  %v2787_v20 = vpop.permute.xlu1 %2786 }
0x2812   :  { %v2789_v26 = vmul.f32 %v2787_v20, %v2780_v15 }
0x2813   :  { %2867 = vrot.lane.b32.xlu0 %v2865_v18, %s4209_s25 }
0x2814   :  { %2791 = vrot.lane.b32.xlu1 %v2789_v26, %s4209_s25 }
0x2885   :  { %v2868_v29 = vpop.permute.xlu0 %2867 }
0x2886   :  { %v5100_v31 = vadd.f32 %v2868_v29, %v2860_v28  ;;  %v2792_v32 = vpop.permute.xlu1 %2791 }
0x2887   :  { %v5102_v22 = vadd.f32 %v2792_v32, %v2784_v30  ;;  %v4176_v32 = vld [vmem:[%s5207_s10 + $0x8] sm:$0xff]  }
0x2888   :  { %4154 = vtanh.f32 %v5100_v31 }
0x2889   :  { %4156 = vtanh.f32 %v5102_v22  ;;  %v3010_v12 = vrot.slane %v5102_v22, 6 }
0x2892   :  { %v4155_v35 = vpop.eup %4154 }
0x2893   :  { %v4157_v34 = vpop.eup %4156  ;;  %2873 = vrot.lane.b32.xlu0 %v4155_v35, %s4205_s0 }
0x2894   :  { %2797 = vrot.lane.b32.xlu1 %v4157_v34, %s4205_s0 }
0x2905   :  { %v2874_v19 = vpop.permute.xlu0 %2873 }
0x2906   :  { %v2876_v25 = vmul.f32 %v2874_v19, %v2859_v16  ;;  %v2798_v37 = vpop.permute.xlu1 %2797  ;;  %v4177_v19 = vld [vmem:[%s5207_s10 + $0x10] sm:$0xff]  }
0x2907   :  { %v2800_v38 = vmul.f32 %v2798_v37, %v2780_v15  ;;  %v4178_v37 = vld [vmem:[%s5207_s10 + $0x18] sm:$0xff]  }
0x2908   :  { %v3033_v2 = vrot.slane %v2876_v25, 4 }
0x2909   :  { %v2953_v3 = vpack.c.bf16 %v2800_v38, %v2800_v38  ;;  %3030 = vrot.lane.b32.xlu0 %v2800_v38, %s4209_s25 }
0x290a   :  { %3034 = vrot.lane.b32.xlu1 %v3033_v2, %s4205_s0 }
0x290b   :  { %v2955_v8 = vrot.slane %v2953_v3, 2 }
0x290d   :  { %2878 = vrot.lane.b32.xlu0 %v2876_v25, %s4209_s25 }
0x290e   :  { %2956 = vrot.lane.b32.xlu1 %v2955_v8, %s4209_s25 }
0x297b   :  { %v3031_v40 = vpop.permute.xlu0 %3030 }
0x297c   :  { %v3035_v42 = vpop.permute.xlu1 %3034 }
0x297d   :  { %v3037_v45 = vsel %vm321_vm8, %v3031_v40, %v3035_v42 }
0x297e   :  { %v3038_v6 = vpack.c.bf16 %v3037_v45, %v3037_v45 }
0x297f   :  { %v2879_v39 = vpop.permute.xlu0 %2878 }
0x2980   :  { %v3040_v43 = vrot.slane %v3038_v6, 2  ;;  %3919 = vmatmul.mubr.msk.f32.vlgmr.msra.gmra.mrb[64].mxu1 %vm321_vm8, %v2879_v39  ;;  %v2957_v48 = vpop.permute.xlu1 %2956 }
0x2981   :  { %3922 = vmatpush3.bf16.msra.mxu1 %v5051_v51  ;;  %3925 = vmatprep.mubr.msk.bf16.mxu1 %vm4207_vm7, %v4206_v23 }
0x2982   :  { %3923 = vmatprep.subr.bf16.mxu1 %v4206_v23  ;;  %3938 = vmatmul.mubr.msk.bf16.vlgmr.msra.gmra.mrb[64].mxu0 %vm569_vm9, %v3040_v43 }
0x2983   :  { %4019 = vmatpush3.bf16.msra.mxu0 %v4810_v47  ;;  %3972 = vmatprep.mubr.msk.f32.mxu0 %vm4207_vm7, %v4206_v23 }
0x2984   :  { %4020 = vmatprep.subr.bf16.mxu0 %v4210_v46 }
0x2985   :  { %3924 = vmatpush3.bf16.msra.mxu1 %v5061_v36 }
0x2986   :  { %4011 = vmatprep.subr.bf16.mxu1 %v4210_v46 }
0x2987   :  { %4022 = vmatpush3.bf16.msra.mxu0 %v4816_v49 }
0x2988   :  { %3926 = vmatmul.mubr.msk.bf16.vlgmr.msra.gmra.mrb[68].mxu1 %vm321_vm8, %v2957_v48 }
0x2989   :  { %4013 = vmatpush3.bf16.msra.mxu1 %v4810_v47  ;;  %3949 = vmatprep.mubr.msk.f32.mxu1 %vm4207_vm7, %v4206_v23  ;;  %v5141_v47 = vld [vmem:[%s5208_s11] ss:$0 sm:$0xff] }
0x298a   :  { %4014 = vmatprep.subr.bf16.mxu1 %v4210_v46 }
0x298d   :  { %4016 = vmatpush3.bf16.msra.mxu1 %v4816_v49 }
0x298e   :  { %3952 = vmatprep.subr.bf16.mxu1 %v4206_v23 }
0x2a53   :  { %v2948_v51 = vpop.f32.mrb[64].mxu1 }
0x2a54   :  { %v2949_v50 = vadd.f32 %v4851_v5, %v2948_v51  ;;  %v3920_v44 = vpop.f32.mrb[65].mxu1 }
0x2a55   :  { %v3078_v41 = vpop.f32.mrb[64].mxu0 }
0x2a56   :  { %2952 = vst.msk [vmem:[%s5211_s14 + $0xa] sm:$0x3] %vm1818_vm10, %v2949_v50  ;;  %v3079_v46 = vadd.f32 %v5141_v47, %v3078_v41  ;;  %v3939_v49 = vpop.f32.mrb[65].mxu0 }
0x2a57   :  { %v3081_v52 = vpop.f32.mrb[66].mxu0 }
0x2a58   :  { %4158 = vtanh.f32 %v3079_v46  ;;  %v3940_v36 = vpop.f32.mrb[67].mxu0 }
0x2a5b   :  { %v2995_v56 = vpop.f32.mrb[68].mxu1 }
0x2a5c   :  { %v3002_v57 = vrot.slane %v2995_v56, 2  ;;  %v3927_v53 = vpop.f32.mrb[69].mxu1  ;;  %v4179_v56 = vld [vmem:[#allocation2] ss:$0 sm:$0xff] }
0x2a5d   :  { %v2998_v58 = vpop.f32.mrb[70].mxu1 }
0x2a5e   :  { %v3004_v63 = vadd.f32 %v3002_v57, %v4371_v33  ;;  %v3928_v54 = vpop.f32.mrb[71].mxu1 }
0x2a60   :  { %4160 = vtanh.f32 %v3004_v63 }
0x2a62   :  { %v4159_v0 = vpop.eup %4158 }
0x2a63   :  { %v3085_v60 = vmul.f32 0.5, %v4159_v0 }
0x2a65   :  { %v3086_v61 = vadd.f32 0.5, %v3085_v60 }
0x2a67   :  { %v3087_v55 = vsel %vm4315_vm4, %v4159_v0, %v3086_v61 }
0x2a68   :  { %3090 = vrot.lane.b32.xlu0 %v3087_v55, %s4205_s0  ;;  %v3088_v9 = vmul.f32 %v3087_v55, %v5100_v31  ;;  %v4175_v31 = vld [vmem:[%s5207_s10] sm:$0xff]  }
0x2a6a   :  { %v4161_v62 = vpop.eup %4160 }
0x2a6b   :  { %v3006_v21 = vmul.f32 0.5, %v4161_v62 }
0x2a6d   :  { %v3007_v59 = vadd.f32 0.5, %v3006_v21 }
0x2a6f   :  { %v3008_v1 = vsel %vm4315_vm4, %v4161_v62, %v3007_v59 }
0x2a70   :  { %3014 = vrot.lane.b32.xlu1 %v3008_v1, %s4205_s0  ;;  %v3012_v14 = vmul.f32 %v3010_v12, %v3008_v1 }
0x2ada   :  { %v3091_v4 = vpop.permute.xlu0 %3090 }
0x2adb   :  { %v3093_v33 = vmul.f32 %v3091_v4, %v3087_v55 }
0x2add   :  { %3095 = vrot.lane.b32.xlu0 %v3093_v33, %s4209_s25 }
0x2ae2   :  { %v3015_v24 = vpop.permute.xlu1 %3014 }
0x2ae3   :  { %v3017_v7 = vmul.f32 %v3015_v24, %v3008_v1 }
0x2ae5   :  { %3019 = vrot.lane.b32.xlu1 %v3017_v7, %s4209_s25 }
0x2b4f   :  { %v3096_v10 = vpop.permute.xlu0 %3095 }
0x2b50   :  { %v3098_v11 = vadd.f32 %v3096_v10, %v3088_v9 }
0x2b52   :  { %4162 = vtanh.f32 %v3098_v11 }
0x2b57   :  { %v3020_v16 = vpop.permute.xlu1 %3019 }
0x2b58   :  { %v3022_v15 = vadd.f32 %v3020_v16, %v3012_v14 }
0x2b5a   :  { %4164 = vtanh.f32 %v3022_v15 }
0x2b5c   :  { %v4163_v17 = vpop.eup %4162 }
0x2b5d   :  { %3101 = vrot.lane.b32.xlu0 %v4163_v17, %s4205_s0 }
0x2b64   :  { %v4165_v18 = vpop.eup %4164 }
0x2b65   :  { %3025 = vrot.lane.b32.xlu1 %v4165_v18, %s4205_s0 }
0x2bcf   :  { %v3102_v20 = vpop.permute.xlu0 %3101 }
0x2bd0   :  { %v3104_v26 = vmul.f32 %v3102_v20, %v3087_v55 }
0x2bd2   :  { %3106 = vrot.lane.b32.xlu0 %v3104_v26, %s4209_s25  ;;  %v3185_v27 = vrot.slane %v3104_v26, 2 }
0x2bd6   :  { %3186 = vrot.lane.b32.xlu0 %v3185_v27, %s4205_s0 }
0x2bd7   :  { %v3026_v28 = vpop.permute.xlu1 %3025 }
0x2bd8   :  { %v3028_v29 = vmul.f32 %v3026_v28, %v3008_v1 }
0x2bda   :  { %3182 = vrot.lane.b32.xlu1 %v3028_v29, %s4209_s25 }
0x2c44   :  { %v3107_v30 = vpop.permute.xlu0 %3106 }
0x2c45   :  { %3950 = vmatmul.mubr.msk.f32.vlgmr.msra.gmra.mrb[66].mxu1 %vm321_vm8, %v3107_v30 }
0x2c46   :  { %3953 = vmatpush3.bf16.msra.mxu1 %v4175_v31  ;;  %3960 = vmatprep.mubr.msk.bf16.mxu1 %vm4207_vm7, %v4206_v23 }
0x2c47   :  { %3954 = vmatprep.subr.bf16.mxu1 %v4206_v23 }
0x2c48   :  { %v3187_v22 = vpop.permute.xlu0 %3186 }
0x2c4a   :  { %3955 = vmatpush3.bf16.msra.mxu1 %v4176_v32 }
0x2c4b   :  { %3956 = vmatprep.subr.bf16.mxu1 %v4206_v23 }
0x2c4c   :  { %v3183_v35 = vpop.permute.xlu1 %3182 }
0x2c4d   :  { %v3189_v34 = vsel %vm321_vm8, %v3183_v35, %v3187_v22 }
0x2c4e   :  { %3957 = vmatpush3.bf16.msra.mxu1 %v4177_v19  ;;  %v3190_v25 = vpack.c.bf16 %v3189_v34, %v3189_v34 }
0x2c4f   :  { %3958 = vmatprep.subr.bf16.mxu1 %v4206_v23 }
0x2c50   :  { %v3192_v38 = vrot.slane %v3190_v25, 3 }
0x2c52   :  { %3959 = vmatpush3.bf16.msra.mxu1 %v4178_v37 }
0x2c55   :  { %3961 = vmatmul.mubr.msk.bf16.vlgmr.msra.gmra.mrb[72].mxu1 %vm569_vm9, %v3192_v38 }
0x2d18   :  { %v3176_v2 = vpop.f32.mrb[66].mxu1 }
0x2d19   :  { %v3177_v3 = vadd.f32 %v4851_v5, %v3176_v2  ;;  %v3951_v8 = vpop.f32.mrb[67].mxu1 }
0x2d1b   :  { %3180 = vst.msk [vmem:[%s5211_s14 + $0xc] sm:$0x3] %vm1818_vm10, %v3177_v3 }
0x2d28   :  { %v3230_v40 = vpop.f32.mrb[72].mxu1 }
0x2d29   :  { %v3231_v23 = vadd.f32 %v5141_v47, %v3230_v40  ;;  %v3962_v42 = vpop.f32.mrb[73].mxu1 }
0x2d2a   :  { %v3233_v45 = vpop.f32.mrb[74].mxu1 }
0x2d2b   :  { %4166 = vtanh.f32 %v3231_v23  ;;  %v3963_v6 = vpop.f32.mrb[75].mxu1 }
0x2d35   :  { %v4167_v39 = vpop.eup %4166 }
0x2d36   :  { %v3237_v43 = vmul.f32 0.5, %v4167_v39 }
0x2d38   :  { %v3238_v48 = vadd.f32 0.5, %v3237_v43 }
0x2d3a   :  { %v3239_v51 = vsel %vm4315_vm4, %v4167_v39, %v3238_v48 }
0x2d3b   :  { %3242 = vrot.lane.b32.xlu1 %v3239_v51, %s4205_s0  ;;  %v3240_v44 = vmul.f32 %v3239_v51, %v3098_v11 }
0x2dad   :  { %v3243_v5 = vpop.permute.xlu1 %3242 }
0x2dae   :  { %v3245_v50 = vmul.f32 %v3243_v5, %v3239_v51 }
0x2db0   :  { %3247 = vrot.lane.b32.xlu0 %v3245_v50, %s4209_s25 }
0x2e22   :  { %v3248_v41 = vpop.permute.xlu0 %3247 }
0x2e23   :  { %v3250_v46 = vadd.f32 %v3248_v41, %v3240_v44 }
0x2e25   :  { %4168 = vtanh.f32 %v3250_v46 }
0x2e2f   :  { %v4169_v47 = vpop.eup %4168 }
0x2e30   :  { %3253 = vrot.lane.b32.xlu1 %v4169_v47, %s4205_s0 }
0x2ea2   :  { %v3254_v49 = vpop.permute.xlu1 %3253 }
0x2ea3   :  { %v3256_v52 = vmul.f32 %v3254_v49, %v3239_v51 }
0x2ea5   :  { %3258 = vrot.lane.b32.xlu0 %v3256_v52, %s4209_s25 }
0x2f17   :  { %v3259_v36 = vpop.permute.xlu0 %3258 }
0x2f18   :  { %3973 = vmatmul.mubr.msk.f32.vlgmr.msra.gmra.mrb[2].mxu0 %vm321_vm8, %v3259_v36 }
0x2feb   :  { %v3328_v13 = vpop.f32.mrb[2].mxu0 }
0x2fec   :  { %v3329_v57 = vadd.f32 %v4179_v56, %v3328_v13  ;;  %v3974_v53 = vpop.f32.mrb[3].mxu0 }
0x2fee   :  { %3332 = vst.msk [vmem:[%s5211_s14 + $0xe] sm:$0x3] %vm1818_vm10, %v3329_v57 }
0x2fef   :  { %3337 = vsyncpa [#allocation4], 1 }

</bundles_post_ra>
